<compile_context>
chip_gen: v7x
topology: tpu7x:2x2x1
jax: 0.10.0
libtpu: 0.0.40
codegen_flags: <defaults>
</compile_context>

<pallas_src>
import jax
import jax.numpy as jnp
import numpy as np
from jax.experimental import pallas as pl
from jax.experimental.pallas import tpu as pltpu

LANE = 128  # TPU vreg lane width; channels are padded to this


def _res_kernel(xp_ref, w1_ref, b1_ref, w2_ref, b2_ref, w3_ref, b3_ref, o_ref):
    # xp_ref : (1, H+2, W+2, Cp)  zero-padded bf16 input tile (channels padded to 128)
    # w1_ref : (9*Cp, Kp) bf16    conv1 3x3 weights, im2col-packed, BN1 folded
    # w2_ref : (9*Kp, Kp) bf16    conv2 3x3 weights, im2col-packed, BN2 folded
    # w3_ref : (Cp, Kp)   bf16    conv3 1x1 weights, BN3 folded
    # b*_ref : (1, Kp)    f32     folded biases
    # o_ref  : (1, H, W, Kp) f32  output (padded channels; wrapper slices to Cout)
    H = o_ref.shape[1]
    W = o_ref.shape[2]
    Cp = xp_ref.shape[3]
    Kp = o_ref.shape[3]

    xp = xp_ref[0]                                            # (H+2, W+2, Cp) bf16

    # ---- conv1 (3x3) + BN1 (folded) + ReLU : one im2col matmul, K = 9*Cp ----
    taps1 = [xp[dy:dy + H, dx:dx + W, :].reshape(H * W, Cp)
             for dy in range(3) for dx in range(3)]
    p1 = jnp.concatenate(taps1, axis=1)                       # (H*W, 9*Cp) bf16
    y1 = jnp.dot(p1, w1_ref[...], preferred_element_type=jnp.float32)
    y1 = jnp.maximum(y1 + b1_ref[...], 0.0)                   # (H*W, Kp) f32

    # Zero-padded intermediate for conv2, built by value (no scratch zero-fill,
    # no masked partial store, nothing persists across grid iterations).
    y1b = y1.astype(jnp.bfloat16).reshape(H, W, Kp)
    zrow = jnp.zeros((1, W, Kp), jnp.bfloat16)
    zcol = jnp.zeros((H + 2, 1, Kp), jnp.bfloat16)
    y1p = jnp.concatenate([zrow, y1b, zrow], axis=0)          # (H+2, W,   Kp)
    y1p = jnp.concatenate([zcol, y1p, zcol], axis=1)          # (H+2, W+2, Kp)

    # ---- conv2 (3x3) + BN2 (folded) : one im2col matmul, K = 9*Kp ----
    taps2 = [y1p[dy:dy + H, dx:dx + W, :].reshape(H * W, Kp)
             for dy in range(3) for dx in range(3)]
    p2 = jnp.concatenate(taps2, axis=1)                       # (H*W, 9*Kp) bf16
    y2 = jnp.dot(p2, w2_ref[...], preferred_element_type=jnp.float32) + b2_ref[...]

    # ---- conv3 (1x1) + BN3 (folded) on the original input (shortcut) ----
    xc = xp[1:H + 1, 1:W + 1, :].reshape(H * W, Cp)
    sc = jnp.dot(xc, w3_ref[...], preferred_element_type=jnp.float32) + b3_ref[...]

    # residual add + final ReLU (f32), lane-dense store
    out = jnp.maximum(y2 + sc, 0.0)
    o_ref[...] = out.reshape(1, H, W, Kp).astype(o_ref.dtype)


def _round_up(n, m):
    return ((n + m - 1) // m) * m


def res_forward(x_nhwc, w1, b1, w2, b2, w3, b3):
    """x_nhwc: (B,H,W,Cin) f32; w1/w2 HWIO (3,3,*,*); w3 HWIO (1,1,Cin,Cout).
    Weights/biases already have BatchNorm folded in (see fold_bn)."""
    B, H, W, Cin = x_nhwc.shape
    Cout = w1.shape[-1]
    Cp = _round_up(Cin, LANE)
    Kp = _round_up(Cout, LANE)

    # spatial halo + lane padding of channels; bf16 to halve HBM traffic and
    # feed the MXU its fast path
    x_pad = jnp.pad(x_nhwc, ((0, 0), (1, 1), (1, 1), (0, Cp - Cin))).astype(jnp.bfloat16)

    def pack3x3(w, cin_p):
        # (3,3,ci,co) -> zero-pad channels -> (9*cin_p, Kp) bf16 (im2col weight)
        ci, co = w.shape[2], w.shape[3]
        wp = jnp.pad(w, ((0, 0), (0, 0), (0, cin_p - ci), (0, Kp - co)))
        return wp.reshape(9 * cin_p, Kp).astype(jnp.bfloat16)

    w1k = pack3x3(w1, Cp)
    w2k = pack3x3(w2, Kp)
    w3k = jnp.pad(w3.reshape(Cin, Cout),
                  ((0, Cp - Cin), (0, Kp - Cout))).astype(jnp.bfloat16)

    def pack_bias(b):
        return jnp.pad(b, (0, Kp - Cout)).reshape(1, Kp).astype(jnp.float32)

    b1k, b2k, b3k = pack_bias(b1), pack_bias(b2), pack_bias(b3)

    out_padded = pl.pallas_call(
        _res_kernel,
        out_shape=jax.ShapeDtypeStruct((B, H, W, Kp), jnp.float32),
        grid=(B,),
        in_specs=[
            pl.BlockSpec((1, H + 2, W + 2, Cp), lambda b: (b, 0, 0, 0)),
            pl.BlockSpec((9 * Cp, Kp), lambda b: (0, 0)),
            pl.BlockSpec((1, Kp), lambda b: (0, 0)),
            pl.BlockSpec((9 * Kp, Kp), lambda b: (0, 0)),
            pl.BlockSpec((1, Kp), lambda b: (0, 0)),
            pl.BlockSpec((Cp, Kp), lambda b: (0, 0)),
            pl.BlockSpec((1, Kp), lambda b: (0, 0)),
        ],
        out_specs=pl.BlockSpec((1, H, W, Kp), lambda b: (b, 0, 0, 0)),
        compiler_params=pltpu.CompilerParams(
            dimension_semantics=("parallel",),
            vmem_limit_bytes=32 * 1024 * 1024,
        ),
    )(x_pad, w1k, b1k, w2k, b2k, w3k, b3k)

    # TODO(synk): for large feature maps (e.g. 56x56x256+), add a spatial grid
    # axis over H with a 1-row halo so per-step VMEM stays bounded (v7x 64 MiB)
    # and the pipeline gets more than B steps.
    return out_padded[..., :Cout]


def fold_bn(w_hwio, conv_b, gamma, beta, mean, var, eps=1e-5):
    """Fold eval-mode BatchNorm into conv weight (HWIO) and bias."""
    scale = gamma / jnp.sqrt(var + eps)          # (Cout,)
    w_f = w_hwio * scale                         # broadcast over last dim
    b_f = (conv_b - mean) * scale + beta
    return w_f, b_f


def ref_forward(x_nhwc, w1, b1, w2, b2, w3, b3):
    """Pure-JAX f32 reference (XLA convs) using the same folded params."""
    dn = ('NHWC', 'HWIO', 'NHWC')
    y = jax.lax.conv_general_dilated(x_nhwc, w1, (1, 1), 'SAME',
                                     dimension_numbers=dn) + b1
    y = jnp.maximum(y, 0.0)
    y = jax.lax.conv_general_dilated(y, w2, (1, 1), 'SAME',
                                     dimension_numbers=dn) + b2
    s = jax.lax.conv_general_dilated(x_nhwc, w3, (1, 1), 'SAME',
                                     dimension_numbers=dn) + b3
    return jnp.maximum(y + s, 0.0)


if __name__ == "__main__":
    B, Cin, Cout, H, W = 2, 4, 8, 16, 16
    key = jax.random.PRNGKey(0)
    ks = jax.random.split(key, 20)

    # input (PyTorch NCHW convention) -> NHWC for the kernel
    x_nchw = jax.random.normal(ks[0], (B, Cin, H, W), jnp.float32)
    x = jnp.transpose(x_nchw, (0, 2, 3, 1))

    def conv_weight(k, cout, cin, kh, kw):
        # PyTorch layout (Cout, Cin, kH, kW) -> HWIO
        w = 0.1 * jax.random.normal(k, (cout, cin, kh, kw), jnp.float32)
        return jnp.transpose(w, (2, 3, 1, 0))

    def bn_params(k, c):
        k1, k2, k3, k4 = jax.random.split(k, 4)
        gamma = 1.0 + 0.1 * jax.random.normal(k1, (c,), jnp.float32)
        beta = 0.1 * jax.random.normal(k2, (c,), jnp.float32)
        mean = 0.1 * jax.random.normal(k3, (c,), jnp.float32)
        var = 0.5 + jnp.abs(jax.random.normal(k4, (c,), jnp.float32)) * 0.1
        return gamma, beta, mean, var

    # conv1 (3x3, Cin->Cout) + BN1
    cw1 = conv_weight(ks[1], Cout, Cin, 3, 3)
    cb1 = 0.1 * jax.random.normal(ks[2], (Cout,), jnp.float32)
    w1, b1 = fold_bn(cw1, cb1, *bn_params(ks[3], Cout))
    # conv2 (3x3, Cout->Cout) + BN2
    cw2 = conv_weight(ks[4], Cout, Cout, 3, 3)
    cb2 = 0.1 * jax.random.normal(ks[5], (Cout,), jnp.float32)
    w2, b2 = fold_bn(cw2, cb2, *bn_params(ks[6], Cout))
    # conv3 (1x1, Cin->Cout) + BN3 (shortcut)
    cw3 = conv_weight(ks[7], Cout, Cin, 1, 1)
    cb3 = 0.1 * jax.random.normal(ks[8], (Cout,), jnp.float32)
    w3, b3 = fold_bn(cw3, cb3, *bn_params(ks[9], Cout))

    out = res_forward(x, w1, b1, w2, b2, w3, b3)
    out = jax.block_until_ready(out)

    ref = ref_forward(x, w1, b1, w2, b2, w3, b3)
    ref = jax.block_until_ready(ref)

    assert out.shape == (B, H, W, Cout)
    assert bool(jnp.all(jnp.isfinite(out)))
    # bf16 MXU operands vs f32 XLA reference -> allow ~1-2% tolerance
    np.testing.assert_allclose(np.asarray(out), np.asarray(ref),
                               rtol=2e-2, atol=2e-2)
    print("KERNEL_OK")
</pallas_src>

<mosaic_0001>
module attributes {stable_mosaic.version = 11 : i64} {
  func.func @_res_kernel(%arg0: i32, %arg1: memref<1x18x18x128xbf16, #tpu.memory_space<vmem>>, %arg2: memref<1152x128xbf16, #tpu.memory_space<vmem>>, %arg3: memref<1x128xf32, #tpu.memory_space<vmem>>, %arg4: memref<1152x128xbf16, #tpu.memory_space<vmem>>, %arg5: memref<1x128xf32, #tpu.memory_space<vmem>>, %arg6: memref<128x128xbf16, #tpu.memory_space<vmem>>, %arg7: memref<1x128xf32, #tpu.memory_space<vmem>>, %arg8: memref<1x16x16x128xf32, #tpu.memory_space<vmem>>) attributes {dimension_semantics = [#tpu.dimension_semantics<parallel>], iteration_bounds = array<i64: 2>, scalar_prefetch = 0 : i64, scratch_operands = 0 : i64, tpu.core_type = #tpu.core_type<tc>, window_params = [{transform_indices = @transform_0, window_bounds = array<i64: 1, 18, 18, 128>}, {pipeline_mode = #tpu.pipeline_mode<synchronous>, transform_indices = @transform_1, window_bounds = array<i64: 1152, 128>}, {pipeline_mode = #tpu.pipeline_mode<synchronous>, transform_indices = @transform_2, window_bounds = array<i64: 1, 128>}, {pipeline_mode = #tpu.pipeline_mode<synchronous>, transform_indices = @transform_3, window_bounds = array<i64: 1152, 128>}, {pipeline_mode = #tpu.pipeline_mode<synchronous>, transform_indices = @transform_4, window_bounds = array<i64: 1, 128>}, {pipeline_mode = #tpu.pipeline_mode<synchronous>, transform_indices = @transform_5, window_bounds = array<i64: 128, 128>}, {pipeline_mode = #tpu.pipeline_mode<synchronous>, transform_indices = @transform_6, window_bounds = array<i64: 1, 128>}, {transform_indices = @transform_7, window_bounds = array<i64: 1, 16, 16, 128>}]} {
    %c0 = arith.constant 0 : index
    %c0_0 = arith.constant 0 : index
    %c0_1 = arith.constant 0 : index
    %c0_2 = arith.constant 0 : index
    %0 = vector.load %arg1[%c0, %c0_0, %c0_1, %c0_2] : memref<1x18x18x128xbf16, #tpu.memory_space<vmem>>, vector<1x18x18x128xbf16>
    %1 = vector.shape_cast %0 : vector<1x18x18x128xbf16> to vector<18x18x128xbf16>
    %2 = vector.extract_strided_slice %1 {offsets = [0, 0, 0], sizes = [16, 16, 128], strides = [1, 1, 1]} : vector<18x18x128xbf16> to vector<16x16x128xbf16>
    %3 = vector.shape_cast %2 : vector<16x16x128xbf16> to vector<256x128xbf16>
    %4 = vector.extract_strided_slice %1 {offsets = [0, 1, 0], sizes = [16, 16, 128], strides = [1, 1, 1]} : vector<18x18x128xbf16> to vector<16x16x128xbf16>
    %5 = vector.shape_cast %4 : vector<16x16x128xbf16> to vector<256x128xbf16>
    %6 = vector.extract_strided_slice %1 {offsets = [0, 2, 0], sizes = [16, 16, 128], strides = [1, 1, 1]} : vector<18x18x128xbf16> to vector<16x16x128xbf16>
    %7 = vector.shape_cast %6 : vector<16x16x128xbf16> to vector<256x128xbf16>
    %8 = vector.extract_strided_slice %1 {offsets = [1, 0, 0], sizes = [16, 16, 128], strides = [1, 1, 1]} : vector<18x18x128xbf16> to vector<16x16x128xbf16>
    %9 = vector.shape_cast %8 : vector<16x16x128xbf16> to vector<256x128xbf16>
    %10 = vector.extract_strided_slice %1 {offsets = [1, 1, 0], sizes = [16, 16, 128], strides = [1, 1, 1]} : vector<18x18x128xbf16> to vector<16x16x128xbf16>
    %11 = vector.shape_cast %10 : vector<16x16x128xbf16> to vector<256x128xbf16>
    %12 = vector.extract_strided_slice %1 {offsets = [1, 2, 0], sizes = [16, 16, 128], strides = [1, 1, 1]} : vector<18x18x128xbf16> to vector<16x16x128xbf16>
    %13 = vector.shape_cast %12 : vector<16x16x128xbf16> to vector<256x128xbf16>
    %14 = vector.extract_strided_slice %1 {offsets = [2, 0, 0], sizes = [16, 16, 128], strides = [1, 1, 1]} : vector<18x18x128xbf16> to vector<16x16x128xbf16>
    %15 = vector.shape_cast %14 : vector<16x16x128xbf16> to vector<256x128xbf16>
    %16 = vector.extract_strided_slice %1 {offsets = [2, 1, 0], sizes = [16, 16, 128], strides = [1, 1, 1]} : vector<18x18x128xbf16> to vector<16x16x128xbf16>
    %17 = vector.shape_cast %16 : vector<16x16x128xbf16> to vector<256x128xbf16>
    %18 = vector.extract_strided_slice %1 {offsets = [2, 2, 0], sizes = [16, 16, 128], strides = [1, 1, 1]} : vector<18x18x128xbf16> to vector<16x16x128xbf16>
    %19 = vector.shape_cast %18 : vector<16x16x128xbf16> to vector<256x128xbf16>
    %20 = tpu.concatenate %3, %5, %7, %9, %11, %13, %15, %17, %19 in 1 : vector<256x128xbf16>, vector<256x128xbf16>, vector<256x128xbf16>, vector<256x128xbf16>, vector<256x128xbf16>, vector<256x128xbf16>, vector<256x128xbf16>, vector<256x128xbf16>, vector<256x128xbf16> -> vector<256x1152xbf16>
    %c0_3 = arith.constant 0 : index
    %c0_4 = arith.constant 0 : index
    %21 = vector.load %arg2[%c0_3, %c0_4] : memref<1152x128xbf16, #tpu.memory_space<vmem>>, vector<1152x128xbf16>
    %cst = arith.constant dense<0.000000e+00> : vector<256x128xf32>
    %22 = tpu.matmul %20, %21, %cst {dimension_numbers = #tpu.dot_dimension_numbers<[1], [0], [0], [1], [0, 0, 1, 1], [], []>} : vector<256x1152xbf16>, vector<1152x128xbf16>, vector<256x128xf32> -> vector<256x128xf32>
    %c0_5 = arith.constant 0 : index
    %c0_6 = arith.constant 0 : index
    %23 = vector.load %arg3[%c0_5, %c0_6] : memref<1x128xf32, #tpu.memory_space<vmem>>, vector<1x128xf32>
    %24 = vector.broadcast %23 : vector<1x128xf32> to vector<256x128xf32>
    %25 = arith.addf %22, %24 : vector<256x128xf32>
    %cst_7 = arith.constant 0.000000e+00 : f32
    %26 = vector.broadcast %cst_7 : f32 to vector<256x128xf32>
    %27 = arith.maximumf %25, %26 : vector<256x128xf32>
    %28 = arith.truncf %27 : vector<256x128xf32> to vector<256x128xbf16>
    %29 = vector.shape_cast %28 : vector<256x128xbf16> to vector<16x16x128xbf16>
    %cst_8 = arith.constant 0.000000e+00 : bf16
    %30 = vector.broadcast %cst_8 : bf16 to vector<1x16x128xbf16>
    %cst_9 = arith.constant 0.000000e+00 : bf16
    %31 = vector.broadcast %cst_9 : bf16 to vector<18x1x128xbf16>
    %32 = tpu.concatenate %30, %29, %30 in 0 : vector<1x16x128xbf16>, vector<16x16x128xbf16>, vector<1x16x128xbf16> -> vector<18x16x128xbf16>
    %33 = tpu.concatenate %31, %32, %31 in 1 : vector<18x1x128xbf16>, vector<18x16x128xbf16>, vector<18x1x128xbf16> -> vector<18x18x128xbf16>
    %34 = vector.extract_strided_slice %33 {offsets = [0, 0, 0], sizes = [16, 16, 128], strides = [1, 1, 1]} : vector<18x18x128xbf16> to vector<16x16x128xbf16>
    %35 = vector.shape_cast %34 : vector<16x16x128xbf16> to vector<256x128xbf16>
    %36 = vector.extract_strided_slice %33 {offsets = [0, 1, 0], sizes = [16, 16, 128], strides = [1, 1, 1]} : vector<18x18x128xbf16> to vector<16x16x128xbf16>
    %37 = vector.shape_cast %36 : vector<16x16x128xbf16> to vector<256x128xbf16>
    %38 = vector.extract_strided_slice %33 {offsets = [0, 2, 0], sizes = [16, 16, 128], strides = [1, 1, 1]} : vector<18x18x128xbf16> to vector<16x16x128xbf16>
    %39 = vector.shape_cast %38 : vector<16x16x128xbf16> to vector<256x128xbf16>
    %40 = vector.extract_strided_slice %33 {offsets = [1, 0, 0], sizes = [16, 16, 128], strides = [1, 1, 1]} : vector<18x18x128xbf16> to vector<16x16x128xbf16>
    %41 = vector.shape_cast %40 : vector<16x16x128xbf16> to vector<256x128xbf16>
    %42 = vector.extract_strided_slice %33 {offsets = [1, 1, 0], sizes = [16, 16, 128], strides = [1, 1, 1]} : vector<18x18x128xbf16> to vector<16x16x128xbf16>
    %43 = vector.shape_cast %42 : vector<16x16x128xbf16> to vector<256x128xbf16>
    %44 = vector.extract_strided_slice %33 {offsets = [1, 2, 0], sizes = [16, 16, 128], strides = [1, 1, 1]} : vector<18x18x128xbf16> to vector<16x16x128xbf16>
    %45 = vector.shape_cast %44 : vector<16x16x128xbf16> to vector<256x128xbf16>
    %46 = vector.extract_strided_slice %33 {offsets = [2, 0, 0], sizes = [16, 16, 128], strides = [1, 1, 1]} : vector<18x18x128xbf16> to vector<16x16x128xbf16>
    %47 = vector.shape_cast %46 : vector<16x16x128xbf16> to vector<256x128xbf16>
    %48 = vector.extract_strided_slice %33 {offsets = [2, 1, 0], sizes = [16, 16, 128], strides = [1, 1, 1]} : vector<18x18x128xbf16> to vector<16x16x128xbf16>
    %49 = vector.shape_cast %48 : vector<16x16x128xbf16> to vector<256x128xbf16>
    %50 = vector.extract_strided_slice %33 {offsets = [2, 2, 0], sizes = [16, 16, 128], strides = [1, 1, 1]} : vector<18x18x128xbf16> to vector<16x16x128xbf16>
    %51 = vector.shape_cast %50 : vector<16x16x128xbf16> to vector<256x128xbf16>
    %52 = tpu.concatenate %35, %37, %39, %41, %43, %45, %47, %49, %51 in 1 : vector<256x128xbf16>, vector<256x128xbf16>, vector<256x128xbf16>, vector<256x128xbf16>, vector<256x128xbf16>, vector<256x128xbf16>, vector<256x128xbf16>, vector<256x128xbf16>, vector<256x128xbf16> -> vector<256x1152xbf16>
    %c0_10 = arith.constant 0 : index
    %c0_11 = arith.constant 0 : index
    %53 = vector.load %arg4[%c0_10, %c0_11] : memref<1152x128xbf16, #tpu.memory_space<vmem>>, vector<1152x128xbf16>
    %cst_12 = arith.constant dense<0.000000e+00> : vector<256x128xf32>
    %54 = tpu.matmul %52, %53, %cst_12 {dimension_numbers = #tpu.dot_dimension_numbers<[1], [0], [0], [1], [0, 0, 1, 1], [], []>} : vector<256x1152xbf16>, vector<1152x128xbf16>, vector<256x128xf32> -> vector<256x128xf32>
    %c0_13 = arith.constant 0 : index
    %c0_14 = arith.constant 0 : index
    %55 = vector.load %arg5[%c0_13, %c0_14] : memref<1x128xf32, #tpu.memory_space<vmem>>, vector<1x128xf32>
    %56 = vector.broadcast %55 : vector<1x128xf32> to vector<256x128xf32>
    %57 = arith.addf %54, %56 : vector<256x128xf32>
    %58 = vector.extract_strided_slice %1 {offsets = [1, 1, 0], sizes = [16, 16, 128], strides = [1, 1, 1]} : vector<18x18x128xbf16> to vector<16x16x128xbf16>
    %59 = vector.shape_cast %58 : vector<16x16x128xbf16> to vector<256x128xbf16>
    %c0_15 = arith.constant 0 : index
    %c0_16 = arith.constant 0 : index
    %60 = vector.load %arg6[%c0_15, %c0_16] : memref<128x128xbf16, #tpu.memory_space<vmem>>, vector<128x128xbf16>
    %cst_17 = arith.constant dense<0.000000e+00> : vector<256x128xf32>
    %61 = tpu.matmul %59, %60, %cst_17 {dimension_numbers = #tpu.dot_dimension_numbers<[1], [0], [0], [1], [0, 0, 1, 1], [], []>} : vector<256x128xbf16>, vector<128x128xbf16>, vector<256x128xf32> -> vector<256x128xf32>
    %c0_18 = arith.constant 0 : index
    %c0_19 = arith.constant 0 : index
    %62 = vector.load %arg7[%c0_18, %c0_19] : memref<1x128xf32, #tpu.memory_space<vmem>>, vector<1x128xf32>
    %63 = vector.broadcast %62 : vector<1x128xf32> to vector<256x128xf32>
    %64 = arith.addf %61, %63 : vector<256x128xf32>
    %65 = arith.addf %57, %64 : vector<256x128xf32>
    %cst_20 = arith.constant 0.000000e+00 : f32
    %66 = vector.broadcast %cst_20 : f32 to vector<256x128xf32>
    %67 = arith.maximumf %65, %66 : vector<256x128xf32>
    %68 = vector.shape_cast %67 : vector<256x128xf32> to vector<1x16x16x128xf32>
    %c0_21 = arith.constant 0 : index
    %c0_22 = arith.constant 0 : index
    %c0_23 = arith.constant 0 : index
    %c0_24 = arith.constant 0 : index
    %69 = vector.load %arg8[%c0_21, %c0_22, %c0_23, %c0_24] : memref<1x16x16x128xf32, #tpu.memory_space<vmem>>, vector<1x16x16x128xf32>
    tpu.vector_store %arg8[%c0_21, %c0_22, %c0_23, %c0_24], %68 {strides = array<i32>} : memref<1x16x16x128xf32, #tpu.memory_space<vmem>>, vector<1x16x16x128xf32>,
    return
  }
  func.func @transform_0(%arg0: i32) -> (i32, i32, i32, i32) {
    %c0_i32 = arith.constant 0 : i32
    %c0_i32_0 = arith.constant 0 : i32
    %c0_i32_1 = arith.constant 0 : i32
    %c0_i32_2 = arith.constant 0 : i32
    return %arg0, %c0_i32, %c0_i32_0, %c0_i32_1 : i32, i32, i32, i32
  }
  func.func @transform_1(%arg0: i32) -> (i32, i32) {
    %c0_i32 = arith.constant 0 : i32
    %c0_i32_0 = arith.constant 0 : i32
    %c0_i32_1 = arith.constant 0 : i32
    return %c0_i32, %c0_i32_0 : i32, i32
  }
  func.func @transform_2(%arg0: i32) -> (i32, i32) {
    %c0_i32 = arith.constant 0 : i32
    %c0_i32_0 = arith.constant 0 : i32
    %c0_i32_1 = arith.constant 0 : i32
    return %c0_i32, %c0_i32_0 : i32, i32
  }
  func.func @transform_3(%arg0: i32) -> (i32, i32) {
    %c0_i32 = arith.constant 0 : i32
    %c0_i32_0 = arith.constant 0 : i32
    %c0_i32_1 = arith.constant 0 : i32
    return %c0_i32, %c0_i32_0 : i32, i32
  }
  func.func @transform_4(%arg0: i32) -> (i32, i32) {
    %c0_i32 = arith.constant 0 : i32
    %c0_i32_0 = arith.constant 0 : i32
    %c0_i32_1 = arith.constant 0 : i32
    return %c0_i32, %c0_i32_0 : i32, i32
  }
  func.func @transform_5(%arg0: i32) -> (i32, i32) {
    %c0_i32 = arith.constant 0 : i32
    %c0_i32_0 = arith.constant 0 : i32
    %c0_i32_1 = arith.constant 0 : i32
    return %c0_i32, %c0_i32_0 : i32, i32
  }
  func.func @transform_6(%arg0: i32) -> (i32, i32) {
    %c0_i32 = arith.constant 0 : i32
    %c0_i32_0 = arith.constant 0 : i32
    %c0_i32_1 = arith.constant 0 : i32
    return %c0_i32, %c0_i32_0 : i32, i32
  }
  func.func @transform_7(%arg0: i32) -> (i32, i32, i32, i32) {
    %c0_i32 = arith.constant 0 : i32
    %c0_i32_0 = arith.constant 0 : i32
    %c0_i32_1 = arith.constant 0 : i32
    %c0_i32_2 = arith.constant 0 : i32
    return %arg0, %c0_i32, %c0_i32_0, %c0_i32_1 : i32, i32, i32, i32
  }
}

</mosaic_0001>

<bundles_post_ra>
// kernel: tpu_custom_call.1
= control target key start
LH: loop header
LB: loop body
LE: loop exit
PB: predicated region body
PF: predicated region fallthrough
CT: control target
= control target key end

     0   :  { %12 = vsyncpa [#allocation3], 0  ;;  %s9162_s0 = inlined_call_operand.vmem [shape: bf16[2,18,18,128], index: 0, kind: input, shape index: {}]   ;;  %s9163_s1 = inlined_call_operand.vmem [shape: bf16[1152,128], index: 1, kind: input, shape index: {}]   ;;  %s9164_s2 = inlined_call_operand.vmem [shape: f32[1,128], index: 2, kind: input, shape index: {}]   ;;  %s9165_s3 = inlined_call_operand.hbm [shape: bf16[1152,128], index: 3, kind: input, shape index: {}]   ;;  %s9166_s4 = inlined_call_operand.vmem [shape: f32[1,128], index: 4, kind: input, shape index: {}]   ;;  %s9167_s5 = inlined_call_operand.vmem [shape: bf16[128,128], index: 5, kind: input, shape index: {}]   ;;  %s9168_s6 = inlined_call_operand.vmem [shape: f32[1,128], index: 6, kind: input, shape index: {}]   ;;  %s9169_s7 = inlined_call_operand.hbm [shape: f32[2,16,16,128], index: 7, kind: output, shape index: {}]  }
   0x1   :  { %13 = vsyncpa [#allocation4], 0 }
   0x2   :  { %15 = vsyncpa [#allocation4 + $0x1], 0  ;;  %s6777_s24 = smov 0   ;;  %s6779_s25 = smov 0  }
   0x3   :  { %s6781_s26 = smov 0   ;;  %s6783_s27 = smov 0  }
   0x4 LB: > { %s6798_s28 = sadd.s32 4294967295, %s6728_s27   ;;  %s4936_s29 = sadd.s32 4294967294, %s6728_s27   ;;  %s6728_s27 = sphi %s6783_s27, %s9300_s27   ;;  %s6724_s26 = sphi %s6781_s26, %s9299_s26   ;;  %s6720_s25 = sphi %s6779_s25, %s9298_s25   ;;  %s6716_s24 = sphi %s6777_s24, %s9297_s24  }
   0x5   : > { %s6802_s30 = sadd.s32 1, %s6728_s27   ;;  %s180_s8 = sadd.s32 1, %s6724_s26 }
   0x6   : > { %s177_s9 = ssub.s32 %s6728_s27, %s6802_s30  ;;  %p190_p0 = scmp.ne.s32.totalorder %s6724_s26, %s6720_s25 }
   0x7   : > { %p178_p1 = scmp.eq.s32.totalorder %s177_s9, 0  ;;  %p191_p2 = scmp.eq.s32.totalorder %s6798_s28, 1 }
   0x8   : > { %p196_p3 = scmp.ne.s32.totalorder %s6720_s25, %s6716_s24  ;;  %p197_p4 = scmp.eq.s32.totalorder %s4936_s29, 1 }
   0x9   : > { %s6813_s10 = scalar_select %p178_p1, %s6724_s26, %s180_s8  }
   0xa   : > { %p6815_p5 = por %p191_p2, %p190_p0  ;;  %p6819_p6 = por %p197_p4, %p196_p3 }
   0xb   : > { %p4937_p7 = scmp.ge.s32.totalorder %s6728_s27, 1  ;;  %p204_p8 = scmp.lt.s32.totalorder %s6728_s27, 3 }
   0xc   : > { %s9218_s11 = scalar_select %p6815_p5, 1, 0 }
   0xd   : > { %s9219_s12 = scalar_select %p6819_p6, 1, 0 }
   0xe   : > { %p9170_p9 = scmp.eq.s32.totalorder %s6798_s28, 0  ;;  %p6826_p10 = pnand %p4937_p7, %p204_p8 }
   0xf   : > { %s6730_s14 = smov [#allocation2]   ;;  %s6634_s19 = scalar_lea.hbm %s9165_s3, 9216 }
  0x10   : > { %s9220_s13 = scalar_select %p6826_p10, 1, 0 }
  0x11   : > { %s222_s15 = sshll.u32 %s6730_s14, 4  ;;  %p6408_p11 = pneg %p6826_p10  ;;  %s223_s15 = int_to_ptr.vmem [resolvable:$true] %s222_s15 }
  0x12   : > { %p6635_p13 = scmp.ne.s32.totalorder %s9165_s3, %s6634_s19  ;;  %p6641_p3 = scmp.lt.u32.totalorder %s6634_s19, %s9165_s3 }
  0x13   : > { %p6834_p12 = pnand %p9170_p9, %p6408_p11 }
  0x15   : > { %p6636_p0 = pneg %p6834_p12 }
  0x17   : > { %p6637_p1 = pnand %p6636_p0, %p6635_p13 }
  0x19   : > { %p6638_p2 = pneg %p6637_p1 }
  0x1b   : > { %p6643_p4 = pnand %p6641_p3, %p6638_p2 }
  0x1d   : > { %6646 = shalt.err (!%p6643_p4)
}
  0x1e   : > { %s6647_s29 = scalar_lea.vmem %s223_s15, 9216  ;;  %p6655_p9 = scmp.lt.s32.totalorder %s223_s15, %s223_s15 }
  0x1f   : > { %p6648_p7 = scmp.ne.s32.totalorder %s223_s15, %s6647_s29  ;;  %p6656_p6 = scmp.lt.s32.totalorder %s6647_s29, %s6647_s29 }
  0x21   : > { %p6650_p8 = pnand %p6648_p7, %p6636_p0  ;;  %p6657_p5 = por %p6656_p6, %p6655_p9 }
  0x23   : > { %p6651_p11 = pneg %p6650_p8 }
  0x25   : > { %p6658_p10 = pnand %p6657_p5, %p6651_p11 }
  0x27   : > { %6661 = shalt.err (!%p6658_p10)
}
  0x28   : > { %s6731_s8 = smov 64   ;;  %s6732_s9 = smov 4  }
  0x29   : > { %6411 = dma.hbm_to_vmem [thread:$0]  (!%p6834_p12), %s9165_s3, 9216, %s223_s15, [#allocation3], %s6731_s8, %s6731_s8, %s6732_s9  }
  0x2a   : > { %p9222_p13 = scmp.ne.s32.totalorder %s9220_s13, 0 }
  0x2c   : > { %255 = sbr.rel (%p9222_p13) target bundleno = 1213 (0x4bd), region = 48 }
  0x33   : > { %p9223_p1 = scmp.eq.s32.totalorder %s6798_s28, 0 }
  0x35   : > { %6707 = dma.done.wait (%p9223_p1), [#allocation3], 9216   ;;  %p9224_p0 = pmov %p9223_p1 }
  0x36   : > { %v6457_v0 = vld [vmem:[%s9163_s1 + $0x40] sm:$0xff]   ;;  %p287_p5 = scmp.lt.s32.totalorder %s6798_s28, 1  ;;  %v6459_v2 = vld [vmem:[%s9163_s1 + $0x48] sm:$0xff]   ;;  %v6461_v4 = vld [vmem:[%s9163_s1 + $0x50] sm:$0xff]   ;;  %vm347_vm0 = vsmask.f32 3328 }
  0x37   : > { %6709 = vsyncadd (%p9224_p0), [#allocation3], 4294958080  ;;  %v6458_v1 = vld [vmem:[%s9163_s1] sm:$0xff]   ;;  %5177 = vmatprep.subr.bf16.mxu0 %v6457_v0  ;;  %v6460_v3 = vld [vmem:[%s9163_s1 + $0x8] sm:$0xff]   ;;  %vm348_vm1 = vsmask.f32 7440 }
  0x38   : > { %5178 = vmatpush3.bf16.msra.mxu0 %v6458_v1  ;;  %s288_s8 = scalar_select %p287_p5, %s6798_s28, 1  ;;  %v6462_v5 = vld [vmem:[%s9163_s1 + $0x10] sm:$0xff]   ;;  %v6463_v6 = vld [vmem:[%s9163_s1 + $0x58] sm:$0xff]   ;;  %v6465_v8 = vld [vmem:[%s9163_s1 + $0x60] sm:$0xff]   ;;  %vm782_vm2 = vcmask 1042432   ;;  %vm783_vm3 = vcmask 1046532  }
  0x39   : > { %5179 = vmatprep.subr.bf16.mxu0 %v6459_v2  ;;  %v6464_v7 = vld [vmem:[%s9163_s1 + $0x18] sm:$0xff]   ;;  %v6466_v9 = vld [vmem:[%s9163_s1 + $0x20] sm:$0xff]   ;;  %v6467_v10 = vld [vmem:[%s9163_s1 + $0x68] sm:$0xff]   ;;  %vm2770_vm6 = vcmask 1040384   ;;  %vm2771_vm7 = vsmask.f32 256 }
  0x3a   : > { %s6401_s19 = smul.u32 216, %s288_s8  ;;  %v6468_v14 = vld [vmem:[%s9163_s1 + $0x28] sm:$0xff]   ;;  %v6469_v19 = vld [vmem:[%s9163_s1 + $0x70] sm:$0xff]   ;;  %vm6920_vm4 = vmor %vm347_vm0, %vm348_vm1  ;;  %vm2807_vm9 = vsmask.f32 7424  ;;  %vm3048_vm10 = vcmask 1046528  }
  0x3b   : > { %v6927_v28 = vld [vmem:[%s9163_s1 + $0xc0] sm:$0xff]   ;;  %vm6936_vm5 = vmor %vm782_vm2, %vm783_vm3  ;;  %v6470_v33 = vld [vmem:[%s9163_s1 + $0x30] sm:$0xff]   ;;  %s284_s8 = sand.u32 1, %s6720_s25   ;;  %p9295_p9 = scmp.ne.s32.totalorder %s9218_s11, 0 }
  0x3c   : > { %5180 = vmatpush3.bf16.msra.mxu0 %v6460_v3  ;;  %s6892_s23 = scalar_lea.vmem %s9162_s0, %s6401_s19  ;;  %v6932_v29 = vld [vmem:[%s9163_s1 + $0x80] sm:$0xff]   ;;  %6289 = vmatprep.subr.bf16.mxu1 %v6927_v28  ;;  %v6948_v37 = vld [vmem:[%s9163_s1 + $0xc8] sm:$0xff]   ;;  %v6471_v38 = vld [vmem:[%s9163_s1 + $0x78] sm:$0xff]   ;;  %s4942_s17 = sshll.u32 %s284_s8, 8 }
  0x3d   : > { %5181 = vmatprep.subr.bf16.mxu0 %v6461_v4  ;;  %v6901_v11 = vld [vmem:[%s6892_s23] sm:$0xf]  ;;  %v6904_v12 = vld [vmem:[%s6892_s23 + $0x4] sm:$0xf]  ;;  %v295_v13 = vld [vmem:[%s6892_s23 + $0x8] sm:$0x1]  ;;  %6297 = vmatpush3.bf16.msra.mxu1 %v6932_v29 }
  0x3e   : > { %v351_v15 = vshrl.u32 %v6901_v11, 16  ;;  %v354_v16 = vshll.u32 %v6901_v11, 16  ;;  %v360_v17 = vshll.u32 %v6904_v12, 16  ;;  %v364_v18 = vshrl.u32 %v6904_v12, 16  ;;  %v6959_v40 = vld [vmem:[%s6892_s23 + $0xc] sm:$0xf]  ;;  %6290 = vmatprep.subr.bf16.mxu1 %v6948_v37  ;;  %vm8075_vm8 = vmand %vm2770_vm6, %vm2771_vm7 }
  0x3f   : > { %v370_v20 = vshll.u32 %v295_v13, 16  ;;  %v787_v21 = vrot.slane %v6904_v12, 5  ;;  %v790_v22 = vrot.slane %v295_v13, 5  ;;  %v4944_v31 = vrot.slane %v6901_v11, 9  ;;  %v6962_v41 = vld [vmem:[%s6892_s23 + $0x10] sm:$0xf] }
  0x40   : > { %5182 = vmatpush3.bf16.msra.mxu0 %v6462_v5  ;;  %v353_v24 = vrot.slane %v351_v15, 4  ;;  %v356_v25 = vrot.slane %v354_v16, 5  ;;  %v362_v26 = vrot.slane %v360_v17, 5  ;;  %v366_v27 = vrot.slane %v364_v18, 4  ;;  %v298_v42 = vld [vmem:[%s6892_s23 + $0x14] sm:$0x1] }
  0x41   : > { %5183 = vmatprep.subr.bf16.mxu0 %v6463_v6  ;;  %v789_v32 = vrot.slane %v787_v21, 4  ;;  %v372_v36 = vrot.slane %v370_v20, 5  ;;  %v375_v45 = vshrl.u32 %v6959_v40, 16  ;;  %v378_v46 = vshll.u32 %v6959_v40, 16  ;;  %v6973_v50 = vld [vmem:[%s9163_s1 + $0x88] sm:$0xff]   ;;  %v6472_v55 = vld [vmem:[%s9163_s1 + $0x38] sm:$0xff]  }
  0x42   : > { %v357_v34 = vor.u32 %v356_v25, %v353_v24  ;;  %v367_v35 = vor.u32 %v366_v27, %v362_v26  ;;  %v384_v47 = vshll.u32 %v6962_v41, 16  ;;  %v388_v48 = vshrl.u32 %v6962_v41, 16  ;;  %6298 = vmatpush3.bf16.msra.mxu1 %v6973_v50  ;;  %v6986_v59 = vld [vmem:[%s9163_s1 + $0xd0] sm:$0xff]   ;;  %v7000_v1 = vld [vmem:[%s9163_s1 + $0xd8] sm:$0xff]   ;;  %v7030_v17 = vld [vmem:[%s9163_s1 + $0xe0] sm:$0xff]   ;;  %s9020_s18 = scalar_lea.vmem [#allocation5], %s4942_s17 }
  0x43   : > { %v6955_v39 = vsel %vm6936_vm5, %v789_v32, %v790_v22  ;;  %v394_v49 = vshll.u32 %v298_v42, 16  ;;  %v377_v53 = vrot.slane %v375_v45, 4  ;;  %v380_v54 = vrot.slane %v378_v46, 5  ;;  %v6991_v61 = vld [vmem:[%s9163_s1 + $0x90] sm:$0xff]   ;;  %v7003_v2 = vld [vmem:[%s6892_s23 + $0x18] sm:$0xf]  ;;  %6291 = vmatprep.subr.bf16.mxu1 %v6986_v59 }
  0x44   : > { %5184 = vmatpush3.bf16.msra.mxu0 %v6464_v7  ;;  %v358_v43 = vrot.slane %v357_v34, 4  ;;  %v368_v44 = vrot.slane %v367_v35, 4  ;;  %v386_v57 = vrot.slane %v384_v47, 5  ;;  %v390_v58 = vrot.slane %v388_v48, 4  ;;  %v7011_v6 = vld [vmem:[%s6892_s23 + $0x1c] sm:$0xf] }
  0x45   : > { %5185 = vmatprep.subr.bf16.mxu0 %v6465_v8  ;;  %v381_v60 = vor.u32 %v380_v54, %v377_v53  ;;  %v6995_v62 = vsel %vm6936_vm5, %v4944_v31, %v787_v21  ;;  %v396_v0 = vrot.slane %v394_v49, 5  ;;  %v4962_v4 = vcombine.low %v6901_v11, %v6904_v12  ;;  %v301_v7 = vld [vmem:[%s6892_s23 + $0x20] sm:$0x1]  ;;  %v7025_v16 = vld [vmem:[%s9163_s1 + $0x98] sm:$0xff]   ;;  %v7051_v31 = vld [vmem:[%s6892_s23 + $0x24] sm:$0xf] }
  0x46   : > { %v363_v51 = vsel %vm6920_vm4, %v358_v43, %v362_v26  ;;  %v373_v52 = vsel %vm6920_vm4, %v368_v44, %v372_v36  ;;  %v391_v63 = vor.u32 %v390_v58, %v386_v57  ;;  %v399_v8 = vshrl.u32 %v7003_v2, 16  ;;  %6299 = vmatpush3.bf16.msra.mxu1 %v6991_v61  ;;  %v7038_v22 = vld [vmem:[%s9163_s1 + $0xa0] sm:$0xff]   ;;  %v7045_v26 = vld [vmem:[%s9163_s1 + $0xe8] sm:$0xff]   ;;  %v7084_v53 = vld [vmem:[%s9163_s1 + $0xf0] sm:$0xff]   ;;  %s5176_s19 = sshll.u32 %s6798_s28, 12  ;;  %s4862_s16 = sshll.u32 %s9020_s18, 4  ;;  %s9114_s16 = int_to_ptr.vmem [resolvable:$true] %s4862_s16 }
  0x47   : > { %v4978_v56 = vcombine.low %v363_v51, %v373_v52  ;;  %v382_v5 = vrot.slane %v381_v60, 4  ;;  %v408_v13 = vshll.u32 %v7011_v6, 16  ;;  %6292 = vmatprep.subr.bf16.mxu1 %v7000_v1  ;;  %v418_v15 = vshll.u32 %v301_v7, 16  ;;  %v7054_v32 = vld [vmem:[%s6892_s23 + $0x28] sm:$0xf]  ;;  %s9112_s13 = scalar_lea.hbm %s9169_s7, %s5176_s19  ;;  %s9121_s28 = scalar_lea.sflag [#allocation4], %s284_s8 }
  0x48   : > { %5186 = vmatpush3.bf16.msra.mxu0 %v6466_v9  ;;  %v392_v9 = vrot.slane %v391_v63, 4  ;;  %v401_v12 = vrot.slane %v399_v8, 4  ;;  %v423_v36 = vshrl.u32 %v7051_v31, 16  ;;  %v432_v42 = vshll.u32 %v7054_v32, 16  ;;  %v7070_v45 = vld [vmem:[%s9163_s1 + $0xa8] sm:$0xff]   ;;  %s6662_s15 = scalar_lea.vmem %s9114_s16, 4096 }
  0x49   : > { %5187 = vmatprep.subr.bf16.mxu0 %v6467_v10  ;;  %1796 = vmatprep.mubr.bf16.mxu0 %v4978_v56  ;;  %v402_v10 = vshll.u32 %v7003_v2, 16  ;;  %v387_v11 = vsel %vm6920_vm4, %v382_v5, %v386_v57  ;;  %v410_v20 = vrot.slane %v408_v13, 5  ;;  %v420_v25 = vrot.slane %v418_v15, 5  ;;  %v7095_v57 = vld [vmem:[%s9163_s1 + $0xf8] sm:$0xff]   ;;  %v7098_v58 = vld [vmem:[%s6892_s23 + $0x30] sm:$0xf]  ;;  %p6663_p6 = scmp.ne.s32.totalorder %s9114_s16, %s6662_s15 }
  0x4a   : > { %v397_v18 = vsel %vm6920_vm4, %v392_v9, %v396_v0  ;;  %6300 = vmatpush3.bf16.msra.mxu1 %v7025_v16  ;;  %v436_v43 = vshrl.u32 %v7054_v32, 16  ;;  %v425_v47 = vrot.slane %v423_v36, 4  ;;  %v434_v51 = vrot.slane %v432_v42, 5  ;;  %v7103_v63 = vld [vmem:[%s6892_s23 + $0x34] sm:$0xf]  ;;  %s6734_s21 = smov [#allocation5]  }
  0x4b   : > { %v7040_v24 = vcombine.low %v387_v11, %v397_v18  ;;  %6293 = vmatprep.subr.bf16.mxu1 %v7030_v17  ;;  %v7106_v0 = vld [vmem:[%s6892_s23 + $0x38] sm:$0x1]  ;;  %v450_v5 = vshll.u32 %v7098_v58, 16  ;;  %v456_v7 = vshll.u32 %v7103_v63, 16  ;;  %v460_v8 = vshrl.u32 %v7103_v63, 16  ;;  %p6664_p10 = pnand %p6663_p6, %p9295_p9  ;;  %s6666_s22 = sshll.u32 %s6734_s21, 4  ;;  %s6667_s22 = int_to_ptr.vmem [resolvable:$false] %s6666_s22 }
  0x4c   : > { %5188 = vmatpush3.bf16.msra.mxu0 %v6468_v14  ;;  %v412_v14 = vshrl.u32 %v7011_v6, 16  ;;  %v438_v52 = vrot.slane %v436_v43, 4  ;;  %v7116_v9 = vcombine.low %v7003_v2, %v7011_v6  ;;  %v4948_v42 = vrot.slane %v7098_v58, 9  ;;  %v7153_v43 = vld [vmem:[%s6892_s23 + $0x48] sm:$0xf]  ;;  %s6668_s29 = scalar_lea.vmem %s6667_s22, 8192  ;;  %p6669_p2 = scmp.lt.s32.totalorder %s9114_s16, %s6667_s22 }
  0x4d   : > { %5189 = vmatprep.subr.bf16.mxu0 %v6469_v19  ;;  %v404_v19 = vrot.slane %v402_v10, 5  ;;  %9229 = vst [vmem:[#allocation8_spill] sm:$0xff] %v7040_v24  ;;  %v458_v15 = vrot.slane %v456_v7, 5  ;;  %v462_v18 = vrot.slane %v460_v8, 4  ;;  %v498_v8 = vshll.u32 %v7153_v43, 16  ;;  %p6665_p12 = pneg %p6664_p10  ;;  %p6670_p3 = scmp.lt.s32.totalorder %s6668_s29, %s6662_s15 }
  0x4e   : > { %v414_v21 = vrot.slane %v412_v14, 4  ;;  %6301 = vmatpush3.bf16.msra.mxu1 %v7038_v22  ;;  %v439_v56 = vor.u32 %v438_v52, %v434_v51  ;;  %v466_v14 = vshll.u32 %v7106_v0, 16  ;;  %v7468_v3 = vld [vmem:[%s6892_s23 + $0x9c] sm:$0xf] }
  0x4f   : > { %v405_v27 = vor.u32 %v404_v19, %v401_v12  ;;  %6294 = vmatprep.subr.bf16.mxu1 %v7045_v26  ;;  %v452_v12 = vrot.slane %v450_v5, 5  ;;  %v7125_v19 = vld [vmem:[%s6892_s23 + $0x3c] sm:$0xf]  ;;  %p6671_p4 = por %p6670_p3, %p6669_p2 }
  0x50   : > { %5190 = vmatpush3.bf16.msra.mxu0 %v6470_v33  ;;  %v304_v33 = vld [vmem:[%s6892_s23 + $0x2c] sm:$0x1]  ;;  %v468_v6 = vrot.slane %v466_v14, 5 }
  0x51   : > { %5191 = vmatprep.subr.bf16.mxu0 %v6471_v38  ;;  %v406_v34 = vrot.slane %v405_v27, 4  ;;  %v426_v38 = vshll.u32 %v7051_v31, 16  ;;  %v442_v44 = vshll.u32 %v304_v33, 16  ;;  %v463_v27 = vor.u32 %v462_v18, %v458_v15  ;;  %p6672_p7 = pnand %p6671_p4, %p6665_p12 }
  0x52   : > { %6302 = vmatpush3.bf16.msra.mxu1 %v7070_v45 }
  0x53   : > { %v428_v48 = vrot.slane %v426_v38, 5  ;;  %6295 = vmatprep.subr.bf16.mxu1 %v7084_v53 }
  0x54   : > { %5192 = vmatpush3.bf16.msra.mxu0 %v6472_v55  ;;  %v7089_v55 = vld [vmem:[%s9163_s1 + $0xb0] sm:$0xff]  }
  0x55   : > { %5289 = vmatprep.subr.bf16.mxu0 %v6927_v28  ;;  %v415_v28 = vor.u32 %v414_v21, %v410_v20  ;;  %v429_v54 = vor.u32 %v428_v48, %v425_v47  ;;  %v471_v21 = vshrl.u32 %v7125_v19, 16 }
  0x56   : > { %6303 = vmatpush3.bf16.msra.mxu1 %v7089_v55 }
  0x57   : > { %1797 = vmatmul.mubr.bf16.vlgmr.msra.gmra.mrb[0].mxu0 %v4962_v4  ;;  %v416_v35 = vrot.slane %v415_v28, 4  ;;  %v430_v60 = vrot.slane %v429_v54, 4  ;;  %v440_v4 = vrot.slane %v439_v56, 4  ;;  %6296 = vmatprep.subr.bf16.mxu1 %v7095_v57  ;;  %v7170_v56 = vcombine.low %v7051_v31, %v7054_v32 }
  0x58   : > { %5290 = vmatpush3.bf16.msra.mxu0 %v6932_v29  ;;  %1804 = vmatprep.mubr.bf16.mxu0 %v7040_v24  ;;  %v7063_v29 = vcombine.low %v6959_v40, %v6962_v41 }
  0x59   : > { %5291 = vmatprep.subr.bf16.mxu0 %v6948_v37  ;;  %v411_v37 = vsel %vm6920_vm4, %v406_v34, %v410_v20  ;;  %v421_v46 = vsel %vm6920_vm4, %v416_v35, %v420_v25  ;;  %v435_v10 = vsel %vm6920_vm4, %v430_v60, %v434_v51  ;;  %v7137_v20 = vld [vmem:[%s6892_s23 + $0x40] sm:$0xf]  ;;  %v474_v25 = vshll.u32 %v7125_v19, 16  ;;  %v7145_v34 = vld [vmem:[%s6892_s23 + $0x44] sm:$0x1] }
  0x5a   : > { %v7077_v49 = vcombine.low %v411_v37, %v421_v46  ;;  %v480_v28 = vshll.u32 %v7137_v20, 16  ;;  %v484_v33 = vshrl.u32 %v7137_v20, 16  ;;  %v473_v35 = vrot.slane %v471_v21, 4 }
  0x5b   : > { %v476_v36 = vrot.slane %v474_v25, 5  ;;  %v7149_v38 = vcombine.low %v7125_v19, %v7137_v20  ;;  %v464_v46 = vrot.slane %v463_v27, 4  ;;  %v815_v51 = vrot.slane %v7103_v63, 5  ;;  %v313_v27 = vld [vmem:[%s6892_s23 + $0x50] sm:$0x1] }
  0x5c   : > { %9230 = vst [vmem:[#allocation9_spill] sm:$0xff] %v7077_v49  ;;  %5292 = vmatpush3.bf16.msra.mxu0 %v6973_v50  ;;  %v444_v50 = vrot.slane %v442_v44, 5  ;;  %v6508_v44 = vld [vmem:[%s9163_s1 + $0x1c0] sm:$0xff]   ;;  %v7159_v47 = vrot.slane %v480_v28, 5  ;;  %v486_v48 = vrot.slane %v484_v33, 4  ;;  %v490_v54 = vshll.u32 %v7145_v34, 16 }
  0x5d   : > { %5293 = vmatprep.subr.bf16.mxu0 %v6986_v59  ;;  %v447_v59 = vshrl.u32 %v7098_v58, 16  ;;  %v477_v52 = vor.u32 %v476_v36, %v473_v35  ;;  %1989 = vmatprep.mubr.bf16.mxu1 %v7149_v38  ;;  %v495_v60 = vshrl.u32 %v7153_v43, 16  ;;  %v817_v5 = vrot.slane %v815_v51, 4  ;;  %v6512_v28 = vld [vmem:[%s9163_s1 + $0x1c8] sm:$0xff]  }
  0x5e   : > { %v445_v11 = vsel %vm6920_vm4, %v440_v4, %v444_v50  ;;  %v7175_v50 = vld [vmem:[%s6892_s23 + $0x4c] sm:$0xf]  ;;  %v816_v4 = vsel %vm6936_vm5, %v4948_v42, %v815_v51  ;;  %v492_v7 = vrot.slane %v490_v54, 5  ;;  %v822_v35 = vrot.slane %v7137_v20, 5  ;;  %v7220_v42 = vld [vmem:[%s6892_s23 + $0x58] sm:$0xf] }
  0x5f   : > { %1805 = vmatmul.mubr.bf16.gmra.mrb[4].mxu0 %v7063_v29  ;;  %v449_v13 = vrot.slane %v447_v59, 4  ;;  %v7128_v2 = vcombine.low %v435_v10, %v445_v11  ;;  %v469_v59 = vsel %vm6920_vm4, %v464_v46, %v468_v6  ;;  %v478_v31 = vrot.slane %v477_v52, 4  ;;  %v7200_v6 = vld [vmem:[%s6892_s23 + $0x54] sm:$0xf] }
  0x60   : > { %1812 = vmatprep.mubr.bf16.mxu0 %v7077_v49  ;;  %5294 = vmatpush3.bf16.msra.mxu0 %v6991_v61  ;;  %v7134_v61 = vld [vmem:[%s9163_s1 + $0xb8] sm:$0xff]   ;;  %v504_v14 = vshll.u32 %v7175_v50, 16  ;;  %v508_v11 = vshrl.u32 %v7175_v50, 16  ;;  %v7197_v18 = vcombine.low %v7153_v43, %v7175_v50  ;;  %v825_v36 = vrot.slane %v7145_v34, 5  ;;  %v6516_v52 = vld [vmem:[%s9163_s1 + $0x1d0] sm:$0xff]  }
  0x61   : > { %5295 = vmatprep.subr.bf16.mxu0 %v7000_v1  ;;  %9231 = vst [vmem:[#allocation10_spill] sm:$0xff] %v7128_v2  ;;  %v453_v1 = vor.u32 %v452_v12, %v449_v13  ;;  %6304 = vmatpush3.bf16.msra.mxu1 %v7134_v61  ;;  %v497_v13 = vrot.slane %v495_v60, 4  ;;  %v483_v33 = vsel %vm6920_vm4, %v478_v31, %v7159_v47  ;;  %v824_v34 = vrot.slane %v822_v35, 4 }
  0x62   : > { %5513 = vmatprep.subr.bf16.mxu1 %v6508_v44  ;;  %v7205_v21 = vrot.slane %v504_v14, 5  ;;  %v510_v25 = vrot.slane %v508_v11, 4  ;;  %v519_v44 = vshrl.u32 %v7200_v6, 16  ;;  %v514_v46 = vshll.u32 %v313_v27, 16 }
  0x63   : > { %v454_v37 = vrot.slane %v453_v1, 4  ;;  %v4949_v1 = vrot.slane %v7125_v19, 9  ;;  %v7243_v54 = vcombine.low %v7098_v58, %v7103_v63  ;;  %v826_v60 = vsel %vm6936_vm5, %v824_v34, %v825_v36 }
  0x64   : > { %5296 = vmatpush3.bf16.msra.mxu0 %v7025_v16  ;;  %v818_v16 = vrot.slane %v7106_v0, 5  ;;  %v7258_v58 = vcombine.low %v7200_v6, %v7220_v42  ;;  %v4950_v63 = vrot.slane %v7153_v43, 9  ;;  %v7271_v43 = vld [vmem:[%s6892_s23 + $0x64] sm:$0xf] }
  0x65   : > { %5297 = vmatprep.subr.bf16.mxu0 %v7030_v17  ;;  %v487_v17 = vor.u32 %v486_v48, %v7159_v47  ;;  %v459_v0 = vsel %vm6920_vm4, %v454_v37, %v458_v15  ;;  %v500_v15 = vrot.slane %v498_v8, 5  ;;  %v522_v37 = vshll.u32 %v7200_v6, 16  ;;  %v6513_v47 = vld [vmem:[%s9163_s1 + $0x188] sm:$0xff]   ;;  %v6517_v8 = vld [vmem:[%s9163_s1 + $0x190] sm:$0xff]  }
  0x66   : > { %v819_v10 = vsel %vm6936_vm5, %v817_v5, %v818_v16  ;;  %v7191_v12 = vcombine.low %v459_v0, %v469_v59  ;;  %v823_v20 = vsel %vm6936_vm5, %v4949_v1, %v822_v35  ;;  %v521_v48 = vrot.slane %v519_v44, 4  ;;  %v7263_v5 = vld [vmem:[%s6892_s23 + $0x60] sm:$0xf]  ;;  %v6520_v1 = vld [vmem:[%s9163_s1 + $0x1d8] sm:$0xff]   ;;  %v7297_v44 = vld [vmem:[%s6892_s23 + $0x6c] sm:$0xf] }
  0x67   : > { %1813 = vmatmul.mubr.bf16.gmra.mrb[8].mxu0 %v7116_v9  ;;  %v488_v32 = vrot.slane %v487_v17, 4  ;;  %v501_v19 = vor.u32 %v500_v15, %v497_v13  ;;  %v524_v51 = vrot.slane %v522_v37, 5  ;;  %v528_v16 = vshll.u32 %v7220_v42, 16 }
  0x68   : > { %1820 = vmatprep.mubr.bf16.mxu0 %v7128_v2  ;;  %5298 = vmatpush3.bf16.msra.mxu0 %v7038_v22  ;;  %9232 = vst [vmem:[#allocation11_spill] sm:$0xff] %v7191_v12  ;;  %v7193_v22 = vcombine.low %v816_v4, %v819_v10  ;;  %v532_v0 = vshrl.u32 %v7220_v42, 16  ;;  %v7254_v59 = vcombine.low %v823_v20, %v826_v60  ;;  %v829_v4 = vrot.slane %v7175_v50, 5  ;;  %v316_v50 = vld [vmem:[%s6892_s23 + $0x5c] sm:$0x1] }
  0x69   : > { %5299 = vmatprep.subr.bf16.mxu0 %v7045_v26  ;;  %v6509_v26 = vld [vmem:[%s9163_s1 + $0x180] sm:$0xff]   ;;  %v502_v31 = vrot.slane %v501_v19, 4  ;;  %v7268_v10 = vrot.slane %v528_v16, 5  ;;  %v525_v11 = vor.u32 %v524_v51, %v521_v48  ;;  %v543_v15 = vshrl.u32 %v7263_v5, 16 }
  0x6a   : > { %9233 = vst [vmem:[#allocation12_spill] sm:$0xff] %v7193_v22  ;;  %1990 = vmatmul.mubr.bf16.vlgmr.msra.gmra.mrb[0].mxu1 %v7193_v22  ;;  %9235 = vst [vmem:[#allocation14_spill] sm:$0xff] %v7254_v59  ;;  %v534_v13 = vrot.slane %v532_v0, 4  ;;  %v831_v14 = vrot.slane %v829_v4, 4  ;;  %v556_v35 = vshrl.u32 %v7271_v43, 16  ;;  %v538_v19 = vshll.u32 %v316_v50, 16 }
  0x6b   : > { %1997 = vmatprep.mubr.bf16.mxu1 %v7197_v18  ;;  %5514 = vmatpush3.bf16.msra.mxu1 %v6509_v26  ;;  %v546_v26 = vshll.u32 %v7263_v5, 16  ;;  %v526_v36 = vrot.slane %v525_v11, 4  ;;  %v545_v20 = vrot.slane %v543_v15, 4  ;;  %v7312_v48 = vcombine.low %v7263_v5, %v7271_v43  ;;  %v7336_v11 = vld [vmem:[%s6892_s23 + $0x7c] sm:$0xf] }
  0x6c   : > { %5300 = vmatpush3.bf16.msra.mxu0 %v7070_v45  ;;  %v493_v45 = vsel %vm6920_vm4, %v488_v32, %v492_v7  ;;  %5515 = vmatprep.subr.bf16.mxu1 %v6512_v28  ;;  %v516_v32 = vrot.slane %v514_v46, 5  ;;  %v832_v7 = vrot.slane %v313_v27, 5  ;;  %v507_v27 = vsel %vm6920_vm4, %v502_v31, %v7205_v21  ;;  %v7306_v46 = vld [vmem:[%s6892_s23 + $0x70] sm:$0xf] }
  0x6d   : > { %5301 = vmatprep.subr.bf16.mxu0 %v7084_v53  ;;  %v511_v53 = vor.u32 %v510_v25, %v7205_v21  ;;  %v7245_v17 = vcombine.low %v483_v33, %v493_v45  ;;  %v830_v25 = vsel %vm6936_vm5, %v4950_v63, %v829_v4  ;;  %v552_v33 = vshll.u32 %v7271_v43, 16  ;;  %v6521_v21 = vld [vmem:[%s9163_s1 + $0x198] sm:$0xff]   ;;  %9238 = vst [vmem:[#allocation17_spill] sm:$0xff] %v7312_v48 }
  0x6e   : > { %v535_v45 = vor.u32 %v534_v13, %v7268_v10  ;;  %v548_v34 = vrot.slane %v546_v26, 5  ;;  %v4951_v51 = vrot.slane %v7200_v6, 9  ;;  %v839_v16 = vrot.slane %v316_v50, 5 }
  0x6f   : > { %1821 = vmatmul.mubr.bf16.gmra.mrb[12].mxu0 %v7170_v56  ;;  %9234 = vst [vmem:[#allocation13_spill] sm:$0xff] %v7245_v17  ;;  %5516 = vmatpush3.bf16.msra.mxu1 %v6513_v47  ;;  %v7316_v60 = vrot.slane %v552_v33, 5  ;;  %v558_v0 = vrot.slane %v556_v35, 4  ;;  %v540_v4 = vrot.slane %v538_v19, 5  ;;  %v570_v31 = vshll.u32 %v7297_v44, 16  ;;  %v6525_v35 = vld [vmem:[%s9163_s1 + $0x1a0] sm:$0xff]  }
  0x70   : > { %1828 = vmatprep.mubr.bf16.mxu0 %v7191_v12  ;;  %5302 = vmatpush3.bf16.msra.mxu0 %v7089_v55  ;;  %v6506_v55 = vld [vmem:[%s9163_s1 + $0x140] sm:$0xff]   ;;  %v536_v63 = vrot.slane %v535_v45, 4  ;;  %v531_v6 = vsel %vm6920_vm4, %v526_v36, %v7268_v10  ;;  %v843_v26 = vrot.slane %v7271_v43, 5  ;;  %v7358_v43 = vcombine.low %v7297_v44, %v7306_v46 }
  0x71   : > { %5303 = vmatprep.subr.bf16.mxu0 %v7095_v57  ;;  %v512_v57 = vrot.slane %v511_v53, 4  ;;  %5517 = vmatprep.subr.bf16.mxu1 %v6516_v52  ;;  %v836_v53 = vrot.slane %v7220_v42, 5  ;;  %v319_v52 = vld [vmem:[%s6892_s23 + $0x68] sm:$0x1]  ;;  %v567_v42 = vshrl.u32 %v7297_v44, 16  ;;  %v559_v50 = vor.u32 %v558_v0, %v7316_v60 }
  0x72   : > { %1998 = vmatmul.mubr.bf16.gmra.mrb[4].mxu1 %v7254_v59  ;;  %v562_v10 = vshll.u32 %v319_v52, 16  ;;  %9240 = vst [vmem:[#allocation19_spill] sm:$0xff] %v7358_v43 }
  0x73   : > { %2005 = vmatprep.mubr.bf16.mxu1 %v7258_v58  ;;  %v517_v28 = vsel %vm6920_vm4, %v512_v57, %v516_v32  ;;  %5518 = vmatpush3.bf16.msra.mxu1 %v6517_v8  ;;  %v576_v57 = vshll.u32 %v7306_v46, 16  ;;  %v7322_v32 = vld [vmem:[%s6892_s23 + $0x78] sm:$0xf]  ;;  %v837_v8 = vsel %vm6936_vm5, %v4951_v51, %v836_v53  ;;  %v569_v15 = vrot.slane %v567_v42, 4 }
  0x74   : > { %5304 = vmatpush3.bf16.msra.mxu0 %v7134_v61  ;;  %v833_v61 = vsel %vm6936_vm5, %v831_v14, %v832_v7  ;;  %5519 = vmatprep.subr.bf16.mxu1 %v6520_v1  ;;  %v7308_v47 = vcombine.low %v507_v27, %v517_v28  ;;  %v580_v7 = vshrl.u32 %v7306_v46, 16  ;;  %v549_v14 = vor.u32 %v548_v34, %v545_v20 }
  0x75   : > { %5401 = vmatprep.subr.bf16.mxu0 %v6506_v55  ;;  %v7302_v37 = vcombine.low %v830_v25, %v833_v61  ;;  %v838_v55 = vrot.slane %v836_v53, 4  ;;  %v7342_v25 = vld [vmem:[%s6892_s23 + $0x74] sm:$0x1]  ;;  %v6524_v61 = vld [vmem:[%s9163_s1 + $0x1e0] sm:$0xff]   ;;  %v541_v1 = vsel %vm6920_vm4, %v536_v63, %v540_v4  ;;  %v572_v27 = vrot.slane %v570_v31, 5 }
  0x76   : > { %9237 = vst [vmem:[#allocation16_spill] sm:$0xff] %v7308_v47  ;;  %v7349_v28 = vrot.slane %v576_v57, 5  ;;  %v582_v33 = vrot.slane %v580_v7, 4  ;;  %v591_v45 = vshrl.u32 %v7322_v32, 16  ;;  %v594_v19 = vshll.u32 %v7322_v32, 16 }
  0x77   : > { %1829 = vmatmul.mubr.bf16.gmra.mrb[16].mxu0 %v7243_v54  ;;  %9236 = vst [vmem:[#allocation15_spill] sm:$0xff] %v7302_v37  ;;  %5520 = vmatpush3.bf16.msra.mxu1 %v6521_v21  ;;  %v840_v13 = vsel %vm6936_vm5, %v838_v55, %v839_v16  ;;  %v4952_v21 = vrot.slane %v7263_v5, 9  ;;  %v845_v20 = vrot.slane %v843_v26, 4  ;;  %v846_v34 = vrot.slane %v319_v52, 5  ;;  %v7370_v57 = vld [vmem:[%s6892_s23 + $0x80] sm:$0x1] }
  0x78   : > { %1836 = vmatprep.mubr.bf16.mxu0 %v7245_v17  ;;  %v7354_v36 = vcombine.low %v837_v8, %v840_v13  ;;  %5521 = vmatprep.subr.bf16.mxu1 %v6524_v61  ;;  %v600_v53 = vshll.u32 %v7336_v11, 16  ;;  %v7364_v51 = vcombine.low %v531_v6, %v541_v1  ;;  %v550_v16 = vrot.slane %v549_v14, 4  ;;  %v6528_v6 = vld [vmem:[%s9163_s1 + $0x1e8] sm:$0xff]  }
  0x79   : > { %v560_v0 = vrot.slane %v559_v50, 4  ;;  %v604_v55 = vshrl.u32 %v7336_v11, 16  ;;  %v564_v42 = vrot.slane %v562_v10, 5  ;;  %v573_v63 = vor.u32 %v572_v27, %v569_v15  ;;  %v7390_v15 = vld [vmem:[%s6892_s23 + $0x84] sm:$0xf] }
  0x7a   : > { %2006 = vmatmul.mubr.bf16.gmra.mrb[8].mxu1 %v7302_v37  ;;  %9239 = vst [vmem:[#allocation18_spill] sm:$0xff] %v7354_v36  ;;  %9241 = vst [vmem:[#allocation20_spill] sm:$0xff] %v7364_v51  ;;  %v583_v4 = vor.u32 %v582_v33, %v7349_v28  ;;  %v586_v31 = vshll.u32 %v7342_v25, 16  ;;  %v593_v5 = vrot.slane %v591_v45, 4  ;;  %v596_v52 = vrot.slane %v594_v19, 5 }
  0x7b   : > { %2013 = vmatprep.mubr.bf16.mxu1 %v7312_v48  ;;  %5522 = vmatpush3.bf16.msra.mxu1 %v6525_v35  ;;  %v7373_v7 = vrot.slane %v600_v53, 5  ;;  %v844_v8 = vsel %vm6936_vm5, %v4952_v21, %v843_v26  ;;  %v847_v13 = vsel %vm6936_vm5, %v845_v20, %v846_v34  ;;  %v606_v14 = vrot.slane %v604_v55, 4  ;;  %v7399_v19 = vld [vmem:[%s6892_s23 + $0x88] sm:$0xf]  ;;  %v7526_v37 = vld [vmem:[%s6892_s23 + $0xb4] sm:$0xf] }
  0x7c   : > { %v850_v50 = vrot.slane %v7306_v46, 5  ;;  %v555_v10 = vsel %vm6920_vm4, %v550_v16, %v7316_v60  ;;  %5523 = vmatprep.subr.bf16.mxu1 %v6528_v6  ;;  %v565_v26 = vsel %vm6920_vm4, %v560_v0, %v564_v42  ;;  %v574_v61 = vrot.slane %v573_v63, 4  ;;  %v6529_v60 = vld [vmem:[%s9163_s1 + $0x1a8] sm:$0xff]  }
  0x7d   : > { %v584_v1 = vrot.slane %v583_v4, 4  ;;  %v588_v27 = vrot.slane %v586_v31, 5  ;;  %v7394_v33 = vcombine.low %v844_v8, %v847_v13  ;;  %v4953_v46 = vrot.slane %v7297_v44, 9  ;;  %v7411_v44 = vld [vmem:[%s6892_s23 + $0x90] sm:$0xf] }
  0x7e   : > { %v597_v35 = vor.u32 %v596_v52, %v593_v5  ;;  %v610_v45 = vshll.u32 %v7370_v57, 16  ;;  %v7406_v21 = vcombine.low %v7322_v32, %v7336_v11  ;;  %v852_v20 = vrot.slane %v850_v50, 4  ;;  %v7429_v52 = vld [vmem:[%s6892_s23 + $0x94] sm:$0xf] }
  0x7f   : > { %1837 = vmatmul.mubr.bf16.gmra.mrb[20].mxu0 %v7149_v38  ;;  %9242 = vst [vmem:[#allocation21_spill] sm:$0xff] %v7394_v33  ;;  %v853_v34 = vrot.slane %v7342_v25, 5  ;;  %v607_v53 = vor.u32 %v606_v14, %v7373_v7  ;;  %v7413_v16 = vcombine.low %v555_v10, %v565_v26  ;;  %v615_v0 = vshrl.u32 %v7390_v15, 16  ;;  %5524 = vmatpush3.bf16.msra.mxu1 %v6529_v60 }
  0x80   : > { %1844 = vmatprep.mubr.bf16.mxu0 %v7308_v47  ;;  %v579_v55 = vsel %vm6920_vm4, %v574_v61, %v7349_v28  ;;  %v618_v42 = vshll.u32 %v7390_v15, 16  ;;  %v589_v25 = vsel %vm6920_vm4, %v584_v1, %v588_v27  ;;  %v851_v4 = vsel %vm6936_vm5, %v4953_v46, %v850_v50 }
  0x81   : > { %9243 = vst [vmem:[#allocation22_spill] sm:$0xff] %v7413_v16  ;;  %v7426_v31 = vrot.slane %v597_v35, 4  ;;  %v612_v5 = vrot.slane %v610_v45, 5  ;;  %v854_v28 = vsel %vm6936_vm5, %v852_v20, %v853_v34  ;;  %v608_v6 = vrot.slane %v607_v53, 4  ;;  %v7447_v35 = vld [vmem:[%s6892_s23 + $0x8c] sm:$0x1] }
  0x82   : > { %2014 = vmatmul.mubr.bf16.gmra.mrb[12].mxu1 %v7354_v36  ;;  %v624_v8 = vshll.u32 %v7399_v19, 16  ;;  %v857_v13 = vrot.slane %v7336_v11, 5  ;;  %v617_v14 = vrot.slane %v615_v0, 4  ;;  %v628_v50 = vshrl.u32 %v7399_v19, 16  ;;  %v6532_v45 = vld [vmem:[%s9163_s1 + $0x1f0] sm:$0xff]  }
  0x83   : > { %2021 = vmatprep.mubr.bf16.mxu1 %v7358_v43  ;;  %v639_v10 = vshrl.u32 %v7411_v44, 16  ;;  %v642_v26 = vshll.u32 %v7411_v44, 16  ;;  %v620_v61 = vrot.slane %v618_v42, 5  ;;  %v648_v1 = vshll.u32 %v7429_v52, 16  ;;  %v6533_v0 = vld [vmem:[%s9163_s1 + $0x1b0] sm:$0xff]   ;;  %5525 = vmatprep.subr.bf16.mxu1 %v6532_v45 }
  0x84   : > { %v7442_v27 = vcombine.low %v579_v55, %v589_v25  ;;  %v7444_v46 = vcombine.low %v851_v4, %v854_v28  ;;  %v652_v11 = vshrl.u32 %v7429_v52, 16  ;;  %v7455_v60 = vcombine.low %v7390_v15, %v7399_v19  ;;  %v7465_v28 = vld [vmem:[%s6892_s23 + $0x98] sm:$0x1]  ;;  %5526 = vmatpush3.bf16.msra.mxu1 %v6533_v0 }
  0x85   : > { %v4954_v20 = vrot.slane %v7322_v32, 9  ;;  %v859_v34 = vrot.slane %v857_v13, 4  ;;  %v860_v53 = vrot.slane %v7370_v57, 5  ;;  %v7462_v55 = vrot.slane %v624_v8, 5 }
  0x86   : > { %9244 = vst [vmem:[#allocation23_spill] sm:$0xff] %v7442_v27  ;;  %9245 = vst [vmem:[#allocation24_spill] sm:$0xff] %v7444_v46  ;;  %v630_v42 = vrot.slane %v628_v50, 4  ;;  %v641_v25 = vrot.slane %v639_v10, 4  ;;  %v644_v4 = vrot.slane %v642_v26, 5  ;;  %v603_v32 = vsel %vm6920_vm4, %v7426_v31, %v7373_v7 }
  0x87   : > { %1845 = vmatmul.mubr.bf16.gmra.mrb[24].mxu0 %v7197_v18  ;;  %v7475_v57 = vrot.slane %v648_v1, 5  ;;  %v654_v8 = vrot.slane %v652_v11, 4  ;;  %v864_v50 = vrot.slane %v7399_v19, 5  ;;  %v613_v10 = vsel %vm6920_vm4, %v608_v6, %v612_v5  ;;  %v7488_v31 = vld [vmem:[%s6892_s23 + $0xa0] sm:$0xf] }
  0x88   : > { %1852 = vmatprep.mubr.bf16.mxu0 %v7364_v51  ;;  %v858_v26 = vsel %vm6936_vm5, %v4954_v20, %v857_v13  ;;  %v861_v45 = vsel %vm6936_vm5, %v859_v34, %v860_v53  ;;  %v634_v7 = vshll.u32 %v7447_v35, 16  ;;  %v621_v19 = vor.u32 %v620_v61, %v617_v14  ;;  %v6536_v13 = vld [vmem:[%s9163_s1 + $0x1f8] sm:$0xff]  }
  0x89   : > { %v631_v1 = vor.u32 %v630_v42, %v7462_v55  ;;  %v4955_v5 = vrot.slane %v7390_v15, 9  ;;  %v645_v6 = vor.u32 %v644_v4, %v641_v25  ;;  %v658_v11 = vshll.u32 %v7465_v28, 16  ;;  %v6537_v14 = vld [vmem:[%s9163_s1 + $0x1b8] sm:$0xff]   ;;  %v7507_v42 = vld [vmem:[%s6892_s23 + $0xa8] sm:$0xf]  ;;  %5527 = vmatprep.subr.bf16.mxu1 %v6536_v13 }
  0x8a   : > { %2022 = vmatmul.mubr.bf16.gmra.mrb[16].mxu1 %v7394_v33  ;;  %v663_v20 = vshrl.u32 %v7468_v3, 16  ;;  %v666_v34 = vshll.u32 %v7468_v3, 16  ;;  %v7502_v61 = vcombine.low %v858_v26, %v861_v45  ;;  %v866_v53 = vrot.slane %v864_v50, 4 }
  0x8b   : > { %2029 = vmatprep.mubr.bf16.mxu1 %v7406_v21  ;;  %v867_v15 = vrot.slane %v7447_v35, 5  ;;  %v655_v0 = vor.u32 %v654_v8, %v7475_v57  ;;  %v7509_v25 = vcombine.low %v603_v32, %v613_v10  ;;  %v7513_v4 = vcombine.low %v7411_v44, %v7429_v52  ;;  %5528 = vmatpush3.bf16.msra.mxu1 %v6537_v14 }
  0x8c   : > { %9246 = vst [vmem:[#allocation25_spill] sm:$0xff] %v7502_v61  ;;  %v672_v63 = vshll.u32 %v7488_v31, 16  ;;  %v622_v35 = vrot.slane %v621_v19, 4  ;;  %v632_v8 = vrot.slane %v631_v1, 4  ;;  %v636_v45 = vrot.slane %v634_v7, 5 }
  0x8d   : > { %9247 = vst [vmem:[#allocation26_spill] sm:$0xff] %v7509_v25  ;;  %v7520_v33 = vrot.slane %v645_v6, 4  ;;  %v7522_v32 = vrot.slane %v658_v11, 5  ;;  %v665_v10 = vrot.slane %v663_v20, 4  ;;  %v668_v13 = vrot.slane %v666_v34, 5 }
  0x8e   : > { %v871_v36 = vrot.slane %v7429_v52, 5  ;;  %v865_v26 = vsel %vm6936_vm5, %v4955_v5, %v864_v50  ;;  %v868_v19 = vsel %vm6936_vm5, %v866_v53, %v867_v15  ;;  %v7533_v1 = vrot.slane %v655_v0, 4  ;;  %v7537_v6 = vld [vmem:[%s6892_s23 + $0xa4] sm:$0x1]  ;;  %v7540_v11 = vld [vmem:[%s6892_s23 + $0xb8] sm:$0xf] }
  0x8f   : > { %1853 = vmatmul.mubr.bf16.gmra.mrb[28].mxu0 %v7258_v58  ;;  %v676_v7 = vshrl.u32 %v7488_v31, 16  ;;  %v7544_v52 = vrot.slane %v672_v63, 5  ;;  %v4956_v20 = vrot.slane %v7411_v44, 9  ;;  %v874_v50 = vrot.slane %v7465_v28, 5 }
  0x90   : > { %1860 = vmatprep.mubr.bf16.mxu0 %v7413_v16  ;;  %v687_v5 = vshrl.u32 %v7507_v42, 16  ;;  %v627_v34 = vsel %vm6920_vm4, %v622_v35, %v7462_v55  ;;  %v690_v14 = vshll.u32 %v7507_v42, 16  ;;  %v637_v63 = vsel %vm6920_vm4, %v632_v8, %v636_v45 }
  0x91   : > { %v7557_v15 = vcombine.low %v865_v26, %v868_v19  ;;  %v873_v44 = vrot.slane %v871_v36, 4  ;;  %v678_v0 = vrot.slane %v676_v7, 4  ;;  %v711_v55 = vshrl.u32 %v7526_v37, 16 }
  0x92   : > { %2030 = vmatmul.mubr.bf16.gmra.mrb[20].mxu1 %v7444_v46  ;;  %v7517_v46 = vld [vmem:[%s6892_s23 + $0xac] sm:$0xf]  ;;  %v714_v35 = vshll.u32 %v7526_v37, 16  ;;  %v682_v59 = vshll.u32 %v7537_v6, 16  ;;  %v689_v22 = vrot.slane %v687_v5, 4  ;;  %v720_v8 = vshll.u32 %v7540_v11, 16 }
  0x93   : > { %2037 = vmatprep.mubr.bf16.mxu1 %v7455_v60  ;;  %v696_v53 = vshll.u32 %v7517_v46, 16  ;;  %9248 = vst [vmem:[#allocation27_spill] sm:$0xff] %v7557_v15  ;;  %v700_v28 = vshrl.u32 %v7517_v46, 16  ;;  %v724_v26 = vshrl.u32 %v7540_v11, 16  ;;  %v7569_v45 = vcombine.low %v627_v34, %v637_v63 }
  0x94   : > { %v669_v19 = vor.u32 %v668_v13, %v665_v10  ;;  %v878_v16 = vrot.slane %v7488_v31, 5  ;;  %v651_v10 = vsel %vm6920_vm4, %v7520_v33, %v7475_v57  ;;  %v713_v13 = vrot.slane %v711_v55, 4 }
  0x95   : > { %9249 = vst [vmem:[#allocation28_spill] sm:$0xff] %v7569_v45  ;;  %v7571_v7 = vrot.slane %v696_v53, 5  ;;  %v702_v5 = vrot.slane %v700_v28, 4  ;;  %v716_v34 = vrot.slane %v714_v35, 5  ;;  %v684_v53 = vrot.slane %v682_v59, 5 }
  0x96   : > { %v670_v57 = vrot.slane %v669_v19, 4  ;;  %v4957_v63 = vrot.slane %v7468_v3, 9  ;;  %v880_v55 = vrot.slane %v878_v16, 4  ;;  %v9250_v35 = vrot.slane %v6962_v41, 5 }
  0x97   : > { %1861 = vmatmul.mubr.bf16.gmra.mrb[32].mxu0 %v7312_v48  ;;  %v875_v48 = vsel %vm6936_vm5, %v873_v44, %v874_v50  ;;  %v726_v50 = vrot.slane %v724_v26, 4  ;;  %v703_v44 = vor.u32 %v702_v5, %v7571_v7  ;;  %v6627_v5 = vld [vmem:[%s6892_s23 + $0x14] sm:$0x1] }
  0x98   : > { %1868 = vmatprep.mubr.bf16.mxu0 %v7442_v27  ;;  %v872_v27 = vsel %vm6936_vm5, %v4956_v20, %v871_v36  ;;  %v661_v36 = vsel %vm6920_vm4, %v7533_v1, %v7522_v32  ;;  %v7593_v20 = vrot.slane %v720_v8, 5  ;;  %v881_v32 = vrot.slane %v7537_v6, 5 }
  0x99   : > { %v7599_v33 = vcombine.low %v872_v27, %v875_v48  ;;  %v885_v48 = vrot.slane %v7517_v46, 5  ;;  %v717_v27 = vor.u32 %v716_v34, %v713_v13  ;;  %v9252_v6 = vmov %v9250_v35 }
  0x9a   : > { %2038 = vmatmul.mubr.bf16.gmra.mrb[24].mxu1 %v7502_v61  ;;  %v7562_v61 = vcombine.low %v7468_v3, %v7488_v31  ;;  %v679_v31 = vor.u32 %v678_v0, %v7544_v52  ;;  %v7607_v0 = vcombine.low %v7507_v42, %v7517_v46  ;;  %v727_v59 = vor.u32 %v726_v50, %v7593_v20 }
  0x9b   : > { %2045 = vmatprep.mubr.bf16.mxu1 %v7513_v4  ;;  %v796_v8 = vrot.slane %v9252_v6, 4  ;;  %v7620_v26 = vcombine.low %v651_v10, %v661_v36  ;;  %v879_v46 = vsel %vm6936_vm5, %v4957_v63, %v878_v16  ;;  %v797_v13 = vrot.slane %v6627_v5, 5  ;;  %v6629_v5 = vld [vmem:[%s6892_s23 + $0x1c] sm:$0xf] }
  0x9c   : > { %v680_v19 = vrot.slane %v679_v31, 4  ;;  %v704_v50 = vrot.slane %v703_v44, 4  ;;  %v718_v41 = vrot.slane %v717_v27, 4  ;;  %v882_v16 = vsel %vm6936_vm5, %v880_v55, %v881_v32  ;;  %v7654_v27 = vld [vmem:[%s6892_s23 + $0xc0] sm:$0xf] }
  0x9d   : > { %9253 = vst [vmem:[#allocation29_spill] sm:$0xff] %v7620_v26  ;;  %v798_v10 = vsel %vm6936_vm5, %v796_v8, %v797_v13  ;;  %v728_v36 = vrot.slane %v727_v59, 4  ;;  %v892_v63 = vrot.slane %v7540_v11, 5  ;;  %v7648_v32 = vcombine.low %v7526_v37, %v7540_v11  ;;  %v7657_v59 = vld [vmem:[%s6892_s23 + $0xc4] sm:$0xf] }
  0x9e   : > { %v685_v44 = vsel %vm6920_vm4, %v680_v19, %v684_v53  ;;  %v6628_v19 = vld [vmem:[%s6892_s23 + $0x18] sm:$0xf]  ;;  %v801_v13 = vrot.slane %v6629_v5, 5  ;;  %v9258_v5 = vld [vmem:[#allocation22_spill] sm:$0xff] }
  0x9f   : > { %1869 = vmatmul.mubr.bf16.gmra.mrb[36].mxu0 %v7358_v43  ;;  %v7574_v43 = vld [vmem:[%s6892_s23 + $0xb0] sm:$0x1] }
  0xa0   : > { %1876 = vmatprep.mubr.bf16.mxu0 %v7509_v25  ;;  %v692_v25 = vrot.slane %v690_v14, 5  ;;  %v7596_v14 = vld [vmem:[%s6892_s23 + $0xbc] sm:$0x1]  ;;  %v706_v28 = vshll.u32 %v7574_v43, 16 }
  0xa1   : > { %v730_v3 = vshll.u32 %v7596_v14, 16  ;;  %v895_v11 = vrot.slane %v7596_v14, 5  ;;  %v723_v14 = vsel %vm6920_vm4, %v718_v41, %v7593_v20  ;;  %v6507_v20 = vld [vmem:[%s9163_s1 + $0x100] sm:$0xff]  }
  0xa2   : > { %2046 = vmatmul.mubr.bf16.gmra.mrb[28].mxu1 %v7557_v15  ;;  %v693_v1 = vor.u32 %v692_v25, %v689_v22  ;;  %v9251_v22 = vrot.slane %v6959_v40, 9  ;;  %v708_v15 = vrot.slane %v706_v28, 5  ;;  %v887_v40 = vrot.slane %v885_v48, 4  ;;  %v6630_v41 = vld [vmem:[%s6892_s23 + $0x20] sm:$0x1] }
  0xa3   : > { %2053 = vmatprep.mubr.bf16.mxu1 %v7562_v61  ;;  %v7644_v28 = vcombine.low %v879_v46, %v882_v16  ;;  %v4946_v46 = vrot.slane %v6628_v19, 9  ;;  %v6515_v16 = vld [vmem:[%s9163_s1 + $0x110] sm:$0xff]   ;;  %v6535_v19 = vld [vmem:[%s9163_s1 + $0x138] sm:$0xff]  }
  0xa4   : > { %v795_v25 = vsel %vm6936_vm5, %v9251_v22, %v9250_v35  ;;  %v694_v34 = vrot.slane %v693_v1, 4  ;;  %v888_v35 = vrot.slane %v7574_v43, 5  ;;  %v4959_v43 = vrot.slane %v7526_v37, 9 }
  0xa5   : > { %v7634_v31 = vcombine.low %v795_v25, %v798_v10  ;;  %v675_v1 = vsel %vm6920_vm4, %v670_v57, %v7544_v52  ;;  %v894_v37 = vrot.slane %v892_v63, 4  ;;  %v804_v10 = vrot.slane %v6630_v41, 5  ;;  %v6544_v41 = vld [vmem:[%s9163_s1 + $0x230] sm:$0xff]  }
  0xa6   : > { %v7650_v55 = vcombine.low %v675_v1, %v685_v44  ;;  %v889_v57 = vsel %vm6936_vm5, %v887_v40, %v888_v35  ;;  %v699_v53 = vsel %vm6920_vm4, %v694_v34, %v7571_v7  ;;  %v893_v7 = vsel %vm6936_vm5, %v4959_v43, %v892_v63  ;;  %v6510_v34 = vld [vmem:[%s9163_s1 + $0x148] sm:$0xff]   ;;  %v6522_v63 = vld [vmem:[%s9163_s1 + $0x160] sm:$0xff]  }
  0xa7   : > { %1877 = vmatmul.mubr.bf16.gmra.mrb[40].mxu0 %v7406_v21  ;;  %v9257_v40 = vcombine.low %v6995_v62, %v6955_v39  ;;  %v803_v35 = vrot.slane %v801_v13, 4  ;;  %v6518_v39 = vld [vmem:[%s9163_s1 + $0x158] sm:$0xff]   ;;  %v6632_v44 = vld [vmem:[%s6892_s23 + $0x24] sm:$0xf] }
  0xa8   : > { %1884 = vmatprep.mubr.bf16.mxu0 %v7569_v45  ;;  %v4958_v45 = vrot.slane %v7507_v42, 9  ;;  %v732_v42 = vrot.slane %v730_v3, 5  ;;  %9254 = vst [vmem:[#allocation30_spill] sm:$0xff] %v7650_v55  ;;  %v709_v3 = vsel %vm6920_vm4, %v704_v50, %v708_v15  ;;  %v896_v15 = vsel %vm6936_vm5, %v894_v37, %v895_v11  ;;  %v6511_v50 = vld [vmem:[%s9163_s1 + $0x108] sm:$0xff]   ;;  %v6519_v62 = vld [vmem:[%s9163_s1 + $0x118] sm:$0xff]  }
  0xa9   : > { %v7693_v6 = vcombine.low %v893_v7, %v896_v15  ;;  %v6633_v37 = vld [vmem:[%s6892_s23 + $0x2c] sm:$0x1] }
  0xaa   : > { %2054 = vmatmul.mubr.bf16.gmra.mrb[32].mxu1 %v7599_v33  ;;  %v886_v52 = vsel %vm6936_vm5, %v4958_v45, %v885_v48  ;;  %v7676_v45 = vcombine.low %v7654_v27, %v7657_v59  ;;  %v7678_v48 = vcombine.low %v699_v53, %v709_v3  ;;  %v733_v25 = vsel %vm6920_vm4, %v728_v36, %v732_v42  ;;  %v6631_v42 = vld [vmem:[%s6892_s23 + $0x28] sm:$0xf] }
  0xab   : > { %2061 = vmatprep.mubr.bf16.mxu1 %v7607_v0  ;;  %v7672_v22 = vcombine.low %v886_v52, %v889_v57  ;;  %v7695_v8 = vcombine.low %v723_v14, %v733_v25  ;;  %v805_v36 = vsel %vm6936_vm5, %v803_v35, %v804_v10  ;;  %v808_v43 = vrot.slane %v6631_v42, 5  ;;  %v6526_v53 = vld [vmem:[%s9163_s1 + $0x168] sm:$0xff]   ;;  %v6531_v25 = vld [vmem:[%s9163_s1 + $0x130] sm:$0xff]   ;;  %v9263_v35 = vld [vmem:[#allocation12_spill] sm:$0xff] }
  0xac   : > { %9255 = vst [vmem:[#allocation31_spill] sm:$0xff] %v7678_v48  ;;  %v4947_v52 = vrot.slane %v6632_v44, 9  ;;  %v811_v11 = vrot.slane %v6633_v37, 5  ;;  %v6527_v3 = vld [vmem:[%s9163_s1 + $0x128] sm:$0xff]   ;;  %v6545_v10 = vld [vmem:[%s9163_s1 + $0x238] sm:$0xff]   ;;  %v9267_v42 = vld [vmem:[#allocation18_spill] sm:$0xff] }
  0xad   : > { %9256 = vst [vmem:[#allocation32_spill] sm:$0xff] %v7695_v8  ;;  %v810_v57 = vrot.slane %v808_v43, 4 }
  0xae   : > { %v809_v7 = vsel %vm6936_vm5, %v4947_v52, %v808_v43  ;;  %v7839_v52 = vld [vmem:[%s6892_s23 + $0xc8] sm:$0x1] }
  0xaf   : > { %1885 = vmatmul.mubr.bf16.gmra.mrb[44].mxu0 %v7455_v60  ;;  %v812_v15 = vsel %vm6936_vm5, %v810_v57, %v811_v11  ;;  %v7845_v57 = vld [vmem:[%s6892_s23 + $0xd0] sm:$0xf] }
  0xb0   : > { %1892 = vmatprep.mubr.bf16.mxu0 %v7620_v26  ;;  %v7771_v14 = vcombine.low %v809_v7, %v812_v15  ;;  %v9268_v7 = vld [vmem:[#allocation21_spill] sm:$0xff] }
  0xb2   : > { %2062 = vmatmul.mubr.bf16.gmra.mrb[36].mxu1 %v7644_v28 }
  0xb3   : > { %2069 = vmatprep.mubr.bf16.mxu1 %v7648_v32 }
  0xb7   : > { %1893 = vmatmul.mubr.bf16.gmra.mrb[48].mxu0 %v7513_v4 }
  0xb8   : > { %1900 = vmatprep.mubr.bf16.mxu0 %v7650_v55 }
  0xba   : > { %2070 = vmatmul.mubr.bf16.gmra.mrb[40].mxu1 %v7672_v22 }
  0xbb   : > { %2077 = vmatprep.mubr.bf16.mxu1 %v7676_v45 }
  0xbf   : > { %1901 = vmatmul.mubr.bf16.gmra.mrb[52].mxu0 %v7562_v61 }
  0xc0   : > { %1908 = vmatprep.mubr.bf16.mxu0 %v7678_v48 }
  0xc2   : > { %2078 = vmatmul.mubr.bf16.gmra.mrb[44].mxu1 %v7693_v6 }
  0xc3   : > { %2279 = vmatprep.mubr.bf16.mxu1 %v7077_v49 }
  0xc7   : > { %1909 = vmatmul.mubr.bf16.gmra.mrb[56].mxu0 %v7607_v0 }
  0xc8   : > { %1916 = vmatprep.mubr.bf16.mxu0 %v7695_v8 }
  0xca   : > { %2280 = vmatmul.mubr.bf16.vlgmr.msra.gmra.mrb[48].mxu1 %v7116_v9 }
  0xcb   : > { %2287 = vmatprep.mubr.bf16.mxu1 %v7128_v2 }
  0xcf   : > { %1917 = vmatmul.mubr.bf16.gmra.mrb[60].mxu0 %v7648_v32 }
  0xd0   : > { %1957 = vmatprep.mubr.bf16.mxu0 %v7063_v29  ;;  %v6514_v29 = vld [vmem:[%s9163_s1 + $0x150] sm:$0xff]  }
  0xd2   : > { %2288 = vmatmul.mubr.bf16.gmra.mrb[52].mxu1 %v7170_v56 }
  0xd3   : > { %2295 = vmatprep.mubr.bf16.mxu1 %v7191_v12 }
  0xd7   : > { %1958 = vmatmul.mubr.bf16.vlgmr.msra.gmra.mrb[64].mxu0 %v9257_v40  ;;  %v9261_v40 = vld [vmem:[#allocation19_spill] sm:$0xff] }
  0xd8   : > { %5402 = vmatpush3.bf16.msra.mxu0 %v6507_v20  ;;  %1965 = vmatprep.mubr.bf16.mxu0 %v7116_v9  ;;  %v802_v9 = vsel %vm6936_vm5, %v4946_v46, %v801_v13  ;;  %v6538_v46 = vld [vmem:[%s9163_s1 + $0x200] sm:$0xff]   ;;  %v6541_v13 = vld [vmem:[%s9163_s1 + $0x218] sm:$0xff]   ;;  %v9259_v20 = vld [vmem:[#allocation17_spill] sm:$0xff] }
  0xd9   : > { %5403 = vmatprep.subr.bf16.mxu0 %v6510_v34  ;;  %v7747_v1 = vcombine.low %v802_v9, %v805_v36  ;;  %v6542_v34 = vld [vmem:[%s9163_s1 + $0x220] sm:$0xff]   ;;  %v901_v9 = vshll.u32 %v7654_v27, 16  ;;  %v911_v36 = vshrl.u32 %v7657_v59, 16 }
  0xda   : > { %2296 = vmatmul.mubr.bf16.gmra.mrb[56].mxu1 %v7243_v54 }
  0xdb   : > { %2303 = vmatprep.mubr.bf16.mxu1 %v7245_v17  ;;  %v913_v44 = vrot.slane %v911_v36, 4  ;;  %v9269_v36 = vld [vmem:[#allocation24_spill] sm:$0xff] }
  0xdc   : > { %5404 = vmatpush3.bf16.msra.mxu0 %v6511_v50  ;;  %v6543_v50 = vld [vmem:[%s9163_s1 + $0x228] sm:$0xff]  }
  0xdd   : > { %5405 = vmatprep.subr.bf16.mxu0 %v6514_v29  ;;  %v9262_v29 = vld [vmem:[#allocation26_spill] sm:$0xff] }
  0xdf   : > { %1966 = vmatmul.mubr.bf16.gmra.mrb[68].mxu0 %v7634_v31 }
  0xe0   : > { %5406 = vmatpush3.bf16.msra.mxu0 %v6515_v16  ;;  %1973 = vmatprep.mubr.bf16.mxu0 %v7170_v56  ;;  %v6523_v56 = vld [vmem:[%s9163_s1 + $0x120] sm:$0xff]  }
  0xe1   : > { %5407 = vmatprep.subr.bf16.mxu0 %v6518_v39  ;;  %v9264_v16 = vld [vmem:[#allocation28_spill] sm:$0xff]  ;;  %v9265_v39 = vld [vmem:[#allocation14_spill] sm:$0xff] }
  0xe2   : > { %2304 = vmatmul.mubr.bf16.gmra.mrb[60].mxu1 %v7149_v38  ;;  %v6530_v38 = vld [vmem:[%s9163_s1 + $0x170] sm:$0xff]  }
  0xe3   : > { %2311 = vmatprep.mubr.bf16.mxu1 %v7308_v47 }
  0xe4   : > { %5408 = vmatpush3.bf16.msra.mxu0 %v6519_v62  ;;  %v9266_v62 = vld [vmem:[#allocation15_spill] sm:$0xff] }
  0xe5   : > { %5409 = vmatprep.subr.bf16.mxu0 %v6522_v63  ;;  %v903_v63 = vrot.slane %v901_v9, 5 }
  0xe7   : > { %1974 = vmatmul.mubr.bf16.gmra.mrb[72].mxu0 %v7747_v1 }
  0xe8   : > { %5410 = vmatpush3.bf16.msra.mxu0 %v6523_v56  ;;  %1981 = vmatprep.mubr.bf16.mxu0 %v7243_v54  ;;  %v6534_v54 = vld [vmem:[%s9163_s1 + $0x178] sm:$0xff]  }
  0xe9   : > { %5411 = vmatprep.subr.bf16.mxu0 %v6526_v53  ;;  %v917_v53 = vshll.u32 %v7839_v52, 16 }
  0xea   : > { %2312 = vmatmul.mubr.bf16.gmra.mrb[64].mxu1 %v7197_v18  ;;  %v6539_v18 = vld [vmem:[%s9163_s1 + $0x208] sm:$0xff]  }
  0xeb   : > { %2319 = vmatprep.mubr.bf16.mxu1 %v7364_v51 }
  0xec   : > { %5412 = vmatpush3.bf16.msra.mxu0 %v6527_v3 }
  0xed   : > { %5413 = vmatprep.subr.bf16.mxu0 %v6530_v38  ;;  %v941_v38 = vshll.u32 %v7845_v57, 16 }
  0xef   : > { %1982 = vmatmul.mubr.bf16.gmra.mrb[76].mxu0 %v7771_v14 }
  0xf0   : > { %5414 = vmatpush3.bf16.msra.mxu0 %v6531_v25  ;;  %2118 = vmatprep.mubr.bf16.mxu0 %v7634_v31  ;;  %v6540_v31 = vld [vmem:[%s9163_s1 + $0x210] sm:$0xff]   ;;  %v945_v25 = vshrl.u32 %v7845_v57, 16 }
  0xf1   : > { %5415 = vmatprep.subr.bf16.mxu0 %v6534_v54 }
  0xf2   : > { %2320 = vmatmul.mubr.bf16.gmra.mrb[68].mxu1 %v7258_v58  ;;  %v9260_v58 = vld [vmem:[#allocation23_spill] sm:$0xff] }
  0xf3   : > { %2327 = vmatprep.mubr.bf16.mxu1 %v9258_v5 }
  0xf4   : > { %5416 = vmatpush3.bf16.msra.mxu0 %v6535_v19 }
  0xf5   : > { %6145 = vmatprep.subr.bf16.mxu0 %v6538_v46 }
  0xf7   : > { %2119 = vmatmul.mubr.bf16.vlgmr.msra.gmra.mrb[80].mxu0 %v7040_v24 }
  0xf8   : > { %6146 = vmatpush3.bf16.msra.mxu0 %v6538_v46  ;;  %2126 = vmatprep.mubr.bf16.mxu0 %v7747_v1 }
  0xf9   : > { %6147 = vmatprep.subr.bf16.mxu0 %v6539_v18 }
  0xfa   : > { %2328 = vmatmul.mubr.bf16.gmra.mrb[72].mxu1 %v9259_v20 }
  0xfb   : > { %2335 = vmatprep.mubr.bf16.mxu1 %v9260_v58 }
  0xfc   : > { %6148 = vmatpush3.bf16.msra.mxu0 %v6539_v18  ;;  %v919_v18 = vrot.slane %v917_v53, 5 }
  0xfd   : > { %6149 = vmatprep.subr.bf16.mxu0 %v6540_v31 }
  0xff   : > { %2127 = vmatmul.mubr.bf16.gmra.mrb[84].mxu0 %v7077_v49 }
 0x100   : > { %2134 = vmatprep.mubr.bf16.mxu0 %v7771_v14  ;;  %6150 = vmatpush3.bf16.msra.mxu0 %v6540_v31 }
 0x101   : > { %6151 = vmatprep.subr.bf16.mxu0 %v6541_v13 }
 0x102   : > { %2336 = vmatmul.mubr.bf16.gmra.mrb[76].mxu1 %v9261_v40  ;;  %v947_v40 = vrot.slane %v945_v25, 4 }
 0x103   : > { %2343 = vmatprep.mubr.bf16.mxu1 %v9262_v29 }
 0x104   : > { %6152 = vmatpush3.bf16.msra.mxu0 %v6541_v13 }
 0x105   : > { %6153 = vmatprep.subr.bf16.mxu0 %v6542_v34 }
 0x107   : > { %2135 = vmatmul.mubr.bf16.gmra.mrb[88].mxu0 %v7128_v2 }
 0x108   : > { %2142 = vmatprep.mubr.bf16.mxu0 %v9263_v35  ;;  %6154 = vmatpush3.bf16.msra.mxu0 %v6542_v34 }
 0x109   : > { %6155 = vmatprep.subr.bf16.mxu0 %v6543_v50 }
 0x10a   : > { %2344 = vmatmul.mubr.bf16.gmra.mrb[80].mxu1 %v7406_v21  ;;  %v898_v21 = vshrl.u32 %v7654_v27, 16 }
 0x10b   : > { %2351 = vmatprep.mubr.bf16.mxu1 %v9264_v16 }
 0x10c   : > { %6156 = vmatpush3.bf16.msra.mxu0 %v6543_v50  ;;  %v900_v43 = vrot.slane %v898_v21, 4  ;;  %v943_v50 = vrot.slane %v941_v38, 5 }
 0x10d   : > { %6157 = vmatprep.subr.bf16.mxu0 %v6544_v41 }
 0x10e   : > { %v904_v37 = vor.u32 %v903_v63, %v900_v43  ;;  %v948_v63 = vor.u32 %v947_v40, %v943_v50 }
 0x10f   : > { %2143 = vmatmul.mubr.bf16.gmra.mrb[92].mxu0 %v7191_v12 }
 0x110   : > { %2150 = vmatprep.mubr.bf16.mxu0 %v9265_v39  ;;  %6158 = vmatpush3.bf16.msra.mxu0 %v6544_v41  ;;  %v905_v19 = vrot.slane %v904_v37, 4  ;;  %v949_v38 = vrot.slane %v948_v63, 4 }
 0x111   : > { %6159 = vmatprep.subr.bf16.mxu0 %v6545_v10 }
 0x112   : > { %2352 = vmatmul.mubr.bf16.gmra.mrb[84].mxu1 %v7455_v60  ;;  %v907_v60 = vshll.u32 %v7657_v59, 16 }
 0x113   : > { %2359 = vmatprep.mubr.bf16.mxu1 %v7620_v26 }
 0x114   : > { %6160 = vmatpush3.bf16.msra.mxu0 %v6545_v10  ;;  %v909_v56 = vrot.slane %v907_v60, 5  ;;  %v7859_v10 = vld [vmem:[%s6892_s23 + $0xd4] sm:$0x1] }
 0x116   : > { %v914_v11 = vor.u32 %v913_v44, %v909_v56  ;;  %v910_v9 = vsel %vm6920_vm4, %v905_v19, %v909_v56  ;;  %v951_v44 = vshll.u32 %v7859_v10, 16 }
 0x117   : > { %2151 = vmatmul.mubr.bf16.gmra.mrb[96].mxu0 %v7245_v17 }
 0x118   : > { %2158 = vmatprep.mubr.bf16.mxu0 %v9266_v62  ;;  %v915_v46 = vrot.slane %v914_v11, 4  ;;  %v953_v25 = vrot.slane %v951_v44, 5 }
 0x11a   : > { %2360 = vmatmul.mubr.bf16.gmra.mrb[88].mxu1 %v7513_v4  ;;  %v7842_v4 = vld [vmem:[%s6892_s23 + $0xcc] sm:$0xf]  ;;  %v920_v60 = vsel %vm6920_vm4, %v915_v46, %v919_v18  ;;  %v954_v46 = vsel %vm6920_vm4, %v949_v38, %v953_v25 }
 0x11b   : > { %2367 = vmatprep.mubr.bf16.mxu1 %v7650_v55  ;;  %v932_v3 = vshrl.u32 %v7842_v4, 16  ;;  %v935_v15 = vshll.u32 %v7842_v4, 16  ;;  %v7872_v53 = vcombine.low %v910_v9, %v920_v60  ;;  %v9272_v9 = vld [vmem:[#allocation27_spill] sm:$0xff] }
 0x11d   : > { %v934_v31 = vrot.slane %v932_v3, 4  ;;  %v937_v34 = vrot.slane %v935_v15, 5  ;;  %9270 = vst [vmem:[#allocation17_spill] sm:$0xff] %v7872_v53 }
 0x11f   : > { %2159 = vmatmul.mubr.bf16.gmra.mrb[100].mxu0 %v7308_v47  ;;  %v938_v43 = vor.u32 %v937_v34, %v934_v31  ;;  %v6548_v47 = vld [vmem:[#allocation2] sm:$0xff]  }
 0x120   : > { %2166 = vmatprep.mubr.bf16.mxu0 %v9267_v42 }
 0x121   : > { %v939_v15 = vrot.slane %v938_v43, 4  ;;  %v5013_v43 = vcombine.low %v7842_v4, %v7845_v57 }
 0x122   : > { %2368 = vmatmul.mubr.bf16.gmra.mrb[92].mxu1 %v7562_v61 }
 0x123   : > { %2375 = vmatprep.mubr.bf16.mxu1 %v7678_v48  ;;  %v944_v19 = vsel %vm6920_vm4, %v939_v15, %v943_v50 }
 0x127   : > { %2167 = vmatmul.mubr.bf16.gmra.mrb[104].mxu0 %v7364_v51  ;;  %v6547_v51 = vld [vmem:[#allocation2 + $0x40] sm:$0xff]  }
 0x128   : > { %2174 = vmatprep.mubr.bf16.mxu0 %v9268_v7  ;;  %5649 = vmatprep.subr.bf16.mxu1 %v6547_v51 }
 0x129   : > { %5650 = vmatpush3.bf16.msra.mxu1 %v6548_v47 }
 0x12a   : > { %v5193_v61 = vpop.f32.mrb[0].mxu0  ;;  %2376 = vmatmul.mubr.bf16.gmra.mrb[96].mxu1 %v7607_v0 }
 0x12b   : > { %v5194_v54 = vpop.f32.mrb[1].mxu0  ;;  %2383 = vmatprep.mubr.bf16.mxu1 %v7695_v8 }
 0x12c   : > { %v7856_v13 = vadd.f32 %v5194_v54, %v5193_v61  ;;  %v5196_v20 = vpop.f32.mrb[2].mxu0  ;;  %v9271_v54 = vld [vmem:[#allocation25_spill] sm:$0xff] }
 0x12d   : > { %v5197_v41 = vpop.f32.mrb[3].mxu0 }
 0x12e   : > { %v7861_v21 = vadd.f32 %v5197_v41, %v5196_v20  ;;  %v5014_v20 = vcombine.low %v944_v19, %v954_v46 }
 0x12f   : > { %2175 = vmatmul.mubr.bf16.gmra.mrb[108].mxu0 %v9258_v5 }
 0x130   : > { %2182 = vmatprep.mubr.bf16.mxu0 %v9269_v36 }
 0x132   : > { %v5199_v37 = vpop.f32.mrb[4].mxu0  ;;  %2384 = vmatmul.mubr.bf16.gmra.mrb[100].mxu1 %v7648_v32 }
 0x133   : > { %v5200_v11 = vpop.f32.mrb[5].mxu0  ;;  %2391 = vmatprep.mubr.bf16.mxu1 %v7872_v53 }
 0x134   : > { %v7874_v0 = vadd.f32 %v5200_v11, %v5199_v37  ;;  %v5202_v3 = vpop.f32.mrb[6].mxu0 }
 0x135   : > { %v5203_v56 = vpop.f32.mrb[7].mxu0 }
 0x136   : > { %v7876_v61 = vadd.f32 %v5203_v56, %v5202_v3 }
 0x137   : > { %2183 = vmatmul.mubr.bf16.gmra.mrb[112].mxu0 %v9260_v58 }
 0x138   : > { %2190 = vmatprep.mubr.bf16.mxu0 %v9271_v54 }
 0x13a   : > { %v5205_v18 = vpop.f32.mrb[8].mxu0  ;;  %2392 = vmatmul.mubr.bf16.gmra.mrb[104].mxu1 %v7676_v45 }
 0x13b   : > { %v5206_v31 = vpop.f32.mrb[9].mxu0  ;;  %2399 = vmatprep.mubr.bf16.mxu1 %v5014_v20 }
 0x13c   : > { %v7886_v34 = vadd.f32 %v5206_v31, %v5205_v18  ;;  %v5208_v40 = vpop.f32.mrb[10].mxu0 }
 0x13d   : > { %v5209_v41 = vpop.f32.mrb[11].mxu0  ;;  %v5329_v50 = vpop.f32.mrb[0].mxu1 }
 0x13e   : > { %v7888_v32 = vadd.f32 %v5209_v41, %v5208_v40  ;;  %v5330_v23 = vpop.f32.mrb[1].mxu1 }
 0x13f   : > { %2191 = vmatmul.mubr.bf16.gmra.mrb[116].mxu0 %v9262_v29  ;;  %v5331_v44 = vadd.f32 %v5330_v23, %v5329_v50  ;;  %v5332_v37 = vpop.f32.mrb[2].mxu1 }
 0x140   : > { %2198 = vmatprep.mubr.bf16.mxu0 %v9272_v9  ;;  %v5333_v15 = vpop.f32.mrb[3].mxu1 }
 0x141   : > { %v5334_v45 = vadd.f32 %v5333_v15, %v5332_v37 }
 0x142   : > { %v5211_v60 = vpop.f32.mrb[12].mxu0  ;;  %2400 = vmatmul.mubr.bf16.gmra.mrb[108].mxu1 %v5013_v43 }
 0x143   : > { %v5212_v63 = vpop.f32.mrb[13].mxu0 }
 0x144   : > { %v7895_v11 = vadd.f32 %v5212_v63, %v5211_v60  ;;  %v5214_v3 = vpop.f32.mrb[14].mxu0  ;;  %v7904_v60 = vld [vmem:[%s9164_s2] ss:$0 sm:$0xff] }
 0x145   : > { %v5215_v38 = vpop.f32.mrb[15].mxu0  ;;  %v5335_v56 = vpop.f32.mrb[4].mxu1 }
 0x146   : > { %v7897_v25 = vadd.f32 %v5215_v38, %v5214_v3  ;;  %v5336_v46 = vpop.f32.mrb[5].mxu1 }
 0x147   : > { %2199 = vmatmul.mubr.bf16.gmra.mrb[120].mxu0 %v9264_v16  ;;  %v5337_v31 = vadd.f32 %v5336_v46, %v5335_v56  ;;  %v5338_v20 = vpop.f32.mrb[6].mxu1 }
 0x148   : > { %2206 = vmatprep.mubr.bf16.mxu0 %v7599_v33  ;;  %v5339_v50 = vpop.f32.mrb[7].mxu1 }
 0x149   : > { %v5340_v43 = vadd.f32 %v5339_v50, %v5338_v20 }
 0x14a   : > { %v5217_v19 = vpop.f32.mrb[16].mxu0 }
 0x14b   : > { %v5218_v18 = vpop.f32.mrb[17].mxu0 }
 0x14c   : > { %v5219_v40 = vadd.f32 %v5218_v18, %v5217_v19  ;;  %v5220_v41 = vpop.f32.mrb[18].mxu0 }
 0x14d   : > { %v5221_v23 = vpop.f32.mrb[19].mxu0  ;;  %v5341_v38 = vpop.f32.mrb[8].mxu1 }
 0x14e   : > { %v1831_v63 = vadd.f32 %v5219_v40, %v7904_v60  ;;  %v5222_v37 = vadd.f32 %v5221_v23, %v5220_v41  ;;  %v5342_v19 = vpop.f32.mrb[9].mxu1 }
 0x14f   : > { %2207 = vmatmul.mubr.bf16.gmra.mrb[124].mxu0 %v7620_v26  ;;  %v5343_v16 = vadd.f32 %v5342_v19, %v5341_v38  ;;  %v5344_v29 = vpop.f32.mrb[10].mxu1 }
 0x150   : > { %v1834_v3 = vadd.f32 %v5222_v37, %v7904_v60  ;;  %2214 = vmatprep.mubr.bf16.mxu0 %v7644_v28  ;;  %v7910_v15 = vadd.f32 %v5331_v44, %v1831_v63  ;;  %v5345_v40 = vpop.f32.mrb[11].mxu1 }
 0x151   : > { %v5346_v23 = vadd.f32 %v5345_v40, %v5344_v29 }
 0x152   : > { %v5223_v56 = vpop.f32.mrb[20].mxu0  ;;  %v7912_v46 = vadd.f32 %v5334_v45, %v1834_v3  ;;  %v926_v3 = vrot.slane %v7657_v59, 5 }
 0x153   : > { %v5224_v18 = vpop.f32.mrb[21].mxu0 }
 0x154   : > { %v5225_v20 = vadd.f32 %v5224_v18, %v5223_v56  ;;  %v5226_v50 = vpop.f32.mrb[22].mxu0  ;;  %v928_v5 = vrot.slane %v926_v3, 4 }
 0x155   : > { %v5227_v41 = vpop.f32.mrb[23].mxu0  ;;  %v5347_v45 = vpop.f32.mrb[12].mxu1 }
 0x156   : > { %v1839_v26 = vadd.f32 %v5225_v20, %v7904_v60  ;;  %v5228_v37 = vadd.f32 %v5227_v41, %v5226_v50  ;;  %v5348_v56 = vpop.f32.mrb[13].mxu1 }
 0x157   : > { %2215 = vmatmul.mubr.bf16.gmra.mrb[128].mxu0 %v7650_v55  ;;  %v5349_v29 = vadd.f32 %v5348_v56, %v5347_v45  ;;  %v5350_v40 = vpop.f32.mrb[14].mxu1 }
 0x158   : > { %v1842_v44 = vadd.f32 %v5228_v37, %v7904_v60  ;;  %2222 = vmatprep.mubr.bf16.mxu0 %v7672_v22  ;;  %v7918_v63 = vadd.f32 %v5337_v31, %v1839_v26  ;;  %v5351_v41 = vpop.f32.mrb[15].mxu1  ;;  %v4960_v37 = vrot.slane %v7654_v27, 9  ;;  %v929_v26 = vrot.slane %v7839_v52, 5 }
 0x159   : > { %v5352_v58 = vadd.f32 %v5351_v41, %v5350_v40 }
 0x15a   : > { %v5229_v38 = vpop.f32.mrb[24].mxu0  ;;  %v7921_v19 = vadd.f32 %v5340_v43, %v1842_v44  ;;  %v927_v27 = vsel %vm6936_vm5, %v4960_v37, %v926_v3  ;;  %v930_v52 = vsel %vm6936_vm5, %v928_v5, %v929_v26 }
 0x15b   : > { %v5230_v18 = vpop.f32.mrb[25].mxu0  ;;  %v7937_v51 = vcombine.low %v927_v27, %v930_v52 }
 0x15c   : > { %v5231_v20 = vadd.f32 %v5230_v18, %v5229_v38  ;;  %v5232_v50 = vpop.f32.mrb[26].mxu0 }
 0x15d   : > { %v5233_v55 = vpop.f32.mrb[27].mxu0  ;;  %v5353_v45 = vpop.f32.mrb[16].mxu1 }
 0x15e   : > { %v1847_v31 = vadd.f32 %v5231_v20, %v7904_v60  ;;  %v5234_v59 = vadd.f32 %v5233_v55, %v5232_v50  ;;  %v5354_v38 = vpop.f32.mrb[17].mxu1 }
 0x15f   : > { %2223 = vmatmul.mubr.bf16.gmra.mrb[132].mxu0 %v7678_v48  ;;  %v5355_v40 = vadd.f32 %v5354_v38, %v5353_v45  ;;  %v5356_v20 = vpop.f32.mrb[18].mxu1 }
 0x160   : > { %v1850_v43 = vadd.f32 %v5234_v59, %v7904_v60  ;;  %2230 = vmatprep.mubr.bf16.mxu0 %v7693_v6  ;;  %v7929_v44 = vadd.f32 %v5343_v16, %v1847_v31  ;;  %v5357_v16 = vpop.f32.mrb[19].mxu1 }
 0x161   : > { %v5358_v59 = vadd.f32 %v5357_v16, %v5356_v20 }
 0x162   : > { %v5235_v55 = vpop.f32.mrb[28].mxu0  ;;  %v7935_v56 = vadd.f32 %v5346_v23, %v1850_v43 }
 0x163   : > { %v5236_v18 = vpop.f32.mrb[29].mxu0 }
 0x164   : > { %v5237_v50 = vadd.f32 %v5236_v18, %v5235_v55  ;;  %v5238_v41 = vpop.f32.mrb[30].mxu0 }
 0x165   : > { %v5239_v31 = vpop.f32.mrb[31].mxu0  ;;  %v5359_v23 = vpop.f32.mrb[20].mxu1 }
 0x166   : > { %v1855_v3 = vadd.f32 %v5237_v50, %v7904_v60  ;;  %v5240_v37 = vadd.f32 %v5239_v31, %v5238_v41  ;;  %v5360_v43 = vpop.f32.mrb[21].mxu1 }
 0x167   : > { %2231 = vmatmul.mubr.bf16.gmra.mrb[136].mxu0 %v7695_v8  ;;  %v5361_v52 = vadd.f32 %v5360_v43, %v5359_v23  ;;  %v5362_v55 = vpop.f32.mrb[22].mxu1  ;;  %v6550_v8 = vld [vmem:[#allocation2 + $0x8] sm:$0xff]  }
 0x168   : > { %v1858_v47 = vadd.f32 %v5240_v37, %v7904_v60  ;;  %2238 = vmatprep.mubr.bf16.mxu0 %v7937_v51  ;;  %v7943_v5 = vadd.f32 %v5349_v29, %v1855_v3  ;;  %v5363_v20 = vpop.f32.mrb[23].mxu1  ;;  %v6549_v37 = vld [vmem:[#allocation2 + $0x48] sm:$0xff]  }
 0x169   : > { %v5364_v41 = vadd.f32 %v5363_v20, %v5362_v55  ;;  %5651 = vmatprep.subr.bf16.mxu1 %v6549_v37 }
 0x16a   : > { %v5241_v26 = vpop.f32.mrb[32].mxu0  ;;  %v7945_v45 = vadd.f32 %v5352_v58, %v1858_v47  ;;  %5652 = vmatpush3.bf16.msra.mxu1 %v6550_v8 }
 0x16b   : > { %v5242_v27 = vpop.f32.mrb[33].mxu0 }
 0x16c   : > { %v5243_v38 = vadd.f32 %v5242_v27, %v5241_v26  ;;  %v5244_v18 = vpop.f32.mrb[34].mxu0 }
 0x16d   : > { %v5245_v50 = vpop.f32.mrb[35].mxu0  ;;  %v5365_v3 = vpop.f32.mrb[24].mxu1 }
 0x16e   : > { %v5246_v16 = vadd.f32 %v5245_v50, %v5244_v18  ;;  %v1863_v31 = vadd.f32 %v5243_v38, %v7904_v60  ;;  %v5366_v26 = vpop.f32.mrb[25].mxu1 }
 0x16f   : > { %2239 = vmatmul.mubr.bf16.gmra.mrb[140].mxu0 %v7872_v53  ;;  %v5367_v27 = vadd.f32 %v5366_v26, %v5365_v3  ;;  %v5368_v55 = vpop.f32.mrb[26].mxu1 }
 0x170   : > { %v7949_v29 = vadd.f32 %v5355_v40, %v1863_v31  ;;  %v1866_v58 = vadd.f32 %v5246_v16, %v7904_v60  ;;  %6161 = vmatprep.mubr.bf16.mxu0 %v7747_v1  ;;  %v5369_v20 = vpop.f32.mrb[27].mxu1 }
 0x171   : > { %v5370_v40 = vadd.f32 %v5369_v20, %v5368_v55 }
 0x172   : > { %v7953_v47 = vadd.f32 %v5358_v59, %v1866_v58  ;;  %v5247_v23 = vpop.f32.mrb[36].mxu0 }
 0x173   : > { %v5248_v43 = vpop.f32.mrb[37].mxu0 }
 0x174   : > { %v5249_v38 = vadd.f32 %v5248_v43, %v5247_v23  ;;  %v5250_v18 = vpop.f32.mrb[38].mxu0 }
 0x175   : > { %v5251_v50 = vpop.f32.mrb[39].mxu0  ;;  %v5371_v59 = vpop.f32.mrb[28].mxu1 }
 0x176   : > { %v5252_v31 = vadd.f32 %v5251_v50, %v5250_v18  ;;  %v1871_v16 = vadd.f32 %v5249_v38, %v7904_v60  ;;  %v5372_v3 = vpop.f32.mrb[29].mxu1 }
 0x177   : > { %6162 = vmatmul.mubr.bf16.vlgmr.msra.gmra.mrb[144].mxu0 %v7771_v14  ;;  %v5373_v26 = vadd.f32 %v5372_v3, %v5371_v59  ;;  %v5374_v43 = vpop.f32.mrb[30].mxu1 }
 0x178   : > { %v7957_v1 = vadd.f32 %v5361_v52, %v1871_v16  ;;  %v1874_v8 = vadd.f32 %v5252_v31, %v7904_v60  ;;  %6165 = vmatprep.mubr.bf16.mxu0 %v9263_v35  ;;  %v5375_v20 = vpop.f32.mrb[31].mxu1  ;;  %v6551_v16 = vld [vmem:[#allocation2 + $0x50] sm:$0xff]  }
 0x179   : > { %v5376_v50 = vadd.f32 %v5375_v20, %v5374_v43  ;;  %v6552_v31 = vld [vmem:[#allocation2 + $0x10] sm:$0xff]   ;;  %5653 = vmatprep.subr.bf16.mxu1 %v6551_v16 }
 0x17a   : > { %v7961_v37 = vadd.f32 %v5364_v41, %v1874_v8  ;;  %v5253_v58 = vpop.f32.mrb[40].mxu0  ;;  %5654 = vmatpush3.bf16.msra.mxu1 %v6552_v31 }
 0x17b   : > { %v5254_v23 = vpop.f32.mrb[41].mxu0 }
 0x17c   : > { %v5255_v55 = vadd.f32 %v5254_v23, %v5253_v58  ;;  %v5256_v18 = vpop.f32.mrb[42].mxu0 }
 0x17d   : > { %v5257_v38 = vpop.f32.mrb[43].mxu0  ;;  %v5377_v8 = vpop.f32.mrb[32].mxu1 }
 0x17e   : > { %v5258_v14 = vadd.f32 %v5257_v38, %v5256_v18  ;;  %v1879_v52 = vadd.f32 %v5255_v55, %v7904_v60  ;;  %v5378_v3 = vpop.f32.mrb[33].mxu1 }
 0x17f   : > { %6166 = vmatmul.mubr.bf16.gmra.mrb[148].mxu0 %v9265_v39  ;;  %v5379_v43 = vadd.f32 %v5378_v3, %v5377_v8  ;;  %v5380_v55 = vpop.f32.mrb[34].mxu1 }
 0x180   : > { %v7965_v35 = vadd.f32 %v5367_v27, %v1879_v52  ;;  %v1882_v41 = vadd.f32 %v5258_v14, %v7904_v60  ;;  %6169 = vmatprep.mubr.bf16.mxu0 %v9266_v62  ;;  %v5381_v38 = vpop.f32.mrb[35].mxu1 }
 0x181   : > { %v5382_v27 = vadd.f32 %v5381_v38, %v5380_v55 }
 0x182   : > { %v7969_v59 = vadd.f32 %v5370_v40, %v1882_v41  ;;  %v5259_v58 = vpop.f32.mrb[44].mxu0 }
 0x183   : > { %v5260_v23 = vpop.f32.mrb[45].mxu0 }
 0x184   : > { %v5261_v18 = vadd.f32 %v5260_v23, %v5259_v58  ;;  %v5262_v20 = vpop.f32.mrb[46].mxu0 }
 0x185   : > { %v5263_v39 = vpop.f32.mrb[47].mxu0  ;;  %v5383_v16 = vpop.f32.mrb[36].mxu1 }
 0x186   : > { %v5264_v52 = vadd.f32 %v5263_v39, %v5262_v20  ;;  %v1887_v14 = vadd.f32 %v5261_v18, %v7904_v60  ;;  %v5384_v8 = vpop.f32.mrb[37].mxu1 }
 0x187   : > { %6170 = vmatmul.mubr.bf16.gmra.mrb[152].mxu0 %v9267_v42  ;;  %v5385_v3 = vadd.f32 %v5384_v8, %v5383_v16  ;;  %v5386_v23 = vpop.f32.mrb[38].mxu1 }
 0x188   : > { %v7973_v62 = vadd.f32 %v5373_v26, %v1887_v14  ;;  %v1890_v40 = vadd.f32 %v5264_v52, %v7904_v60  ;;  %6173 = vmatprep.mubr.bf16.mxu0 %v9268_v7  ;;  %v5387_v38 = vpop.f32.mrb[39].mxu1  ;;  %v6553_v14 = vld [vmem:[#allocation2 + $0x58] sm:$0xff]  }
 0x189   : > { %v5388_v39 = vadd.f32 %v5387_v38, %v5386_v23  ;;  %v6554_v52 = vld [vmem:[#allocation2 + $0x18] sm:$0xff]   ;;  %5655 = vmatprep.subr.bf16.mxu1 %v6553_v14 }
 0x18a   : > { %v7977_v31 = vadd.f32 %v5376_v50, %v1890_v40  ;;  %v5265_v41 = vpop.f32.mrb[48].mxu0  ;;  %5656 = vmatpush3.bf16.msra.mxu1 %v6554_v52 }
 0x18b   : > { %v5266_v58 = vpop.f32.mrb[49].mxu0 }
 0x18c   : > { %v5267_v55 = vadd.f32 %v5266_v58, %v5265_v41  ;;  %v5268_v20 = vpop.f32.mrb[50].mxu0 }
 0x18d   : > { %v5269_v18 = vpop.f32.mrb[51].mxu0  ;;  %v5389_v40 = vpop.f32.mrb[40].mxu1 }
 0x18e   : > { %v1895_v42 = vadd.f32 %v5267_v55, %v7904_v60  ;;  %v5270_v26 = vadd.f32 %v5269_v18, %v5268_v20  ;;  %v5390_v8 = vpop.f32.mrb[41].mxu1 }
 0x18f   : > { %6174 = vmatmul.mubr.bf16.gmra.mrb[156].mxu0 %v9269_v36  ;;  %v5391_v23 = vadd.f32 %v5390_v8, %v5389_v40  ;;  %v5392_v55 = vpop.f32.mrb[42].mxu1 }
 0x190   : > { %v1898_v7 = vadd.f32 %v5270_v26, %v7904_v60  ;;  %v7982_v50 = vadd.f32 %v5379_v43, %v1895_v42  ;;  %6177 = vmatprep.mubr.bf16.mxu0 %v9271_v54  ;;  %v5393_v18 = vpop.f32.mrb[43].mxu1 }
 0x191   : > { %v5394_v53 = vadd.f32 %v5393_v18, %v5392_v55 }
 0x192   : > { %v7985_v16 = vadd.f32 %v5382_v27, %v1898_v7  ;;  %v5271_v41 = vpop.f32.mrb[52].mxu0 }
 0x193   : > { %v5272_v58 = vpop.f32.mrb[53].mxu0 }
 0x194   : > { %v5273_v20 = vadd.f32 %v5272_v58, %v5271_v41  ;;  %v5274_v38 = vpop.f32.mrb[54].mxu0 }
 0x195   : > { %v5275_v36 = vpop.f32.mrb[55].mxu0  ;;  %v5395_v27 = vpop.f32.mrb[44].mxu1 }
 0x196   : > { %v1903_v43 = vadd.f32 %v5273_v20, %v7904_v60  ;;  %v5276_v42 = vadd.f32 %v5275_v36, %v5274_v38  ;;  %v5396_v7 = vpop.f32.mrb[45].mxu1 }
 0x197   : > { %6178 = vmatmul.mubr.bf16.gmra.mrb[160].mxu0 %v9272_v9  ;;  %v5397_v41 = vadd.f32 %v5396_v7, %v5395_v27  ;;  %v5398_v8 = vpop.f32.mrb[46].mxu1 }
 0x198   : > { %v1906_v54 = vadd.f32 %v5276_v42, %v7904_v60  ;;  %v7990_v26 = vadd.f32 %v5385_v3, %v1903_v43  ;;  %6181 = vmatprep.mubr.bf16.mxu0 %v7599_v33  ;;  %v5399_v20 = vpop.f32.mrb[47].mxu1  ;;  %v6555_v3 = vld [vmem:[#allocation2 + $0x60] sm:$0xff]   ;;  %v960_v42 = vrot.slane %v7845_v57, 5 }
 0x199   : > { %v5400_v18 = vadd.f32 %v5399_v20, %v5398_v8  ;;  %v6556_v43 = vld [vmem:[#allocation2 + $0x20] sm:$0xff]   ;;  %5657 = vmatprep.subr.bf16.mxu1 %v6555_v3 }
 0x19a   : > { %v7993_v14 = vadd.f32 %v5388_v39, %v1906_v54  ;;  %v5277_v52 = vpop.f32.mrb[56].mxu0  ;;  %5658 = vmatpush3.bf16.msra.mxu1 %v6556_v43  ;;  %v962_v20 = vrot.slane %v960_v42, 4 }
 0x19b   : > { %v5278_v40 = vpop.f32.mrb[57].mxu0 }
 0x19c   : > { %v5279_v58 = vadd.f32 %v5278_v40, %v5277_v52  ;;  %v5280_v55 = vpop.f32.mrb[58].mxu0 }
 0x19d   : > { %v5281_v38 = vpop.f32.mrb[59].mxu0  ;;  %v5529_v54 = vpop.f32.mrb[48].mxu1 }
 0x19e   : > { %v1911_v9 = vadd.f32 %v5279_v58, %v7904_v60  ;;  %v5282_v36 = vadd.f32 %v5281_v38, %v5280_v55  ;;  %v5530_v7 = vpop.f32.mrb[49].mxu1 }
 0x19f   : > { %6182 = vmatmul.mubr.bf16.gmra.mrb[164].mxu0 %v7644_v28  ;;  %v8004_v8 = vadd.f32 %v5530_v7, %v5529_v54  ;;  %v5532_v58 = vpop.f32.mrb[50].mxu1 }
 0x1a0   : > { %v1914_v33 = vadd.f32 %v5282_v36, %v7904_v60  ;;  %v7998_v39 = vadd.f32 %v5391_v23, %v1911_v9  ;;  %6185 = vmatprep.mubr.bf16.mxu0 %v7672_v22  ;;  %v4961_v23 = vrot.slane %v7842_v4, 9  ;;  %v963_v22 = vrot.slane %v7859_v10, 5  ;;  %v5533_v38 = vpop.f32.mrb[51].mxu1 }
 0x1a1   : > { %v8008_v9 = vadd.f32 %v5533_v38, %v5532_v58 }
 0x1a2   : > { %v8002_v27 = vadd.f32 %v5394_v53, %v1914_v33  ;;  %v5283_v52 = vpop.f32.mrb[60].mxu0  ;;  %v961_v4 = vsel %vm6936_vm5, %v4961_v23, %v960_v42  ;;  %v964_v10 = vsel %vm6936_vm5, %v962_v20, %v963_v22  ;;  %v6557_v22 = vld [vmem:[#allocation2 + $0x68] sm:$0xff]  }
 0x1a3   : > { %v5284_v40 = vpop.f32.mrb[61].mxu0  ;;  %v5015_v58 = vcombine.low %v961_v4, %v964_v10  ;;  %5659 = vmatprep.subr.bf16.mxu1 %v6557_v22  ;;  %v6561_v22 = vld [vmem:[#allocation2 + $0xc0] sm:$0xff]  }
 0x1a4   : > { %v5285_v28 = vadd.f32 %v5284_v40, %v5283_v52  ;;  %v5286_v55 = vpop.f32.mrb[62].mxu0  ;;  %5761 = vmatprep.subr.bf16.mxu0 %v6561_v22 }
 0x1a5   : > { %v5287_v57 = vpop.f32.mrb[63].mxu0  ;;  %v5535_v33 = vpop.f32.mrb[52].mxu1 }
 0x1a6   : > { %v1919_v53 = vadd.f32 %v5285_v28, %v7904_v60  ;;  %v5288_v36 = vadd.f32 %v5287_v57, %v5286_v55  ;;  %v5536_v7 = vpop.f32.mrb[53].mxu1  ;;  %v6558_v57 = vld [vmem:[#allocation2 + $0x28] sm:$0xff]  }
 0x1a7   : > { %6186 = vmatmul.mubr.bf16.gmra.mrb[168].mxu0 %v7693_v6  ;;  %v8022_v6 = vadd.f32 %v5536_v7, %v5535_v33  ;;  %v5538_v28 = vpop.f32.mrb[54].mxu1  ;;  %5660 = vmatpush3.bf16.msra.mxu1 %v6558_v57 }
 0x1a8   : > { %v1922_v3 = vadd.f32 %v5288_v36, %v7904_v60  ;;  %v8013_v43 = vadd.f32 %v5397_v41, %v1919_v53  ;;  %6189 = vmatprep.mubr.bf16.mxu0 %v7937_v51  ;;  %v1799_v41 = vadd.f32 %v7856_v13, %v7904_v60  ;;  %v5539_v38 = vpop.f32.mrb[55].mxu1 }
 0x1a9   : > { %v8026_v23 = vadd.f32 %v5539_v38, %v5538_v28 }
 0x1aa   : > { %v8020_v54 = vadd.f32 %v5400_v18, %v1922_v3  ;;  %v5305_v52 = vpop.f32.mrb[64].mxu0  ;;  %v1802_v18 = vadd.f32 %v7861_v21, %v7904_v60 }
 0x1ab   : > { %v5306_v40 = vpop.f32.mrb[65].mxu0 }
 0x1ac   : > { %v5307_v51 = vadd.f32 %v5306_v40, %v5305_v52  ;;  %v5308_v55 = vpop.f32.mrb[66].mxu0  ;;  %v1807_v52 = vadd.f32 %v7874_v0, %v7904_v60 }
 0x1ad   : > { %v5309_v42 = vpop.f32.mrb[67].mxu0  ;;  %v5541_v36 = vpop.f32.mrb[56].mxu1 }
 0x1ae   : > { %v8028_v30 = vadd.f32 %v5307_v51, %v1799_v41  ;;  %v5310_v20 = vadd.f32 %v5309_v42, %v5308_v55  ;;  %v5542_v3 = vpop.f32.mrb[57].mxu1  ;;  %v1810_v51 = vadd.f32 %v7876_v61, %v7904_v60 }
 0x1af   : > { %6190 = vmatmul.mubr.bf16.gmra.mrb[172].mxu0 %v5015_v58  ;;  %v8034_v10 = vadd.f32 %v5542_v3, %v5541_v36  ;;  %v5544_v33 = vpop.f32.mrb[58].mxu1  ;;  %v1815_v3 = vadd.f32 %v7886_v34, %v7904_v60 }
 0x1b0   : > { %v8032_v53 = vadd.f32 %v5310_v20, %v1802_v18  ;;  %v5545_v40 = vpop.f32.mrb[59].mxu1 }
 0x1b1   : > { %v8038_v41 = vadd.f32 %v5545_v40, %v5544_v33  ;;  %v1818_v40 = vadd.f32 %v7888_v32, %v7904_v60  ;;  %v6566_v32 = vld [vmem:[#allocation2 + $0x90] sm:$0xff]  }
 0x1b2   : > { %v5311_v13 = vpop.f32.mrb[68].mxu0 }
 0x1b3   : > { %v5312_v4 = vpop.f32.mrb[69].mxu0 }
 0x1b4   : > { %v5313_v7 = vadd.f32 %v5312_v4, %v5311_v13  ;;  %v5314_v21 = vpop.f32.mrb[70].mxu0  ;;  %v6562_v13 = vld [vmem:[#allocation2 + $0x80] sm:$0xff]  }
 0x1b5   : > { %v5315_v28 = vpop.f32.mrb[71].mxu0  ;;  %v5547_v42 = vpop.f32.mrb[60].mxu1  ;;  %5762 = vmatpush3.bf16.msra.mxu0 %v6562_v13 }
 0x1b6   : > { %v8040_v58 = vadd.f32 %v5313_v7, %v1807_v52  ;;  %v5316_v55 = vadd.f32 %v5315_v28, %v5314_v21  ;;  %v5548_v20 = vpop.f32.mrb[61].mxu1 }
 0x1b7   : > { %v8046_v0 = vadd.f32 %v5548_v20, %v5547_v42  ;;  %v5550_v36 = vpop.f32.mrb[62].mxu1  ;;  %v6563_v42 = vld [vmem:[#allocation2 + $0xc8] sm:$0xff]  }
 0x1b8   : > { %v8044_v38 = vadd.f32 %v5316_v55, %v1810_v51  ;;  %v5551_v52 = vpop.f32.mrb[63].mxu1  ;;  %v6559_v51 = vld [vmem:[#allocation2 + $0x70] sm:$0xff]   ;;  %v6564_v20 = vld [vmem:[#allocation2 + $0x88] sm:$0xff]   ;;  %5763 = vmatprep.subr.bf16.mxu0 %v6563_v42 }
 0x1b9   : > { %v8050_v7 = vadd.f32 %v5551_v52, %v5550_v36  ;;  %v6560_v55 = vld [vmem:[#allocation2 + $0x30] sm:$0xff]   ;;  %5661 = vmatprep.subr.bf16.mxu1 %v6559_v51  ;;  %5764 = vmatpush3.bf16.msra.mxu0 %v6564_v20  ;;  %v6567_v20 = vld [vmem:[#allocation2 + $0xd8] sm:$0xff]  }
 0x1ba   : > { %v5317_v18 = vpop.f32.mrb[72].mxu0  ;;  %5662 = vmatpush3.bf16.msra.mxu1 %v6560_v55  ;;  %v1826_v55 = vadd.f32 %v7897_v25, %v7904_v60 }
 0x1bb   : > { %v5318_v57 = vpop.f32.mrb[73].mxu0 }
 0x1bc   : > { %v5319_v4 = vadd.f32 %v5318_v57, %v5317_v18  ;;  %v5320_v33 = vpop.f32.mrb[74].mxu0  ;;  %v6565_v57 = vld [vmem:[#allocation2 + $0xd0] sm:$0xff]  }
 0x1bd   : > { %v5321_v61 = vpop.f32.mrb[75].mxu0  ;;  %v5553_v34 = vpop.f32.mrb[64].mxu1  ;;  %5765 = vmatprep.subr.bf16.mxu0 %v6565_v57  ;;  %v6571_v57 = vld [vmem:[#allocation2 + $0xe0] sm:$0xff]  }
 0x1be   : > { %v8052_v21 = vadd.f32 %v5319_v4, %v1815_v3  ;;  %v5322_v28 = vadd.f32 %v5321_v61, %v5320_v33  ;;  %v5554_v22 = vpop.f32.mrb[65].mxu1  ;;  %v1823_v4 = vadd.f32 %v7895_v11, %v7904_v60  ;;  %5766 = vmatpush3.bf16.msra.mxu0 %v6566_v32 }
 0x1bf   : > { %v8058_v13 = vadd.f32 %v5554_v22, %v5553_v34  ;;  %v5556_v3 = vpop.f32.mrb[66].mxu1  ;;  %v6568_v34 = vld [vmem:[#allocation2 + $0x98] sm:$0xff]   ;;  %5767 = vmatprep.subr.bf16.mxu0 %v6567_v20 }
 0x1c0   : > { %v8056_v48 = vadd.f32 %v5322_v28, %v1818_v40  ;;  %v5557_v61 = vpop.f32.mrb[67].mxu1  ;;  %v6569_v20 = vld [vmem:[#allocation2 + $0x78] sm:$0xff]  }
 0x1c1   : > { %v8062_v28 = vadd.f32 %v5557_v61, %v5556_v3  ;;  %5663 = vmatprep.subr.bf16.mxu1 %v6569_v20 }
 0x1c2   : > { %v5323_v18 = vpop.f32.mrb[76].mxu0  ;;  %5768 = vmatpush3.bf16.msra.mxu0 %v6568_v34  ;;  %v9273_v34 = vmov 0 }
 0x1c3   : > { %v5324_v36 = vpop.f32.mrb[77].mxu0  ;;  %5769 = vmatprep.subr.bf16.mxu0 %v6571_v57  ;;  %v9274_v34 = vsel %vm8075_vm8, 4294967295, %v9273_v34 }
 0x1c4   : > { %v5325_v33 = vadd.f32 %v5324_v36, %v5323_v18  ;;  %v5326_v52 = vpop.f32.mrb[78].mxu0  ;;  %9275 = vst [vmem:[#allocation19_spill] sm:$0xff] %v9274_v34 }
 0x1c5   : > { %v5327_v40 = vpop.f32.mrb[79].mxu0  ;;  %v5559_v11 = vpop.f32.mrb[68].mxu1 }
 0x1c6   : > { %v8064_v51 = vadd.f32 %v5325_v33, %v1823_v4  ;;  %v5328_v42 = vadd.f32 %v5327_v40, %v5326_v52  ;;  %v5560_v36 = vpop.f32.mrb[69].mxu1  ;;  %v6572_v4 = vld [vmem:[#allocation2 + $0xa0] sm:$0xff]   ;;  %v6733_v52 = vmov 0  }
 0x1c7   : > { %v8070_v3 = vadd.f32 %v5560_v36, %v5559_v11  ;;  %v5562_v32 = vpop.f32.mrb[70].mxu1  ;;  %5770 = vmatpush3.bf16.msra.mxu0 %v6572_v4  ;;  %v2620_v40 = vrot.slane %v6733_v52, 7  ;;  %v6574_v11 = vld [vmem:[#allocation2 + $0xa8] sm:$0xff]  }
 0x1c8   : > { %v8068_v22 = vadd.f32 %v5328_v42, %v1826_v55  ;;  %v5563_v12 = vpop.f32.mrb[71].mxu1 }
 0x1c9   : > { %v8072_v60 = vadd.f32 %v5563_v12, %v5562_v32  ;;  %v8090_v32 = vsel %vm8075_vm8, %v2620_v40, 0 }
 0x1ca   : > { %v5417_v18 = vpop.f32.mrb[80].mxu0  ;;  %9276 = vst [vmem:[#allocation12_spill] sm:$0xff] %v8090_v32  ;;  %v2816_v52 = vshll.u32 %v8090_v32, 16 }
 0x1cb   : > { %v5418_v17 = vpop.f32.mrb[81].mxu0 }
 0x1cc   : > { %v5419_v33 = vadd.f32 %v5418_v17, %v5417_v18  ;;  %v5420_v61 = vpop.f32.mrb[82].mxu0  ;;  %v6573_v17 = vld [vmem:[#allocation2 + $0xe8] sm:$0xff]   ;;  %v8081_v18 = vsel %vm8075_vm8, 0, %v2620_v40  ;;  %v2818_v34 = vrot.slane %v2816_v52, 1 }
 0x1cd   : > { %v5421_v25 = vpop.f32.mrb[83].mxu0  ;;  %5771 = vmatprep.subr.bf16.mxu0 %v6573_v17  ;;  %v5565_v57 = vpop.f32.mrb[72].mxu1  ;;  %v6570_v17 = vld [vmem:[#allocation2 + $0x38] sm:$0xff]  }
 0x1ce   : > { %v2121_v55 = vadd.f32 %v5419_v33, %v8028_v30  ;;  %v5422_v42 = vadd.f32 %v5421_v25, %v5420_v61  ;;  %v2811_v30 = vshll.u32 %v8081_v18, 16  ;;  %5772 = vmatpush3.bf16.msra.mxu0 %v6574_v11  ;;  %v5566_v33 = vpop.f32.mrb[73].mxu1  ;;  %v6575_v25 = vld [vmem:[#allocation2 + $0xf0] sm:$0xff]   ;;  %5664 = vmatpush3.bf16.msra.mxu1 %v6570_v17 }
 0x1cf   : > { %v5568_v20 = vpop.f32.mrb[74].mxu1  ;;  %v6576_v11 = vld [vmem:[#allocation2 + $0xb0] sm:$0xff]   ;;  %5773 = vmatprep.subr.bf16.mxu0 %v6575_v25 }
 0x1d0   : > { %v2124_v12 = vadd.f32 %v5422_v42, %v8032_v53  ;;  %v8085_v36 = vadd.f32 %v8004_v8, %v2121_v55  ;;  %v2809_v53 = vshrl.u32 %v8081_v18, 16  ;;  %v2813_v8 = vrot.slane %v2811_v30, 1  ;;  %v5569_v49 = vpop.f32.mrb[75].mxu1 }
 0x1d1   : > { %v8097_v42 = vadd.f32 %v5566_v33, %v5565_v57  ;;  %v6577_v33 = vld [vmem:[#allocation2 + $0xf8] sm:$0xff]  }
 0x1d2   : > { %v5423_v4 = vpop.f32.mrb[84].mxu0  ;;  %v8093_v61 = vadd.f32 %v8008_v9, %v2124_v12  ;;  %v2814_v24 = vor.u32 %v2813_v8, %v2809_v53  ;;  %v8099_v12 = vadd.f32 %v5569_v49, %v5568_v20  ;;  %5774 = vmatpush3.bf16.msra.mxu0 %v6576_v11 }
 0x1d3   : > { %v5424_v55 = vpop.f32.mrb[85].mxu0  ;;  %5775 = vmatprep.subr.bf16.mxu0 %v6577_v33 }
 0x1d4   : > { %v5425_v2 = vadd.f32 %v5424_v55, %v5423_v4  ;;  %v5426_v40 = vpop.f32.mrb[86].mxu0  ;;  %v8103_v57 = vsel %vm2807_vm9, %v2814_v24, %v2818_v34  ;;  %v6578_v4 = vld [vmem:[#allocation2 + $0xb8] sm:$0xff]  }
 0x1d5   : > { %v5427_v9 = vpop.f32.mrb[87].mxu0  ;;  %3747 = vmatprep.mubr.bf16.mxu1 %v8103_v57  ;;  %v5571_v49 = vpop.f32.mrb[76].mxu1 }
 0x1d6   : > { %v2129_v30 = vadd.f32 %v5425_v2, %v8040_v58  ;;  %v5428_v32 = vadd.f32 %v5427_v9, %v5426_v40  ;;  %3748 = vmatmul.mubr.bf16.vlgmr.msra.gmra.mrb[112].mxu1 %v8081_v18  ;;  %5776 = vmatpush3.bf16.msra.mxu0 %v6578_v4  ;;  %v5572_v2 = vpop.f32.mrb[77].mxu1 }
 0x1d7   : > { %v8114_v34 = vadd.f32 %v5572_v2, %v5571_v49  ;;  %v5574_v52 = vpop.f32.mrb[78].mxu1 }
 0x1d8   : > { %v2132_v25 = vadd.f32 %v5428_v32, %v8044_v38  ;;  %v8108_v53 = vadd.f32 %v8022_v6, %v2129_v30  ;;  %v5575_v38 = vpop.f32.mrb[79].mxu1 }
 0x1d9   : > { %v8116_v6 = vadd.f32 %v5575_v38, %v5574_v52  ;;  %v6580_v38 = vld [vmem:[#allocation2 + $0x100] sm:$0xff]  }
 0x1da   : > { %v5429_v8 = vpop.f32.mrb[88].mxu0  ;;  %v8112_v58 = vadd.f32 %v8026_v23, %v2132_v25  ;;  %v6579_v23 = vld [vmem:[#allocation2 + $0x140] sm:$0xff]  }
 0x1db   : > { %v5430_v24 = vpop.f32.mrb[89].mxu0  ;;  %5873 = vmatprep.subr.bf16.mxu1 %v6579_v23 }
 0x1dc   : > { %v5431_v55 = vadd.f32 %v5430_v24, %v5429_v8  ;;  %v5432_v20 = vpop.f32.mrb[90].mxu0  ;;  %5874 = vmatpush3.bf16.msra.mxu1 %v6580_v38 }
 0x1dd   : > { %v5433_v32 = vpop.f32.mrb[91].mxu0  ;;  %v5577_v30 = vpop.f32.mrb[80].mxu1 }
 0x1de   : > { %v2137_v17 = vadd.f32 %v5431_v55, %v8052_v21  ;;  %v5434_v11 = vadd.f32 %v5433_v32, %v5432_v20  ;;  %v5578_v4 = vpop.f32.mrb[81].mxu1 }
 0x1df   : > { %v8126_v8 = vadd.f32 %v5578_v4, %v5577_v30  ;;  %v5580_v2 = vpop.f32.mrb[82].mxu1 }
 0x1e0   : > { %v2140_v40 = vadd.f32 %v5434_v11, %v8056_v48  ;;  %v8121_v9 = vadd.f32 %v8034_v10, %v2137_v17  ;;  %v5581_v52 = vpop.f32.mrb[83].mxu1 }
 0x1e1   : > { %v8128_v48 = vadd.f32 %v5581_v52, %v5580_v2 }
 0x1e2   : > { %v5435_v33 = vpop.f32.mrb[92].mxu0  ;;  %v8124_v25 = vadd.f32 %v8038_v41, %v2140_v40 }
 0x1e3   : > { %v5436_v49 = vpop.f32.mrb[93].mxu0 }
 0x1e4   : > { %v5437_v24 = vadd.f32 %v5436_v49, %v5435_v33  ;;  %v5438_v21 = vpop.f32.mrb[94].mxu0 }
 0x1e5   : > { %v5439_v55 = vpop.f32.mrb[95].mxu0  ;;  %v5583_v17 = vpop.f32.mrb[84].mxu1 }
 0x1e6   : > { %v2145_v10 = vadd.f32 %v5437_v24, %v8064_v51  ;;  %v5440_v20 = vadd.f32 %v5439_v55, %v5438_v21  ;;  %v5584_v40 = vpop.f32.mrb[85].mxu1 }
 0x1e7   : > { %v8138_v33 = vadd.f32 %v5584_v40, %v5583_v17  ;;  %v5586_v4 = vpop.f32.mrb[86].mxu1 }
 0x1e8   : > { %v2148_v32 = vadd.f32 %v5440_v20, %v8068_v22  ;;  %v8133_v41 = vadd.f32 %v8046_v0, %v2145_v10  ;;  %v5587_v2 = vpop.f32.mrb[87].mxu1 }
 0x1e9   : > { %v8140_v21 = vadd.f32 %v5587_v2, %v5586_v4  ;;  %v6582_v2 = vld [vmem:[#allocation2 + $0x108] sm:$0xff]  }
 0x1ea   : > { %v5441_v11 = vpop.f32.mrb[96].mxu0  ;;  %v8136_v23 = vadd.f32 %v8050_v7, %v2148_v32  ;;  %v6581_v7 = vld [vmem:[#allocation2 + $0x148] sm:$0xff]  }
 0x1eb   : > { %v5442_v30 = vpop.f32.mrb[97].mxu0  ;;  %5875 = vmatprep.subr.bf16.mxu1 %v6581_v7 }
 0x1ec   : > { %v5443_v49 = vadd.f32 %v5442_v30, %v5441_v11  ;;  %v5444_v51 = vpop.f32.mrb[98].mxu0  ;;  %5876 = vmatpush3.bf16.msra.mxu1 %v6582_v2 }
 0x1ed   : > { %v5445_v24 = vpop.f32.mrb[99].mxu0  ;;  %v5589_v10 = vpop.f32.mrb[88].mxu1 }
 0x1ee   : > { %v2153_v0 = vadd.f32 %v5443_v49, %v7910_v15  ;;  %v5446_v22 = vadd.f32 %v5445_v24, %v5444_v51  ;;  %v5590_v38 = vpop.f32.mrb[89].mxu1 }
 0x1ef   : > { %v8150_v11 = vadd.f32 %v5590_v38, %v5589_v10  ;;  %v5592_v40 = vpop.f32.mrb[90].mxu1 }
 0x1f0   : > { %v2156_v52 = vadd.f32 %v5446_v22, %v7912_v46  ;;  %v8145_v55 = vadd.f32 %v8058_v13, %v2153_v0  ;;  %v5593_v4 = vpop.f32.mrb[91].mxu1 }
 0x1f1   : > { %v8152_v46 = vadd.f32 %v5593_v4, %v5592_v40 }
 0x1f2   : > { %v5447_v20 = vpop.f32.mrb[100].mxu0  ;;  %v8148_v32 = vadd.f32 %v8062_v28, %v2156_v52 }
 0x1f3   : > { %v5448_v17 = vpop.f32.mrb[101].mxu0 }
 0x1f4   : > { %v5449_v30 = vadd.f32 %v5448_v17, %v5447_v20  ;;  %v5450_v15 = vpop.f32.mrb[102].mxu0 }
 0x1f5   : > { %v5451_v49 = vpop.f32.mrb[103].mxu0  ;;  %v5595_v0 = vpop.f32.mrb[92].mxu1 }
 0x1f6   : > { %v2161_v13 = vadd.f32 %v5449_v30, %v7918_v63  ;;  %v5452_v51 = vadd.f32 %v5451_v49, %v5450_v15  ;;  %v5596_v52 = vpop.f32.mrb[93].mxu1 }
 0x1f7   : > { %v8162_v20 = vadd.f32 %v5596_v52, %v5595_v0  ;;  %v5598_v38 = vpop.f32.mrb[94].mxu1 }
 0x1f8   : > { %v2164_v24 = vadd.f32 %v5452_v51, %v7921_v19  ;;  %v8157_v28 = vadd.f32 %v8070_v3, %v2161_v13  ;;  %v5599_v40 = vpop.f32.mrb[95].mxu1 }
 0x1f9   : > { %v8164_v15 = vadd.f32 %v5599_v40, %v5598_v38  ;;  %v6584_v40 = vld [vmem:[#allocation2 + $0x110] sm:$0xff]  }
 0x1fa   : > { %v5453_v22 = vpop.f32.mrb[104].mxu0  ;;  %v8160_v7 = vadd.f32 %v8072_v60, %v2164_v24  ;;  %v6583_v60 = vld [vmem:[#allocation2 + $0x150] sm:$0xff]  }
 0x1fb   : > { %v5454_v10 = vpop.f32.mrb[105].mxu0  ;;  %5877 = vmatprep.subr.bf16.mxu1 %v6583_v60 }
 0x1fc   : > { %v5455_v17 = vadd.f32 %v5454_v10, %v5453_v22  ;;  %v5456_v63 = vpop.f32.mrb[106].mxu0  ;;  %5878 = vmatpush3.bf16.msra.mxu1 %v6584_v40 }
 0x1fd   : > { %v5457_v30 = vpop.f32.mrb[107].mxu0  ;;  %v5601_v13 = vpop.f32.mrb[96].mxu1 }
 0x1fe   : > { %v2169_v19 = vadd.f32 %v5455_v17, %v7929_v44  ;;  %v5458_v3 = vadd.f32 %v5457_v30, %v5456_v63  ;;  %v5602_v2 = vpop.f32.mrb[97].mxu1 }
 0x1ff   : > { %v8174_v22 = vadd.f32 %v5602_v2, %v5601_v13  ;;  %v5604_v52 = vpop.f32.mrb[98].mxu1 }
 0x200   : > { %v2172_v4 = vadd.f32 %v5458_v3, %v7935_v56  ;;  %v8169_v49 = vadd.f32 %v8097_v42, %v2169_v19  ;;  %v5605_v38 = vpop.f32.mrb[99].mxu1 }
 0x201   : > { %v8176_v56 = vadd.f32 %v5605_v38, %v5604_v52 }
 0x202   : > { %v5459_v51 = vpop.f32.mrb[108].mxu0  ;;  %v8172_v24 = vadd.f32 %v8099_v12, %v2172_v4 }
 0x203   : > { %v5460_v0 = vpop.f32.mrb[109].mxu0 }
 0x204   : > { %v5461_v10 = vadd.f32 %v5460_v0, %v5459_v51  ;;  %v5462_v44 = vpop.f32.mrb[110].mxu0 }
 0x205   : > { %v5463_v17 = vpop.f32.mrb[111].mxu0  ;;  %v5607_v19 = vpop.f32.mrb[100].mxu1 }
 0x206   : > { %v2177_v42 = vadd.f32 %v5461_v10, %v7943_v5  ;;  %v5464_v63 = vadd.f32 %v5463_v17, %v5462_v44  ;;  %v5608_v4 = vpop.f32.mrb[101].mxu1 }
 0x207   : > { %v8186_v51 = vadd.f32 %v5608_v4, %v5607_v19  ;;  %v5610_v2 = vpop.f32.mrb[102].mxu1 }
 0x208   : > { %v2180_v30 = vadd.f32 %v5464_v63, %v7945_v45  ;;  %v8181_v12 = vadd.f32 %v8114_v34, %v2177_v42  ;;  %v5611_v52 = vpop.f32.mrb[103].mxu1  ;;  %v6586_v42 = vld [vmem:[#allocation2 + $0x118] sm:$0xff]  }
 0x209   : > { %v8188_v44 = vadd.f32 %v5611_v52, %v5610_v2 }
 0x20a   : > { %v5465_v3 = vpop.f32.mrb[112].mxu0  ;;  %v8184_v60 = vadd.f32 %v8116_v6, %v2180_v30  ;;  %v6585_v6 = vld [vmem:[#allocation2 + $0x158] sm:$0xff]  }
 0x20b   : > { %v5466_v13 = vpop.f32.mrb[113].mxu0  ;;  %5879 = vmatprep.subr.bf16.mxu1 %v6585_v6 }
 0x20c   : > { %v5467_v0 = vadd.f32 %v5466_v13, %v5465_v3  ;;  %v5468_v5 = vpop.f32.mrb[114].mxu0  ;;  %5880 = vmatpush3.bf16.msra.mxu1 %v6586_v42 }
 0x20d   : > { %v5469_v10 = vpop.f32.mrb[115].mxu0  ;;  %v5613_v63 = vpop.f32.mrb[104].mxu1 }
 0x20e   : > { %v2185_v45 = vadd.f32 %v5467_v0, %v7949_v29  ;;  %v5470_v34 = vadd.f32 %v5469_v10, %v5468_v5  ;;  %v5614_v30 = vpop.f32.mrb[105].mxu1 }
 0x20f   : > { %v8198_v4 = vadd.f32 %v5614_v30, %v5613_v63  ;;  %v5616_v13 = vpop.f32.mrb[106].mxu1 }
 0x210   : > { %v2188_v38 = vadd.f32 %v5470_v34, %v7953_v47  ;;  %v8193_v17 = vadd.f32 %v8126_v8, %v2185_v45  ;;  %v5617_v47 = vpop.f32.mrb[107].mxu1 }
 0x211   : > { %v8200_v8 = vadd.f32 %v5617_v47, %v5616_v13 }
 0x212   : > { %v5471_v40 = vpop.f32.mrb[116].mxu0  ;;  %v8196_v19 = vadd.f32 %v8128_v48, %v2188_v38 }
 0x213   : > { %v5472_v3 = vpop.f32.mrb[117].mxu0 }
 0x214   : > { %v5473_v29 = vadd.f32 %v5472_v3, %v5471_v40  ;;  %v5474_v2 = vpop.f32.mrb[118].mxu0 }
 0x215   : > { %v5475_v0 = vpop.f32.mrb[119].mxu0  ;;  %v5619_v45 = vpop.f32.mrb[108].mxu1 }
 0x216   : > { %v2193_v5 = vadd.f32 %v5473_v29, %v7957_v1  ;;  %v5476_v52 = vadd.f32 %v5475_v0, %v5474_v2  ;;  %v5620_v38 = vpop.f32.mrb[109].mxu1  ;;  %v6587_v1 = vld [vmem:[#allocation2 + $0x160] sm:$0xff]  }
 0x217   : > { %v8210_v63 = vadd.f32 %v5620_v38, %v5619_v45  ;;  %v5622_v40 = vpop.f32.mrb[110].mxu1  ;;  %5881 = vmatprep.subr.bf16.mxu1 %v6587_v1  ;;  %v6589_v1 = vld [vmem:[#allocation2 + $0x168] sm:$0xff]  }
 0x218   : > { %v2196_v10 = vadd.f32 %v5476_v52, %v7961_v37  ;;  %v8205_v48 = vadd.f32 %v8138_v33, %v2193_v5  ;;  %v5623_v13 = vpop.f32.mrb[111].mxu1  ;;  %v6588_v37 = vld [vmem:[#allocation2 + $0x120] sm:$0xff]  }
 0x219   : > { %v8212_v2 = vadd.f32 %v5623_v13, %v5622_v40  ;;  %5882 = vmatpush3.bf16.msra.mxu1 %v6588_v37  ;;  %v6590_v37 = vld [vmem:[#allocation2 + $0x128] sm:$0xff]  }
 0x21a   : > { %v5477_v34 = vpop.f32.mrb[120].mxu0  ;;  %v8208_v6 = vadd.f32 %v8140_v21, %v2196_v10  ;;  %5883 = vmatprep.subr.bf16.mxu1 %v6589_v1 }
 0x21b   : > { %v5478_v42 = vpop.f32.mrb[121].mxu0 }
 0x21c   : > { %v5479_v30 = vadd.f32 %v5478_v42, %v5477_v34  ;;  %v5480_v3 = vpop.f32.mrb[122].mxu0 }
 0x21d   : > { %v5481_v29 = vpop.f32.mrb[123].mxu0  ;;  %5884 = vmatpush3.bf16.msra.mxu1 %v6590_v37 }
 0x21e   : > { %v2201_v33 = vadd.f32 %v5479_v30, %v7965_v35  ;;  %v5482_v47 = vadd.f32 %v5481_v29, %v5480_v3 }
 0x220   : > { %v2204_v21 = vadd.f32 %v5482_v47, %v7969_v59  ;;  %v8217_v0 = vadd.f32 %v8150_v11, %v2201_v33 }
 0x222   : > { %v5483_v5 = vpop.f32.mrb[124].mxu0  ;;  %v8220_v52 = vadd.f32 %v8152_v46, %v2204_v21 }
 0x223   : > { %v5484_v10 = vpop.f32.mrb[125].mxu0 }
 0x224   : > { %v5485_v45 = vadd.f32 %v5484_v10, %v5483_v5  ;;  %v5486_v34 = vpop.f32.mrb[126].mxu0 }
 0x225   : > { %v5487_v38 = vpop.f32.mrb[127].mxu0 }
 0x226   : > { %v2209_v42 = vadd.f32 %v5485_v45, %v7973_v62  ;;  %v5488_v40 = vadd.f32 %v5487_v38, %v5486_v34 }
 0x228   : > { %v2212_v35 = vadd.f32 %v5488_v40, %v7977_v31  ;;  %v8225_v30 = vadd.f32 %v8162_v20, %v2209_v42 }
 0x22a   : > { %v5489_v59 = vpop.f32.mrb[128].mxu0  ;;  %v8228_v11 = vadd.f32 %v8164_v15, %v2212_v35 }
 0x22b   : > { %v5490_v3 = vpop.f32.mrb[129].mxu0 }
 0x22c   : > { %v5491_v13 = vadd.f32 %v5490_v3, %v5489_v59  ;;  %v5492_v46 = vpop.f32.mrb[130].mxu0  ;;  %v6591_v59 = vld [vmem:[#allocation2 + $0x170] sm:$0xff]  }
 0x22d   : > { %v5493_v29 = vpop.f32.mrb[131].mxu0  ;;  %5885 = vmatprep.subr.bf16.mxu1 %v6591_v59 }
 0x22e   : > { %v2217_v33 = vadd.f32 %v5491_v13, %v7982_v50  ;;  %v5494_v47 = vadd.f32 %v5493_v29, %v5492_v46  ;;  %v6592_v13 = vld [vmem:[#allocation2 + $0x130] sm:$0xff]   ;;  %v6593_v46 = vld [vmem:[#allocation2 + $0x1c0] sm:$0xff]  }
 0x22f   : > { %5886 = vmatpush3.bf16.msra.mxu1 %v6592_v13  ;;  %5985 = vmatprep.subr.bf16.mxu0 %v6593_v46 }
 0x230   : > { %v2220_v62 = vadd.f32 %v5494_v47, %v7985_v16  ;;  %v8233_v31 = vadd.f32 %v8174_v22, %v2217_v33 }
 0x232   : > { %v5495_v20 = vpop.f32.mrb[132].mxu0  ;;  %v8236_v15 = vadd.f32 %v8176_v56, %v2220_v62 }
 0x233   : > { %v5496_v21 = vpop.f32.mrb[133].mxu0 }
 0x234   : > { %v5497_v5 = vadd.f32 %v5496_v21, %v5495_v20  ;;  %v5498_v10 = vpop.f32.mrb[134].mxu0 }
 0x235   : > { %v5499_v45 = vpop.f32.mrb[135].mxu0 }
 0x236   : > { %v2225_v34 = vadd.f32 %v5497_v5, %v7990_v26  ;;  %v5500_v38 = vadd.f32 %v5499_v45, %v5498_v10 }
 0x238   : > { %v2228_v50 = vadd.f32 %v5500_v38, %v7993_v14  ;;  %v8241_v42 = vadd.f32 %v8186_v51, %v2225_v34  ;;  %v6601_v38 = vld [vmem:[#allocation2 + $0x178] sm:$0xff]  }
 0x239   : > { %5887 = vmatprep.subr.bf16.mxu1 %v6601_v38 }
 0x23a   : > { %v5501_v16 = vpop.f32.mrb[136].mxu0  ;;  %v8244_v22 = vadd.f32 %v8188_v44, %v2228_v50 }
 0x23b   : > { %v5502_v40 = vpop.f32.mrb[137].mxu0 }
 0x23c   : > { %v5503_v35 = vadd.f32 %v5502_v40, %v5501_v16  ;;  %v5504_v56 = vpop.f32.mrb[138].mxu0  ;;  %v6602_v16 = vld [vmem:[#allocation2 + $0x138] sm:$0xff]  }
 0x23d   : > { %v5505_v3 = vpop.f32.mrb[139].mxu0  ;;  %5888 = vmatpush3.bf16.msra.mxu1 %v6602_v16 }
 0x23e   : > { %v2233_v1 = vadd.f32 %v5503_v35, %v7998_v39  ;;  %v5506_v26 = vadd.f32 %v5505_v3, %v5504_v56 }
 0x240   : > { %v2236_v14 = vadd.f32 %v5506_v26, %v8002_v27  ;;  %v8249_v51 = vadd.f32 %v8198_v4, %v2233_v1  ;;  %v9277_v26 = vld [vmem:[#allocation12_spill] sm:$0xff] }
 0x242   : > { %v5507_v44 = vpop.f32.mrb[140].mxu0  ;;  %v8252_v29 = vadd.f32 %v8200_v8, %v2236_v14  ;;  %v3050_v14 = vrot.slane %v9277_v26, 1 }
 0x243   : > { %v5508_v37 = vpop.f32.mrb[141].mxu0 }
 0x244   : > { %v5509_v33 = vadd.f32 %v5508_v37, %v5507_v44  ;;  %v5510_v47 = vpop.f32.mrb[142].mxu0 }
 0x245   : > { %v5511_v62 = vpop.f32.mrb[143].mxu0 }
 0x246   : > { %v2241_v20 = vadd.f32 %v5509_v33, %v8013_v43  ;;  %v5512_v39 = vadd.f32 %v5511_v62, %v5510_v47  ;;  %v3049_v47 = vrot.slane %v8081_v18, 1 }
 0x248   : > { %v2244_v21 = vadd.f32 %v5512_v39, %v8020_v54  ;;  %v8257_v5 = vadd.f32 %v8210_v63, %v2241_v20 }
 0x24a   : > { %v6163_v27 = vpop.f32.mrb[144].mxu0  ;;  %v8260_v4 = vadd.f32 %v8212_v2, %v2244_v21 }
 0x24b   : > { %v2451_v10 = vadd.f32 %v6163_v27, %v8108_v53  ;;  %v2442_v8 = vpop.f32.mrb[145].mxu0 }
 0x24c   : > { %v2443_v45 = vadd.f32 %v2442_v8, %v8085_v36  ;;  %v6164_v34 = vpop.f32.mrb[146].mxu0 }
 0x24d   : > { %v2454_v50 = vadd.f32 %v6164_v34, %v8112_v58  ;;  %v2445_v43 = vpop.f32.mrb[147].mxu0  ;;  %v2571_v63 = vmax.f32 %v2451_v10, 0.0 }
 0x24e   : > { %v2446_v54 = vadd.f32 %v2445_v43, %v8093_v61  ;;  %v2569_v35 = vmax.f32 %v2443_v45, 0.0  ;;  %v6594_v43 = vld [vmem:[#allocation2 + $0x180] sm:$0xff]  }
 0x24f   : > { %v2572_v40 = vmax.f32 %v2454_v50, 0.0  ;;  %v8283_v50 = vsel %vm3048_vm10, %v3049_v47, %v3050_v14 }
 0x250   : > { %v2570_v2 = vmax.f32 %v2446_v54, 0.0 }
 0x251   : > { %v2602_v56 = vpack.c.bf16 %v2572_v40, %v2571_v63  ;;  %v6595_v40 = vld [vmem:[#allocation2 + $0x1c8] sm:$0xff]  }
 0x252   : > { %v2601_v59 = vpack.c.bf16 %v2570_v2, %v2569_v35  ;;  %v6167_v53 = vpop.f32.mrb[148].mxu0 }
 0x253   : > { %v2632_v3 = vshrl.u32 %v2602_v56, 16  ;;  %v2467_v36 = vadd.f32 %v6167_v53, %v8133_v41  ;;  %v2458_v13 = vpop.f32.mrb[149].mxu0  ;;  %v2635_v44 = vshll.u32 %v2602_v56, 16 }
 0x254   : > { %v2625_v46 = vshrl.u32 %v2601_v59, 16  ;;  %v2459_v58 = vadd.f32 %v2458_v13, %v8121_v9  ;;  %v6168_v1 = vpop.f32.mrb[150].mxu0  ;;  %v2628_v20 = vshll.u32 %v2601_v59, 16 }
 0x255   : > { %v2634_v61 = vrot.slane %v2632_v3, 7  ;;  %v2470_v37 = vadd.f32 %v6168_v1, %v8136_v23  ;;  %v2461_v33 = vpop.f32.mrb[151].mxu0  ;;  %v2575_v21 = vmax.f32 %v2467_v36, 0.0 }
 0x256   : > { %v2627_v62 = vrot.slane %v2625_v46, 7  ;;  %v2462_v39 = vadd.f32 %v2461_v33, %v8124_v25  ;;  %v2573_v27 = vmax.f32 %v2459_v58, 0.0 }
 0x257   : > { %v2637_v41 = vor.u32 %v2635_v44, %v2634_v61  ;;  %v2576_v10 = vmax.f32 %v2470_v37, 0.0  ;;  %v8274_v8 = vsel %vm8075_vm8, %v2634_v61, 0  ;;  %v6596_v44 = vld [vmem:[#allocation2 + $0x188] sm:$0xff]  }
 0x258   : > { %v2630_v45 = vor.u32 %v2628_v20, %v2627_v62  ;;  %v8278_v23 = vsel %vm8075_vm8, %v2627_v62, 0  ;;  %v2574_v34 = vmax.f32 %v2462_v39, 0.0  ;;  %v2840_v53 = vshll.u32 %v8274_v8, 16  ;;  %v6597_v20 = vld [vmem:[#allocation2 + $0x1d0] sm:$0xff]  }
 0x259   : > { %v8280_v38 = vpack.c.bf16 %v2576_v10, %v2575_v21  ;;  %v8287_v25 = vsel %vm8075_vm8, 0, %v2637_v41  ;;  %v2828_v56 = vshll.u32 %v8278_v23, 16  ;;  %v3053_v58 = vrot.slane %v8278_v23, 1 }
 0x25a   : > { %v2603_v16 = vpack.c.bf16 %v2574_v34, %v2573_v27  ;;  %v6171_v54 = vpop.f32.mrb[152].mxu0  ;;  %v8291_v63 = vsel %vm8075_vm8, 0, %v2630_v45  ;;  %v2835_v59 = vshll.u32 %v8287_v25, 16 }
 0x25b   : > { %v2483_v35 = vadd.f32 %v6171_v54, %v8157_v28  ;;  %v2474_v2 = vpop.f32.mrb[153].mxu0  ;;  %3908 = vmatprep.mubr.bf16.mxu0 %v8291_v63  ;;  %v2823_v46 = vshll.u32 %v8291_v63, 16  ;;  %v8302_v28 = vld [vmem:[#allocation2 + $0x200] sm:$0xff]   ;;  %v2646_v1 = vshrl.u32 %v8280_v38, 16  ;;  %v2821_v61 = vshrl.u32 %v8291_v63, 16 }
 0x25c   : > { %v2639_v3 = vshrl.u32 %v2603_v16, 16  ;;  %v2475_v36 = vadd.f32 %v2474_v2, %v8145_v55  ;;  %v6172_v13 = vpop.f32.mrb[154].mxu0  ;;  %3909 = vmatmul.mubr.bf16.vlgmr.msra.gmra.mrb[176].mxu0 %v8283_v50  ;;  %v2833_v55 = vshrl.u32 %v8287_v25, 16  ;;  %v2642_v33 = vshll.u32 %v2603_v16, 16  ;;  %6193 = vmatprep.subr.bf16.mxu1 %v8302_v28 }
 0x25d   : > { %v2486_v26 = vadd.f32 %v6172_v13, %v8160_v7  ;;  %v2477_v14 = vpop.f32.mrb[155].mxu0  ;;  %3916 = vmatprep.mubr.bf16.mxu0 %v8287_v25  ;;  %5986 = vmatpush3.bf16.msra.mxu0 %v6594_v43  ;;  %v2825_v62 = vrot.slane %v2823_v46, 1  ;;  %v2579_v39 = vmax.f32 %v2483_v35, 0.0  ;;  %v2830_v41 = vrot.slane %v2828_v56, 1 }
 0x25e   : > { %v2641_v37 = vrot.slane %v2639_v3, 7  ;;  %v2478_v47 = vadd.f32 %v2477_v14, %v8148_v32  ;;  %5987 = vmatprep.subr.bf16.mxu0 %v6595_v40  ;;  %v2837_v21 = vrot.slane %v2835_v59, 1  ;;  %v2577_v10 = vmax.f32 %v2475_v36, 0.0  ;;  %v6598_v59 = vld [vmem:[#allocation2 + $0x190] sm:$0xff]  }
 0x25f   : > { %v2580_v7 = vmax.f32 %v2486_v26, 0.0  ;;  %v2826_v23 = vor.u32 %v2825_v62, %v2821_v61  ;;  %v2648_v34 = vrot.slane %v2646_v1, 7  ;;  %v3052_v16 = vrot.slane %v8291_v63, 1  ;;  %v6599_v1 = vld [vmem:[#allocation2 + $0x1d8] sm:$0xff]  }
 0x260   : > { %v2644_v27 = vor.u32 %v2642_v33, %v2641_v37  ;;  %v2578_v45 = vmax.f32 %v2478_v47, 0.0  ;;  %v2838_v54 = vor.u32 %v2837_v21, %v2833_v55  ;;  %v8316_v32 = vsel %vm8075_vm8, %v2641_v37, 0  ;;  %v6600_v33 = vld [vmem:[#allocation2 + $0x198] sm:$0xff]  }
 0x261   : > { %v8311_v43 = vpack.c.bf16 %v2580_v7, %v2579_v39  ;;  %5988 = vmatpush3.bf16.msra.mxu0 %v6596_v44  ;;  %v8319_v2 = vsel %vm2807_vm9, %v2826_v23, %v2830_v41  ;;  %v2842_v56 = vrot.slane %v2840_v53, 1  ;;  %v2649_v3 = vshll.u32 %v8280_v38, 16 }
 0x262   : > { %v2605_v40 = vpack.c.bf16 %v2578_v45, %v2577_v10  ;;  %v6175_v35 = vpop.f32.mrb[156].mxu0  ;;  %5989 = vmatprep.subr.bf16.mxu0 %v6597_v20  ;;  %3755 = vmatprep.mubr.bf16.mxu1 %v8319_v2  ;;  %v8326_v46 = vsel %vm8075_vm8, 0, %v2644_v27  ;;  %v8334_v38 = vsel %vm3048_vm10, %v3052_v16, %v3053_v58  ;;  %v2852_v37 = vshll.u32 %v8316_v32, 16 }
 0x263   : > { %v2499_v36 = vadd.f32 %v6175_v35, %v8181_v12  ;;  %v2490_v13 = vpop.f32.mrb[157].mxu0  ;;  %3756 = vmatmul.mubr.bf16.gmra.mrb[116].mxu1 %v8291_v63  ;;  %v8331_v61 = vsel %vm2807_vm9, %v2838_v54, %v2842_v56  ;;  %v2651_v12 = vor.u32 %v2649_v3, %v2648_v34  ;;  %v2847_v63 = vshll.u32 %v8326_v46, 16  ;;  %v6604_v56 = vld [vmem:[#allocation2 + $0x1a0] sm:$0xff]  }
 0x264   : > { %v2653_v26 = vshrl.u32 %v2605_v40, 16  ;;  %v2491_v14 = vadd.f32 %v2490_v13, %v8169_v49  ;;  %v6176_v53 = vpop.f32.mrb[158].mxu0  ;;  %3763 = vmatprep.mubr.bf16.mxu1 %v8331_v61  ;;  %3917 = vmatmul.mubr.bf16.gmra.mrb[180].mxu0 %v8334_v38  ;;  %v2845_v62 = vshrl.u32 %v8326_v46, 16  ;;  %v2854_v27 = vrot.slane %v2852_v37, 1 }
 0x265   : > { %v2502_v55 = vadd.f32 %v6176_v53, %v8184_v60  ;;  %v2493_v44 = vpop.f32.mrb[159].mxu0  ;;  %3924 = vmatprep.mubr.bf16.mxu0 %v8326_v46  ;;  %5990 = vmatpush3.bf16.msra.mxu0 %v6598_v59  ;;  %v2583_v58 = vmax.f32 %v2499_v36, 0.0  ;;  %v6603_v60 = vld [vmem:[#allocation2 + $0x1e0] sm:$0xff]   ;;  %v2849_v41 = vrot.slane %v2847_v63, 1  ;;  %v8349_v10 = vsel %vm8075_vm8, 0, %v2651_v12 }
 0x266   : > { %v2494_v49 = vadd.f32 %v2493_v44, %v8172_v24  ;;  %5991 = vmatprep.subr.bf16.mxu0 %v6599_v1  ;;  %v2655_v20 = vrot.slane %v2653_v26, 7  ;;  %v2581_v39 = vmax.f32 %v2491_v14, 0.0  ;;  %v3055_v24 = vrot.slane %v8287_v25, 1  ;;  %v6605_v1 = vld [vmem:[#allocation2 + $0x1e8] sm:$0xff]  }
 0x267   : > { %v2584_v47 = vmax.f32 %v2502_v55, 0.0  ;;  %v2850_v54 = vor.u32 %v2849_v41, %v2845_v62  ;;  %v3056_v16 = vrot.slane %v8274_v8, 1  ;;  %v2859_v35 = vshll.u32 %v8349_v10, 16 }
 0x268   : > { %v2582_v7 = vmax.f32 %v2494_v49, 0.0  ;;  %v8357_v59 = vsel %vm8075_vm8, %v2648_v34, 0  ;;  %v2656_v3 = vshll.u32 %v2605_v40, 16  ;;  %v2660_v34 = vshrl.u32 %v8311_v43, 16  ;;  %v6606_v49 = vld [vmem:[#allocation2 + $0x1a8] sm:$0xff]  }
 0x269   : > { %v8344_v21 = vpack.c.bf16 %v2584_v47, %v2583_v58  ;;  %5992 = vmatpush3.bf16.msra.mxu0 %v6600_v33  ;;  %v8363_v8 = vsel %vm2807_vm9, %v2850_v54, %v2854_v27  ;;  %v8366_v53 = vsel %vm3048_vm10, %v3055_v24, %v3056_v16  ;;  %v2857_v44 = vshrl.u32 %v8349_v10, 16  ;;  %v6608_v16 = vld [vmem:[#allocation2 + $0x1b0] sm:$0xff]  }
 0x26a   : > { %v8351_v45 = vpack.c.bf16 %v2582_v7, %v2581_v39  ;;  %v6179_v23 = vpop.f32.mrb[160].mxu0  ;;  %5993 = vmatprep.subr.bf16.mxu0 %v6603_v60  ;;  %v2658_v12 = vor.u32 %v2656_v3, %v2655_v20  ;;  %v2864_v37 = vshll.u32 %v8357_v59, 16  ;;  %v2662_v60 = vrot.slane %v2660_v34, 7 }
 0x26b   : > { %v2515_v36 = vadd.f32 %v6179_v23, %v8205_v48  ;;  %v2506_v13 = vpop.f32.mrb[161].mxu0  ;;  %3764 = vmatmul.mubr.bf16.gmra.mrb[120].mxu1 %v8287_v25  ;;  %v3059_v23 = vrot.slane %v8316_v32, 1 }
 0x26c   : > { %v2507_v26 = vadd.f32 %v2506_v13, %v8193_v17  ;;  %v6180_v14 = vpop.f32.mrb[162].mxu0  ;;  %3771 = vmatprep.mubr.bf16.mxu1 %v8363_v8  ;;  %3925 = vmatmul.mubr.bf16.gmra.mrb[184].mxu0 %v8366_v53  ;;  %v2861_v17 = vrot.slane %v2859_v35, 1  ;;  %v8381_v7 = vsel %vm8075_vm8, 0, %v2658_v12  ;;  %v2866_v24 = vrot.slane %v2864_v37, 1  ;;  %v6609_v13 = vld [vmem:[#allocation2 + $0x1f8] sm:$0xff]  }
 0x26d   : > { %v2518_v40 = vadd.f32 %v6180_v14, %v8208_v6  ;;  %v2509_v48 = vpop.f32.mrb[163].mxu0  ;;  %3932 = vmatprep.mubr.bf16.mxu0 %v8349_v10  ;;  %5994 = vmatpush3.bf16.msra.mxu0 %v6604_v56  ;;  %v2587_v63 = vmax.f32 %v2515_v36, 0.0  ;;  %v6607_v6 = vld [vmem:[#allocation2 + $0x1f0] sm:$0xff]   ;;  %v2871_v54 = vshll.u32 %v8381_v7, 16  ;;  %v2663_v35 = vshll.u32 %v8311_v43, 16 }
 0x26e   : > { %v2510_v55 = vadd.f32 %v2509_v48, %v8196_v19  ;;  %5995 = vmatprep.subr.bf16.mxu0 %v6605_v1  ;;  %v2585_v58 = vmax.f32 %v2507_v26, 0.0  ;;  %v2862_v62 = vor.u32 %v2861_v17, %v2857_v44  ;;  %v3058_v19 = vrot.slane %v8326_v46, 1  ;;  %v6610_v17 = vld [vmem:[#allocation2 + $0x1b8] sm:$0xff]  }
 0x26f   : > { %v2588_v33 = vmax.f32 %v2518_v40, 0.0  ;;  %v8390_v56 = vsel %vm8075_vm8, %v2655_v20, 0  ;;  %v2873_v43 = vrot.slane %v2871_v54, 1  ;;  %v2665_v34 = vor.u32 %v2663_v35, %v2662_v60 }
 0x270   : > { %v2586_v47 = vmax.f32 %v2510_v55, 0.0  ;;  %v8396_v26 = vsel %vm2807_vm9, %v2862_v62, %v2866_v24  ;;  %v8399_v14 = vsel %vm3048_vm10, %v3058_v19, %v3059_v23  ;;  %v2667_v20 = vshrl.u32 %v8351_v45, 16 }
 0x271   : > { %v8376_v39 = vpack.c.bf16 %v2588_v33, %v2587_v63  ;;  %5996 = vmatpush3.bf16.msra.mxu0 %v6606_v49  ;;  %v2869_v40 = vshrl.u32 %v8381_v7, 16  ;;  %v2876_v48 = vshll.u32 %v8390_v56, 16  ;;  %v3061_v63 = vrot.slane %v8349_v10, 1 }
 0x272   : > { %v8383_v41 = vpack.c.bf16 %v2586_v47, %v2585_v58  ;;  %v6183_v27 = vpop.f32.mrb[164].mxu0  ;;  %5997 = vmatprep.subr.bf16.mxu0 %v6607_v6  ;;  %v2669_v33 = vrot.slane %v2667_v20, 7  ;;  %v3062_v19 = vrot.slane %v8357_v59, 1  ;;  %v8422_v24 = vsel %vm8075_vm8, %v2662_v60, 0 }
 0x273   : > { %v2531_v3 = vadd.f32 %v6183_v27, %v8225_v30  ;;  %v2522_v36 = vpop.f32.mrb[165].mxu0  ;;  %3772 = vmatmul.mubr.bf16.gmra.mrb[124].mxu1 %v8326_v46  ;;  %v2874_v49 = vor.u32 %v2873_v43, %v2869_v40  ;;  %v2878_v62 = vrot.slane %v2876_v48, 1  ;;  %v2670_v23 = vshll.u32 %v8351_v45, 16 }
 0x274   : > { %v2523_v1 = vadd.f32 %v2522_v36, %v8217_v0  ;;  %v6184_v32 = vpop.f32.mrb[166].mxu0  ;;  %3779 = vmatprep.mubr.bf16.mxu1 %v8396_v26  ;;  %3933 = vmatmul.mubr.bf16.gmra.mrb[188].mxu0 %v8399_v14  ;;  %v8432_v59 = vsel %vm3048_vm10, %v3061_v63, %v3062_v19  ;;  %v2674_v60 = vshrl.u32 %v8344_v21, 16  ;;  %v2888_v43 = vshll.u32 %v8422_v24, 16 }
 0x275   : > { %v2534_v30 = vadd.f32 %v6184_v32, %v8228_v11  ;;  %v2525_v0 = vpop.f32.mrb[167].mxu0  ;;  %3940 = vmatprep.mubr.bf16.mxu0 %v8381_v7  ;;  %5998 = vmatpush3.bf16.msra.mxu0 %v6608_v16  ;;  %v2591_v55 = vmax.f32 %v2531_v3, 0.0  ;;  %v8429_v36 = vsel %vm2807_vm9, %v2874_v49, %v2878_v62  ;;  %v2681_v48 = vshrl.u32 %v8383_v41, 16 }
 0x276   : > { %v2526_v12 = vadd.f32 %v2525_v0, %v8220_v52  ;;  %5999 = vmatprep.subr.bf16.mxu0 %v6609_v13  ;;  %v2589_v37 = vmax.f32 %v2523_v1, 0.0  ;;  %v8414_v52 = vsel %vm8075_vm8, 0, %v2665_v34  ;;  %v2672_v1 = vor.u32 %v2670_v23, %v2669_v33 }
 0x277   : > { %v2592_v44 = vmax.f32 %v2534_v30, 0.0  ;;  %v2883_v27 = vshll.u32 %v8414_v52, 16  ;;  %v2881_v32 = vshrl.u32 %v8414_v52, 16  ;;  %v2676_v40 = vrot.slane %v2674_v60, 7 }
 0x278   : > { %v2590_v11 = vmax.f32 %v2526_v12, 0.0  ;;  %v2677_v63 = vshll.u32 %v8344_v21, 16  ;;  %v2683_v21 = vrot.slane %v2681_v48, 7  ;;  %v2684_v60 = vshll.u32 %v8383_v41, 16 }
 0x279   : > { %v8410_v6 = vpack.c.bf16 %v2592_v44, %v2591_v55  ;;  %6000 = vmatpush3.bf16.msra.mxu0 %v6610_v17  ;;  %v2885_v13 = vrot.slane %v2883_v27, 1  ;;  %v3068_v41 = vrot.slane %v8422_v24, 1 }
 0x27a   : > { %v8416_v58 = vpack.c.bf16 %v2590_v11, %v2589_v37  ;;  %v6187_v47 = vpop.f32.mrb[168].mxu0  ;;  %v2890_v37 = vrot.slane %v2888_v43, 1  ;;  %v3065_v11 = vrot.slane %v8390_v56, 1  ;;  %v2688_v43 = vshrl.u32 %v8376_v39, 16 }
 0x27b   : > { %v2547_v54 = vadd.f32 %v6187_v47, %v8241_v42  ;;  %v2538_v16 = vpop.f32.mrb[169].mxu0  ;;  %3780 = vmatmul.mubr.bf16.gmra.mrb[128].mxu1 %v8349_v10  ;;  %v2886_v12 = vor.u32 %v2885_v13, %v2881_v32  ;;  %v2797_v47 = vsel %vm8075_vm8, %v2669_v33, 0 }
 0x27c   : > { %v2539_v35 = vadd.f32 %v2538_v16, %v8233_v31  ;;  %v6188_v3 = vpop.f32.mrb[170].mxu0  ;;  %3787 = vmatprep.mubr.bf16.mxu1 %v8429_v36  ;;  %3941 = vmatmul.mubr.bf16.gmra.mrb[192].mxu0 %v8432_v59  ;;  %v2900_v13 = vshll.u32 %v2797_v47, 16 }
 0x27d   : > { %v2550_v45 = vadd.f32 %v6188_v3, %v8244_v22  ;;  %v2541_v31 = vpop.f32.mrb[171].mxu0  ;;  %3948 = vmatprep.mubr.bf16.mxu0 %v8414_v52  ;;  %v2595_v34 = vmax.f32 %v2547_v54, 0.0  ;;  %v3064_v22 = vrot.slane %v8381_v7, 1  ;;  %v8461_v54 = vsel %vm2807_vm9, %v2886_v12, %v2890_v37 }
 0x27e   : > { %v2542_v42 = vadd.f32 %v2541_v31, %v8236_v15  ;;  %v2593_v30 = vmax.f32 %v2539_v35, 0.0  ;;  %v8448_v15 = vsel %vm8075_vm8, 0, %v2672_v1  ;;  %v2679_v35 = vor.u32 %v2677_v63, %v2676_v40 }
 0x27f   : > { %v2596_v20 = vmax.f32 %v2550_v45, 0.0  ;;  %v2895_v49 = vshll.u32 %v8448_v15, 16  ;;  %v8464_v56 = vsel %vm3048_vm10, %v3064_v22, %v3065_v11  ;;  %v2893_v33 = vshrl.u32 %v8448_v15, 16 }
 0x280   : > { %v2594_v0 = vmax.f32 %v2542_v42, 0.0  ;;  %v2798_v22 = vsel %vm8075_vm8, %v2676_v40, 0  ;;  %v2690_v11 = vrot.slane %v2688_v43, 7  ;;  %v2691_v63 = vshll.u32 %v8376_v39, 16 }
 0x281   : > { %v8444_v17 = vpack.c.bf16 %v2596_v20, %v2595_v34  ;;  %v2897_v16 = vrot.slane %v2895_v49, 1  ;;  %v2686_v34 = vor.u32 %v2684_v60, %v2683_v21  ;;  %v2912_v49 = vshll.u32 %v2798_v22, 16 }
 0x282   : > { %v8450_v55 = vpack.c.bf16 %v2594_v0, %v2593_v30  ;;  %v6191_v44 = vpop.f32.mrb[172].mxu0  ;;  %v2902_v0 = vrot.slane %v2900_v13, 1 }
 0x283   : > { %v2563_v62 = vadd.f32 %v6191_v44, %v8257_v5  ;;  %v2554_v19 = vpop.f32.mrb[173].mxu0  ;;  %3788 = vmatmul.mubr.bf16.gmra.mrb[132].mxu1 %v8381_v7  ;;  %v2898_v32 = vor.u32 %v2897_v16, %v2893_v33  ;;  %v8498_v24 = vsel %vm8075_vm8, 0, %v2686_v34  ;;  %v2695_v16 = vshrl.u32 %v8416_v58, 16 }
 0x284   : > { %v2555_v27 = vadd.f32 %v2554_v19, %v8249_v51  ;;  %v6192_v23 = vpop.f32.mrb[174].mxu0  ;;  %3795 = vmatprep.mubr.bf16.mxu1 %v8461_v54  ;;  %3949 = vmatmul.mubr.bf16.gmra.mrb[196].mxu0 %v8464_v56  ;;  %v3070_v19 = vrot.slane %v8448_v15, 1  ;;  %v3074_v34 = vrot.slane %v2798_v22, 1 }
 0x285   : > { %v2566_v3 = vadd.f32 %v6192_v23, %v8260_v4  ;;  %v2557_v5 = vpop.f32.mrb[175].mxu0  ;;  %3956 = vmatprep.mubr.bf16.mxu0 %v8448_v15  ;;  %v2599_v1 = vmax.f32 %v2563_v62, 0.0  ;;  %v3067_v4 = vrot.slane %v8414_v52, 1  ;;  %v8489_v48 = vsel %vm2807_vm9, %v2898_v32, %v2902_v0 }
 0x286   : > { %v2558_v51 = vadd.f32 %v2557_v5, %v8252_v29  ;;  %v2597_v31 = vmax.f32 %v2555_v27, 0.0  ;;  %v8479_v29 = vsel %vm8075_vm8, 0, %v2679_v35  ;;  %v2919_v27 = vshll.u32 %v8498_v24, 16 }
 0x287   : > { %v2600_v45 = vmax.f32 %v2566_v3, 0.0  ;;  %v2907_v12 = vshll.u32 %v8479_v29, 16  ;;  %v8492_v44 = vsel %vm3048_vm10, %v3067_v4, %v3068_v41  ;;  %v2905_v40 = vshrl.u32 %v8479_v29, 16 }
 0x288   : > { %v2598_v42 = vmax.f32 %v2558_v51, 0.0  ;;  %v2693_v23 = vor.u32 %v2691_v63, %v2690_v11  ;;  %v2914_v35 = vrot.slane %v2912_v49, 1  ;;  %v3071_v3 = vrot.slane %v2797_v47, 1 }
 0x289   : > { %v8475_v20 = vpack.c.bf16 %v2600_v45, %v2599_v1  ;;  %v2909_v37 = vrot.slane %v2907_v12, 1  ;;  %v2799_v5 = vsel %vm8075_vm8, %v2683_v21, 0  ;;  %v2921_v33 = vrot.slane %v2919_v27, 1 }
 0x28a   : > { %v8481_v30 = vpack.c.bf16 %v2598_v42, %v2597_v31  ;;  %v8513_v39 = vsel %vm3048_vm10, %v3070_v19, %v3071_v3  ;;  %v2697_v13 = vrot.slane %v2695_v16, 7  ;;  %v8519_v47 = vsel %vm8075_vm8, 0, %v2693_v23 }
 0x28b   : > { %3796 = vmatmul.mubr.bf16.gmra.mrb[136].mxu1 %v8414_v52  ;;  %v2910_v62 = vor.u32 %v2909_v37, %v2905_v40  ;;  %v2917_v21 = vshrl.u32 %v8498_v24, 16  ;;  %v2924_v60 = vshll.u32 %v2799_v5, 16  ;;  %v2698_v1 = vshll.u32 %v8416_v58, 16 }
 0x28c   : > { %3803 = vmatprep.mubr.bf16.mxu1 %v8489_v48  ;;  %3957 = vmatmul.mubr.bf16.gmra.mrb[200].mxu0 %v8492_v44  ;;  %v3073_v31 = vrot.slane %v8479_v29, 1  ;;  %v2931_v42 = vshll.u32 %v8519_v47, 16  ;;  %v2702_v32 = vshrl.u32 %v8410_v6, 16  ;;  %v2800_v0 = vsel %vm8075_vm8, %v2690_v11, 0 }
 0x28d   : > { %3964 = vmatprep.mubr.bf16.mxu0 %v8479_v29  ;;  %v8510_v51 = vsel %vm2807_vm9, %v2910_v62, %v2914_v35  ;;  %v2922_v45 = vor.u32 %v2921_v33, %v2917_v21  ;;  %v2700_v4 = vor.u32 %v2698_v1, %v2697_v13  ;;  %v2926_v43 = vrot.slane %v2924_v60, 1 }
 0x28e   : > { %v8534_v58 = vsel %vm3048_vm10, %v3073_v31, %v3074_v34  ;;  %v2933_v12 = vrot.slane %v2931_v42, 1  ;;  %v2704_v37 = vrot.slane %v2702_v32, 7  ;;  %v2929_v11 = vshrl.u32 %v8519_v47, 16 }
 0x28f   : > { %v8531_v41 = vsel %vm2807_vm9, %v2922_v45, %v2926_v43  ;;  %v8540_v22 = vsel %vm8075_vm8, 0, %v2700_v4  ;;  %v2936_v40 = vshll.u32 %v2800_v0, 16  ;;  %v2705_v49 = vshll.u32 %v8410_v6, 16 }
 0x290   : > { %v2934_v63 = vor.u32 %v2933_v12, %v2929_v11  ;;  %v3076_v62 = vrot.slane %v8498_v24, 1  ;;  %v2943_v19 = vshll.u32 %v8540_v22, 16  ;;  %v2709_v23 = vshrl.u32 %v8450_v55, 16 }
 0x291   : > { %v2707_v27 = vor.u32 %v2705_v49, %v2704_v37  ;;  %v2938_v16 = vrot.slane %v2936_v40, 1  ;;  %v3077_v35 = vrot.slane %v2799_v5, 1  ;;  %v2801_v3 = vsel %vm8075_vm8, %v2697_v13, 0 }
 0x292   : > { %v2945_v21 = vrot.slane %v2943_v19, 1  ;;  %v2711_v60 = vrot.slane %v2709_v23, 7  ;;  %v2941_v13 = vshrl.u32 %v8540_v22, 16  ;;  %v2948_v1 = vshll.u32 %v2801_v3, 16 }
 0x293   : > { %3804 = vmatmul.mubr.bf16.gmra.mrb[140].mxu1 %v8448_v15  ;;  %v8552_v33 = vsel %vm2807_vm9, %v2934_v63, %v2938_v16  ;;  %v8555_v6 = vsel %vm3048_vm10, %v3076_v62, %v3077_v35  ;;  %v8561_v5 = vsel %vm8075_vm8, 0, %v2707_v27  ;;  %v2712_v45 = vshll.u32 %v8450_v55, 16 }
 0x294   : > { %3811 = vmatprep.mubr.bf16.mxu1 %v8510_v51  ;;  %3965 = vmatmul.mubr.bf16.gmra.mrb[204].mxu0 %v8513_v39  ;;  %v2946_v31 = vor.u32 %v2945_v21, %v2941_v13  ;;  %v3079_v42 = vrot.slane %v8519_v47, 1  ;;  %v2955_v32 = vshll.u32 %v8561_v5, 16  ;;  %v2716_v4 = vshrl.u32 %v8444_v17, 16 }
 0x295   : > { %3972 = vmatprep.mubr.bf16.mxu0 %v8498_v24  ;;  %v2714_v43 = vor.u32 %v2712_v45, %v2711_v60  ;;  %v2950_v34 = vrot.slane %v2948_v1, 1  ;;  %v3080_v12 = vrot.slane %v2800_v0, 1  ;;  %v2802_v11 = vsel %vm8075_vm8, %v2704_v37, 0 }
 0x296   : > { %v2957_v49 = vrot.slane %v2955_v32, 1  ;;  %v2718_v62 = vrot.slane %v2716_v4, 7  ;;  %v2953_v19 = vshrl.u32 %v8561_v5, 16  ;;  %v2960_v27 = vshll.u32 %v2802_v11, 16 }
 0x297   : > { %v8573_v40 = vsel %vm2807_vm9, %v2946_v31, %v2950_v34  ;;  %v8576_v55 = vsel %vm3048_vm10, %v3079_v42, %v3080_v12  ;;  %v8582_v0 = vsel %vm8075_vm8, 0, %v2714_v43  ;;  %v2719_v35 = vshll.u32 %v8444_v17, 16 }
 0x298   : > { %v2958_v13 = vor.u32 %v2957_v49, %v2953_v19  ;;  %v3082_v1 = vrot.slane %v8540_v22, 1  ;;  %v2967_v45 = vshll.u32 %v8582_v0, 16  ;;  %v2723_v32 = vshrl.u32 %v8481_v30, 16 }
 0x299   : > { %v2721_v42 = vor.u32 %v2719_v35, %v2718_v62  ;;  %v2962_v4 = vrot.slane %v2960_v27, 1  ;;  %v3083_v43 = vrot.slane %v2801_v3, 1  ;;  %v2803_v34 = vsel %vm8075_vm8, %v2711_v60, 0 }
 0x29a   : > { %v2969_v49 = vrot.slane %v2967_v45, 1  ;;  %v2965_v60 = vshrl.u32 %v8582_v0, 16  ;;  %v2726_v19 = vshll.u32 %v8481_v30, 16  ;;  %v2804_v45 = vsel %vm8075_vm8, %v2718_v62, 0 }
 0x29b   : > { %3812 = vmatmul.mubr.bf16.gmra.mrb[144].mxu1 %v8479_v29  ;;  %v8598_v17 = vsel %vm2807_vm9, %v2958_v13, %v2962_v4  ;;  %v8601_v12 = vsel %vm3048_vm10, %v3082_v1, %v3083_v43  ;;  %v8607_v3 = vsel %vm8075_vm8, 0, %v2721_v42  ;;  %v3086_v1 = vrot.slane %v2802_v11, 1 }
 0x29c   : > { %3819 = vmatprep.mubr.bf16.mxu1 %v8531_v41  ;;  %3973 = vmatmul.mubr.bf16.gmra.mrb[208].mxu0 %v8534_v58  ;;  %v2970_v27 = vor.u32 %v2969_v49, %v2965_v60  ;;  %v2979_v35 = vshll.u32 %v8607_v3, 16  ;;  %v2977_v11 = vshrl.u32 %v8607_v3, 16  ;;  %v2984_v62 = vshll.u32 %v2804_v45, 16 }
 0x29d   : > { %3980 = vmatprep.mubr.bf16.mxu0 %v8519_v47  ;;  %v3088_v49 = vrot.slane %v8582_v0, 1 }
 0x29e   : > { %v2981_v30 = vrot.slane %v2979_v35, 1 }
 0x2a0   : > { %v2982_v43 = vor.u32 %v2981_v30, %v2977_v11  ;;  %v2733_v30 = vshll.u32 %v8475_v20, 16 }
 0x2a3   : > { %3820 = vmatmul.mubr.bf16.gmra.mrb[148].mxu1 %v8498_v24 }
 0x2a4   : > { %3827 = vmatprep.mubr.bf16.mxu1 %v8552_v33  ;;  %3981 = vmatmul.mubr.bf16.gmra.mrb[212].mxu0 %v8555_v6 }
 0x2a5   : > { %3988 = vmatprep.mubr.bf16.mxu0 %v8540_v22 }
 0x2a9   : > { %v5665_v63 = vpop.f32.mrb[112].mxu1 }
 0x2aa   : > { %v5666_v37 = vpop.f32.mrb[113].mxu1 }
 0x2ab   : > { %3828 = vmatmul.mubr.bf16.gmra.mrb[152].mxu1 %v8519_v47  ;;  %v8586_v23 = vadd.f32 %v5666_v37, %v5665_v63  ;;  %v5668_v16 = vpop.f32.mrb[114].mxu1  ;;  %v2725_v63 = vrot.slane %v2723_v32, 7  ;;  %v2972_v37 = vshll.u32 %v2803_v34, 16 }
 0x2ac   : > { %3835 = vmatprep.mubr.bf16.mxu1 %v8573_v40  ;;  %3989 = vmatmul.mubr.bf16.gmra.mrb[216].mxu0 %v8576_v55  ;;  %v5669_v21 = vpop.f32.mrb[115].mxu1 }
 0x2ad   : > { %3996 = vmatprep.mubr.bf16.mxu0 %v8561_v5  ;;  %v8591_v31 = vadd.f32 %v5669_v21, %v5668_v16  ;;  %v3085_v16 = vrot.slane %v8561_v5, 1  ;;  %v2728_v21 = vor.u32 %v2726_v19, %v2725_v63  ;;  %v2974_v13 = vrot.slane %v2972_v37, 1 }
 0x2ae   : > { %v2730_v37 = vshrl.u32 %v8475_v20, 16  ;;  %v2986_v19 = vrot.slane %v2984_v62, 1  ;;  %v3091_v62 = vrot.slane %v8607_v3, 1 }
 0x2af   : > { %v8618_v42 = vsel %vm2807_vm9, %v2970_v27, %v2974_v13  ;;  %v8621_v32 = vsel %vm3048_vm10, %v3085_v16, %v3086_v1  ;;  %v8627_v4 = vsel %vm8075_vm8, 0, %v2728_v21  ;;  %v3089_v27 = vrot.slane %v2803_v34, 1 }
 0x2b0   : > { %v2991_v60 = vshll.u32 %v8627_v4, 16  ;;  %v2805_v16 = vsel %vm8075_vm8, %v2725_v63, 0  ;;  %v8638_v35 = vsel %vm2807_vm9, %v2982_v43, %v2986_v19  ;;  %v8643_v1 = vrot.slane %v2730_v37, 7 }
 0x2b1   : > { %v8641_v21 = vsel %vm3048_vm10, %v3088_v49, %v3089_v27  ;;  %v2989_v34 = vshrl.u32 %v8627_v4, 16  ;;  %v2996_v63 = vshll.u32 %v2805_v16, 16  ;;  %v3095_v27 = vrot.slane %v2805_v16, 1  ;;  %v6613_v16 = vld [vmem:[#allocation2 + $0x210] sm:$0xff]  }
 0x2b2   : > { %v2993_v13 = vrot.slane %v2991_v60, 1  ;;  %v2735_v43 = vor.u32 %v2733_v30, %v8643_v1  ;;  %v3092_v60 = vrot.slane %v2804_v45, 1  ;;  %v3094_v45 = vrot.slane %v8627_v4, 1 }
 0x2b3   : > { %3836 = vmatmul.mubr.bf16.gmra.mrb[156].mxu1 %v8540_v22  ;;  %v2998_v49 = vrot.slane %v2996_v63, 1  ;;  %v6614_v63 = vld [vmem:[#allocation2 + $0x218] sm:$0xff]  }
 0x2b4   : > { %3843 = vmatprep.mubr.bf16.mxu1 %v8598_v17  ;;  %3997 = vmatmul.mubr.bf16.gmra.mrb[220].mxu0 %v8601_v12  ;;  %v2994_v11 = vor.u32 %v2993_v13, %v2989_v34  ;;  %v8657_v19 = vsel %vm3048_vm10, %v3091_v62, %v3092_v60  ;;  %v8663_v20 = vsel %vm8075_vm8, 0, %v2735_v43  ;;  %v8669_v13 = vsel %vm3048_vm10, %v3094_v45, %v3095_v27  ;;  %v6612_v34 = vld [vmem:[#allocation2 + $0x208] sm:$0xff]  }
 0x2b5   : > { %4004 = vmatprep.mubr.bf16.mxu0 %v8582_v0  ;;  %v3114_v9 = vshrl.u32 %v8663_v20, 16 }
 0x2b6   : > { %v8654_v37 = vsel %vm2807_vm9, %v2994_v11, %v2998_v49 }
 0x2bb   : > { %3844 = vmatmul.mubr.bf16.gmra.mrb[160].mxu1 %v8561_v5 }
 0x2bc   : > { %3851 = vmatprep.mubr.bf16.mxu1 %v8618_v42  ;;  %4005 = vmatmul.mubr.bf16.gmra.mrb[224].mxu0 %v8621_v32 }
 0x2bd   : > { %4012 = vmatprep.mubr.bf16.mxu0 %v8607_v3 }
 0x2c3   : > { %3852 = vmatmul.mubr.bf16.gmra.mrb[164].mxu1 %v8582_v0 }
 0x2c4   : > { %3859 = vmatprep.mubr.bf16.mxu1 %v8638_v35  ;;  %4013 = vmatmul.mubr.bf16.gmra.mrb[228].mxu0 %v8641_v21 }
 0x2c5   : > { %4020 = vmatprep.mubr.bf16.mxu0 %v8627_v4 }
 0x2cb   : > { %3860 = vmatmul.mubr.bf16.gmra.mrb[168].mxu1 %v8607_v3 }
 0x2cc   : > { %3867 = vmatprep.mubr.bf16.mxu1 %v8654_v37  ;;  %4021 = vmatmul.mubr.bf16.gmra.mrb[232].mxu0 %v8657_v19 }
 0x2cd   : > { %4028 = vmatprep.mubr.bf16.mxu0 %v8663_v20 }
 0x2d3   : > { %3868 = vmatmul.mubr.bf16.gmra.mrb[172].mxu1 %v8627_v4 }
 0x2d4   : > { %4029 = vmatmul.mubr.bf16.gmra.mrb[236].mxu0 %v8669_v13  ;;  %4069 = vmatprep.mubr.bf16.mxu1 %v8334_v38  ;;  %v8725_v38 = vld [vmem:[%s9166_s4] ss:$0 sm:$0xff] }
 0x2d5   : > { %4230 = vmatprep.mubr.bf16.mxu0 %v8331_v61 }
 0x2db   : > { %4070 = vmatmul.mubr.bf16.vlgmr.msra.gmra.mrb[176].mxu1 %v8319_v2  ;;  %v6617_v2 = vld [vmem:[#allocation2 + $0x230] sm:$0xff]  }
 0x2dc   : > { %4077 = vmatprep.mubr.bf16.mxu1 %v8366_v53  ;;  %4231 = vmatmul.mubr.bf16.vlgmr.msra.gmra.mrb[240].mxu0 %v8287_v25  ;;  %v6615_v25 = vld [vmem:[#allocation2 + $0x220] sm:$0xff]  }
 0x2dd   : > { %6194 = vmatpush3.bf16.msra.mxu1 %v8302_v28  ;;  %4238 = vmatprep.mubr.bf16.mxu0 %v8363_v8  ;;  %v6616_v28 = vld [vmem:[#allocation2 + $0x228] sm:$0xff]  }
 0x2de   : > { %6195 = vmatprep.subr.bf16.mxu1 %v6612_v34 }
 0x2e1   : > { %6196 = vmatpush3.bf16.msra.mxu1 %v6612_v34 }
 0x2e2   : > { %6197 = vmatprep.subr.bf16.mxu1 %v6613_v16 }
 0x2e3   : > { %4078 = vmatmul.mubr.bf16.gmra.mrb[180].mxu1 %v8331_v61  ;;  %v8694_v61 = vld [vmem:[%s9167_s5] sm:$0xff]  }
 0x2e4   : > { %4085 = vmatprep.mubr.bf16.mxu1 %v8399_v14  ;;  %4239 = vmatmul.mubr.bf16.gmra.mrb[244].mxu0 %v8326_v46  ;;  %v6618_v46 = vld [vmem:[#allocation2 + $0x238] sm:$0xff]  }
 0x2e5   : > { %4246 = vmatprep.mubr.bf16.mxu0 %v8396_v26  ;;  %6198 = vmatpush3.bf16.msra.mxu1 %v6613_v16 }
 0x2e6   : > { %6199 = vmatprep.subr.bf16.mxu1 %v6614_v63 }
 0x2e9   : > { %6200 = vmatpush3.bf16.msra.mxu1 %v6614_v63 }
 0x2ea   : > { %6201 = vmatprep.subr.bf16.mxu1 %v6615_v25 }
 0x2eb   : > { %4086 = vmatmul.mubr.bf16.gmra.mrb[184].mxu1 %v8363_v8 }
 0x2ec   : > { %4093 = vmatprep.mubr.bf16.mxu1 %v8432_v59  ;;  %4247 = vmatmul.mubr.bf16.gmra.mrb[248].mxu0 %v8349_v10  ;;  %v3750_v10 = vadd.f32 %v8586_v23, %v8725_v38 }
 0x2ed   : > { %4254 = vmatprep.mubr.bf16.mxu0 %v8429_v36  ;;  %6202 = vmatpush3.bf16.msra.mxu1 %v6615_v25 }
 0x2ee   : > { %6203 = vmatprep.subr.bf16.mxu1 %v6616_v28 }
 0x2f1   : > { %6204 = vmatpush3.bf16.msra.mxu1 %v6616_v28 }
 0x2f2   : > { %6205 = vmatprep.subr.bf16.mxu1 %v6617_v2 }
 0x2f3   : > { %4094 = vmatmul.mubr.bf16.gmra.mrb[188].mxu1 %v8396_v26 }
 0x2f4   : > { %4101 = vmatprep.mubr.bf16.mxu1 %v8464_v56  ;;  %4255 = vmatmul.mubr.bf16.gmra.mrb[252].mxu0 %v8381_v7 }
 0x2f5   : > { %4262 = vmatprep.mubr.bf16.mxu0 %v8461_v54  ;;  %6206 = vmatpush3.bf16.msra.mxu1 %v6617_v2 }
 0x2f6   : > { %6207 = vmatprep.subr.bf16.mxu1 %v6618_v46 }
 0x2f9   : > { %6208 = vmatpush3.bf16.msra.mxu1 %v6618_v46 }
 0x2fa   : > { %6241 = vmatprep.subr.bf16.mxu1 %v8694_v61 }
 0x2fb   : > { %4102 = vmatmul.mubr.bf16.gmra.mrb[192].mxu1 %v8429_v36 }
 0x2fc   : > { %4109 = vmatprep.mubr.bf16.mxu1 %v8492_v44  ;;  %4263 = vmatmul.mubr.bf16.gmra.mrb[0].mxu0 %v8414_v52 }
 0x2fd   : > { %4270 = vmatprep.mubr.bf16.mxu0 %v8489_v48 }
 0x303   : > { %4110 = vmatmul.mubr.bf16.gmra.mrb[196].mxu1 %v8461_v54 }
 0x304   : > { %4117 = vmatprep.mubr.bf16.mxu1 %v8513_v39  ;;  %4271 = vmatmul.mubr.bf16.gmra.mrb[4].mxu0 %v8448_v15  ;;  %v3753_v15 = vadd.f32 %v8591_v31, %v8725_v38 }
 0x305   : > { %4278 = vmatprep.mubr.bf16.mxu0 %v8510_v51 }
 0x30b   : > { %4118 = vmatmul.mubr.bf16.gmra.mrb[200].mxu1 %v8489_v48 }
 0x30c   : > { %4125 = vmatprep.mubr.bf16.mxu1 %v8534_v58  ;;  %4279 = vmatmul.mubr.bf16.gmra.mrb[8].mxu0 %v8479_v29 }
 0x30d   : > { %4286 = vmatprep.mubr.bf16.mxu0 %v8531_v41 }
 0x313   : > { %4126 = vmatmul.mubr.bf16.gmra.mrb[204].mxu1 %v8510_v51 }
 0x314   : > { %4133 = vmatprep.mubr.bf16.mxu1 %v8555_v6  ;;  %4287 = vmatmul.mubr.bf16.gmra.mrb[12].mxu0 %v8498_v24 }
 0x315   : > { %4294 = vmatprep.mubr.bf16.mxu0 %v8552_v33 }
 0x31b   : > { %4134 = vmatmul.mubr.bf16.gmra.mrb[208].mxu1 %v8531_v41 }
 0x31c   : > { %4141 = vmatprep.mubr.bf16.mxu1 %v8576_v55  ;;  %4295 = vmatmul.mubr.bf16.gmra.mrb[16].mxu0 %v8519_v47 }
 0x31d   : > { %4302 = vmatprep.mubr.bf16.mxu0 %v8573_v40 }
 0x323   : > { %4142 = vmatmul.mubr.bf16.gmra.mrb[212].mxu1 %v8552_v33 }
 0x324   : > { %4149 = vmatprep.mubr.bf16.mxu1 %v8601_v12  ;;  %4303 = vmatmul.mubr.bf16.gmra.mrb[20].mxu0 %v8540_v22 }
 0x325   : > { %4310 = vmatprep.mubr.bf16.mxu0 %v8598_v17 }
 0x32b   : > { %4150 = vmatmul.mubr.bf16.gmra.mrb[216].mxu1 %v8573_v40 }
 0x32c   : > { %4157 = vmatprep.mubr.bf16.mxu1 %v8621_v32  ;;  %4311 = vmatmul.mubr.bf16.gmra.mrb[24].mxu0 %v8561_v5  ;;  %v3116_v5 = vshll.u32 %v8663_v20, 16 }
 0x32d   : > { %4318 = vmatprep.mubr.bf16.mxu0 %v8618_v42 }
 0x32e   : > { %v3118_v60 = vrot.slane %v3116_v5, 1 }
 0x32f   : > { %v5777_v8 = vpop.f32.mrb[176].mxu0 }
 0x330   : > { %v5778_v7 = vpop.f32.mrb[177].mxu0  ;;  %v3119_v28 = vor.u32 %v3118_v60, %v3114_v9 }
 0x331   : > { %v5779_v26 = vadd.f32 %v5778_v7, %v5777_v8  ;;  %v5780_v52 = vpop.f32.mrb[178].mxu0 }
 0x332   : > { %v5781_v36 = vpop.f32.mrb[179].mxu0 }
 0x333   : > { %v8734_v54 = vadd.f32 %v5779_v26, %v3750_v10  ;;  %v5782_v29 = vadd.f32 %v5781_v36, %v5780_v52  ;;  %4158 = vmatmul.mubr.bf16.gmra.mrb[220].mxu1 %v8598_v17 }
 0x334   : > { %4165 = vmatprep.mubr.bf16.mxu1 %v8641_v21  ;;  %4319 = vmatmul.mubr.bf16.gmra.mrb[28].mxu0 %v8582_v0  ;;  %v2806_v0 = vsel %vm8075_vm8, %v8643_v1, 0 }
 0x335   : > { %v8737_v48 = vadd.f32 %v5782_v29, %v3753_v15  ;;  %4326 = vmatprep.mubr.bf16.mxu0 %v8638_v35  ;;  %v3121_v1 = vshll.u32 %v2806_v0, 16 }
 0x336   : > { %v5671_v24 = vpop.f32.mrb[116].mxu1 }
 0x337   : > { %v5672_v51 = vpop.f32.mrb[117].mxu1  ;;  %v5783_v47 = vpop.f32.mrb[180].mxu0  ;;  %v3123_v26 = vrot.slane %v3121_v1, 1 }
 0x338   : > { %v5673_v41 = vadd.f32 %v5672_v51, %v5671_v24  ;;  %v5674_v22 = vpop.f32.mrb[118].mxu1  ;;  %v5784_v33 = vpop.f32.mrb[181].mxu0 }
 0x339   : > { %v5785_v40 = vadd.f32 %v5784_v33, %v5783_v47  ;;  %v5675_v23 = vpop.f32.mrb[119].mxu1  ;;  %v5786_v31 = vpop.f32.mrb[182].mxu0  ;;  %v3124_v29 = vsel %vm2807_vm9, %v3119_v28, %v3123_v26 }
 0x33a   : > { %v3758_v17 = vadd.f32 %v5673_v41, %v8725_v38  ;;  %v5676_v30 = vadd.f32 %v5675_v23, %v5674_v22  ;;  %v5787_v11 = vpop.f32.mrb[183].mxu0  ;;  %v3128_v22 = vrot.slane %v8663_v20, 1 }
 0x33b   : > { %v5788_v62 = vadd.f32 %v5787_v11, %v5786_v31  ;;  %4166 = vmatmul.mubr.bf16.gmra.mrb[224].mxu1 %v8618_v42 }
 0x33c   : > { %v8748_v43 = vadd.f32 %v5785_v40, %v3758_v17  ;;  %v3761_v49 = vadd.f32 %v5676_v30, %v8725_v38  ;;  %4173 = vmatprep.mubr.bf16.mxu1 %v8657_v19  ;;  %4327 = vmatmul.mubr.bf16.gmra.mrb[32].mxu0 %v8607_v3  ;;  %v3129_v17 = vrot.slane %v2806_v0, 1 }
 0x33d   : > { %4334 = vmatprep.mubr.bf16.mxu0 %v8654_v37 }
 0x33e   : > { %v8754_v45 = vadd.f32 %v5788_v62, %v3761_v49  ;;  %v5677_v27 = vpop.f32.mrb[120].mxu1  ;;  %v8771_v49 = vsel %vm3048_vm10, %v3128_v22, %v3129_v17 }
 0x33f   : > { %v5678_v34 = vpop.f32.mrb[121].mxu1  ;;  %v5789_v16 = vpop.f32.mrb[184].mxu0 }
 0x340   : > { %v5679_v42 = vadd.f32 %v5678_v34, %v5677_v27  ;;  %v5680_v63 = vpop.f32.mrb[122].mxu1  ;;  %v5790_v25 = vpop.f32.mrb[185].mxu0 }
 0x341   : > { %v5791_v2 = vadd.f32 %v5790_v25, %v5789_v16  ;;  %v5681_v46 = vpop.f32.mrb[123].mxu1  ;;  %v5792_v10 = vpop.f32.mrb[186].mxu0 }
 0x342   : > { %v3766_v3 = vadd.f32 %v5679_v42, %v8725_v38  ;;  %v5682_v8 = vadd.f32 %v5681_v46, %v5680_v63  ;;  %v5793_v7 = vpop.f32.mrb[187].mxu0 }
 0x343   : > { %v5794_v52 = vadd.f32 %v5793_v7, %v5792_v10  ;;  %4174 = vmatmul.mubr.bf16.gmra.mrb[228].mxu1 %v8638_v35 }
 0x344   : > { %v8759_v36 = vadd.f32 %v5791_v2, %v3766_v3  ;;  %v3769_v15 = vadd.f32 %v5682_v8, %v8725_v38  ;;  %4181 = vmatprep.mubr.bf16.mxu1 %v8669_v13  ;;  %4335 = vmatmul.mubr.bf16.gmra.mrb[36].mxu0 %v8627_v4 }
 0x345   : > { %4342 = vmatprep.mubr.bf16.mxu0 %v3124_v29 }
 0x346   : > { %v8765_v24 = vadd.f32 %v5794_v52, %v3769_v15  ;;  %v5683_v51 = vpop.f32.mrb[124].mxu1 }
 0x347   : > { %v5684_v47 = vpop.f32.mrb[125].mxu1  ;;  %v5795_v41 = vpop.f32.mrb[188].mxu0 }
 0x348   : > { %v5685_v33 = vadd.f32 %v5684_v47, %v5683_v51  ;;  %v5686_v35 = vpop.f32.mrb[126].mxu1  ;;  %v5796_v5 = vpop.f32.mrb[189].mxu0 }
 0x349   : > { %v5797_v40 = vadd.f32 %v5796_v5, %v5795_v41  ;;  %v5687_v23 = vpop.f32.mrb[127].mxu1  ;;  %v5798_v31 = vpop.f32.mrb[190].mxu0 }
 0x34a   : > { %v3774_v30 = vadd.f32 %v5685_v33, %v8725_v38  ;;  %v5688_v4 = vadd.f32 %v5687_v23, %v5686_v35  ;;  %v5799_v11 = vpop.f32.mrb[191].mxu0 }
 0x34b   : > { %v5800_v62 = vadd.f32 %v5799_v11, %v5798_v31  ;;  %4182 = vmatmul.mubr.bf16.gmra.mrb[232].mxu1 %v8654_v37  ;;  %v6621_v31 = vld [vmem:[%s9167_s5 + $0x10] sm:$0xff]  }
 0x34c   : > { %v8773_v60 = vadd.f32 %v5797_v40, %v3774_v30  ;;  %v3777_v27 = vadd.f32 %v5688_v4, %v8725_v38  ;;  %4189 = vmatprep.mubr.bf16.mxu1 %v8771_v49  ;;  %4343 = vmatmul.mubr.bf16.gmra.mrb[40].mxu0 %v8663_v20 }
 0x34d   : > { %4350 = vmatprep.mubr.bf16.mxu0 %v8103_v57 }
 0x34e   : > { %v8779_v0 = vadd.f32 %v5800_v62, %v3777_v27  ;;  %v5689_v9 = vpop.f32.mrb[128].mxu1 }
 0x34f   : > { %v5690_v1 = vpop.f32.mrb[129].mxu1  ;;  %v5801_v34 = vpop.f32.mrb[192].mxu0 }
 0x350   : > { %v5691_v16 = vadd.f32 %v5690_v1, %v5689_v9  ;;  %v5692_v37 = vpop.f32.mrb[130].mxu1  ;;  %v5802_v42 = vpop.f32.mrb[193].mxu0 }
 0x351   : > { %v5803_v63 = vadd.f32 %v5802_v42, %v5801_v34  ;;  %v5693_v25 = vpop.f32.mrb[131].mxu1  ;;  %v5804_v28 = vpop.f32.mrb[194].mxu0 }
 0x352   : > { %v3782_v2 = vadd.f32 %v5691_v16, %v8725_v38  ;;  %v5694_v46 = vadd.f32 %v5693_v25, %v5692_v37  ;;  %v5805_v10 = vpop.f32.mrb[195].mxu0 }
 0x353   : > { %v5806_v3 = vadd.f32 %v5805_v10, %v5804_v28  ;;  %4190 = vmatmul.mubr.bf16.gmra.mrb[236].mxu1 %v3124_v29  ;;  %v6620_v29 = vld [vmem:[%s9167_s5 + $0x8] sm:$0xff]   ;;  %v6623_v28 = vld [vmem:[%s9167_s5 + $0x20] sm:$0xff]  }
 0x354   : > { %v8782_v20 = vadd.f32 %v5803_v63, %v3782_v2  ;;  %v3785_v57 = vadd.f32 %v5694_v46, %v8725_v38  ;;  %6209 = vmatprep.mubr.bf16.mxu1 %v8366_v53  ;;  %4351 = vmatmul.mubr.bf16.gmra.mrb[44].mxu0 %v8081_v18 }
 0x356   : > { %v8787_v8 = vadd.f32 %v5806_v3, %v3785_v57  ;;  %v5695_v7 = vpop.f32.mrb[132].mxu1 }
 0x357   : > { %v5696_v26 = vpop.f32.mrb[133].mxu1  ;;  %v5807_v52 = vpop.f32.mrb[196].mxu0 }
 0x358   : > { %v5697_v15 = vadd.f32 %v5696_v26, %v5695_v7  ;;  %v5698_v51 = vpop.f32.mrb[134].mxu1  ;;  %v5808_v47 = vpop.f32.mrb[197].mxu0 }
 0x359   : > { %v5809_v41 = vadd.f32 %v5808_v47, %v5807_v52  ;;  %v5699_v22 = vpop.f32.mrb[135].mxu1  ;;  %v5810_v33 = vpop.f32.mrb[198].mxu0 }
 0x35a   : > { %v3790_v35 = vadd.f32 %v5697_v15, %v8725_v38  ;;  %v5700_v53 = vadd.f32 %v5699_v22, %v5698_v51  ;;  %v5811_v5 = vpop.f32.mrb[199].mxu0 }
 0x35b   : > { %v5812_v18 = vadd.f32 %v5811_v5, %v5810_v33  ;;  %6210 = vmatmul.mubr.bf16.vlgmr.msra.gmra.mrb[240].mxu1 %v8399_v14 }
 0x35c   : > { %v8794_v40 = vadd.f32 %v5809_v41, %v3790_v35  ;;  %v3793_v23 = vadd.f32 %v5700_v53, %v8725_v38  ;;  %6213 = vmatprep.mubr.bf16.mxu1 %v8432_v59  ;;  %6242 = vmatpush3.bf16.msra.mxu1 %v8694_v61  ;;  %v6622_v59 = vld [vmem:[%s9167_s5 + $0x18] sm:$0xff]   ;;  %v6625_v35 = vld [vmem:[%s9167_s5 + $0x30] sm:$0xff]  }
 0x35d   : > { %6243 = vmatprep.subr.bf16.mxu1 %v6620_v29 }
 0x35e   : > { %v8802_v17 = vadd.f32 %v5812_v18, %v3793_v23  ;;  %v5701_v30 = vpop.f32.mrb[136].mxu1 }
 0x35f   : > { %v5702_v4 = vpop.f32.mrb[137].mxu1  ;;  %v5813_v11 = vpop.f32.mrb[200].mxu0 }
 0x360   : > { %v5703_v62 = vadd.f32 %v5702_v4, %v5701_v30  ;;  %v5704_v14 = vpop.f32.mrb[138].mxu1  ;;  %v5814_v27 = vpop.f32.mrb[201].mxu0  ;;  %6244 = vmatpush3.bf16.msra.mxu1 %v6620_v29 }
 0x361   : > { %v5815_v9 = vadd.f32 %v5814_v27, %v5813_v11  ;;  %v5705_v1 = vpop.f32.mrb[139].mxu1  ;;  %v5816_v34 = vpop.f32.mrb[202].mxu0  ;;  %6245 = vmatprep.subr.bf16.mxu1 %v6621_v31 }
 0x362   : > { %v3798_v61 = vadd.f32 %v5703_v62, %v8725_v38  ;;  %v5706_v16 = vadd.f32 %v5705_v1, %v5704_v14  ;;  %v5817_v37 = vpop.f32.mrb[203].mxu0 }
 0x363   : > { %v5818_v42 = vadd.f32 %v5817_v37, %v5816_v34  ;;  %6214 = vmatmul.mubr.bf16.gmra.mrb[244].mxu1 %v8464_v56 }
 0x364   : > { %v8809_v63 = vadd.f32 %v5815_v9, %v3798_v61  ;;  %v3801_v25 = vadd.f32 %v5706_v16, %v8725_v38  ;;  %6217 = vmatprep.mubr.bf16.mxu1 %v8492_v44  ;;  %6246 = vmatpush3.bf16.msra.mxu1 %v6621_v31  ;;  %v6624_v44 = vld [vmem:[%s9167_s5 + $0x28] sm:$0xff]  }
 0x365   : > { %6247 = vmatprep.subr.bf16.mxu1 %v6622_v59 }
 0x366   : > { %v8816_v2 = vadd.f32 %v5818_v42, %v3801_v25  ;;  %v5707_v46 = vpop.f32.mrb[140].mxu1 }
 0x367   : > { %v5708_v10 = vpop.f32.mrb[141].mxu1  ;;  %v5819_v3 = vpop.f32.mrb[204].mxu0 }
 0x368   : > { %v5709_v57 = vadd.f32 %v5708_v10, %v5707_v46  ;;  %v5710_v7 = vpop.f32.mrb[142].mxu1  ;;  %v5820_v56 = vpop.f32.mrb[205].mxu0  ;;  %6248 = vmatpush3.bf16.msra.mxu1 %v6622_v59 }
 0x369   : > { %v5821_v26 = vadd.f32 %v5820_v56, %v5819_v3  ;;  %v5711_v52 = vpop.f32.mrb[143].mxu1  ;;  %v5822_v15 = vpop.f32.mrb[206].mxu0  ;;  %6249 = vmatprep.subr.bf16.mxu1 %v6623_v28 }
 0x36a   : > { %v3806_v51 = vadd.f32 %v5709_v57, %v8725_v38  ;;  %v5712_v47 = vadd.f32 %v5711_v52, %v5710_v7  ;;  %v5823_v41 = vpop.f32.mrb[207].mxu0 }
 0x36b   : > { %v5824_v22 = vadd.f32 %v5823_v41, %v5822_v15  ;;  %6218 = vmatmul.mubr.bf16.gmra.mrb[248].mxu1 %v8513_v39 }
 0x36c   : > { %v8823_v33 = vadd.f32 %v5821_v26, %v3806_v51  ;;  %v3809_v29 = vadd.f32 %v5712_v47, %v8725_v38  ;;  %6221 = vmatprep.mubr.bf16.mxu1 %v8534_v58  ;;  %6250 = vmatpush3.bf16.msra.mxu1 %v6623_v28  ;;  %v6626_v58 = vld [vmem:[%s9167_s5 + $0x38] sm:$0xff]  }
 0x36d   : > { %6251 = vmatprep.subr.bf16.mxu1 %v6624_v44 }
 0x36e   : > { %v8830_v53 = vadd.f32 %v5824_v22, %v3809_v29  ;;  %v5713_v5 = vpop.f32.mrb[144].mxu1 }
 0x36f   : > { %v5714_v18 = vpop.f32.mrb[145].mxu1  ;;  %v5825_v23 = vpop.f32.mrb[208].mxu0 }
 0x370   : > { %v5715_v31 = vadd.f32 %v5714_v18, %v5713_v5  ;;  %v5716_v30 = vpop.f32.mrb[146].mxu1  ;;  %v5826_v39 = vpop.f32.mrb[209].mxu0  ;;  %6252 = vmatpush3.bf16.msra.mxu1 %v6624_v44 }
 0x371   : > { %v5827_v4 = vadd.f32 %v5826_v39, %v5825_v23  ;;  %v5717_v11 = vpop.f32.mrb[147].mxu1  ;;  %v5828_v62 = vpop.f32.mrb[210].mxu0  ;;  %6253 = vmatprep.subr.bf16.mxu1 %v6625_v35 }
 0x372   : > { %v3814_v14 = vadd.f32 %v5715_v31, %v8725_v38  ;;  %v5718_v27 = vadd.f32 %v5717_v11, %v5716_v30  ;;  %v5829_v9 = vpop.f32.mrb[211].mxu0 }
 0x373   : > { %v5830_v1 = vadd.f32 %v5829_v9, %v5828_v62  ;;  %6222 = vmatmul.mubr.bf16.gmra.mrb[252].mxu1 %v8555_v6 }
 0x374   : > { %v8837_v34 = vadd.f32 %v5827_v4, %v3814_v14  ;;  %v3817_v59 = vadd.f32 %v5718_v27, %v8725_v38  ;;  %6225 = vmatprep.mubr.bf16.mxu1 %v8576_v55  ;;  %6254 = vmatpush3.bf16.msra.mxu1 %v6625_v35 }
 0x375   : > { %6255 = vmatprep.subr.bf16.mxu1 %v6626_v58 }
 0x376   : > { %v8841_v61 = vadd.f32 %v5830_v1, %v3817_v59  ;;  %v5719_v16 = vpop.f32.mrb[148].mxu1 }
 0x377   : > { %v5720_v37 = vpop.f32.mrb[149].mxu1  ;;  %v5831_v42 = vpop.f32.mrb[212].mxu0 }
 0x378   : > { %v5721_v25 = vadd.f32 %v5720_v37, %v5719_v16  ;;  %v5722_v28 = vpop.f32.mrb[150].mxu1  ;;  %v5832_v46 = vpop.f32.mrb[213].mxu0  ;;  %6256 = vmatpush3.bf16.msra.mxu1 %v6626_v58 }
 0x379   : > { %v5833_v10 = vadd.f32 %v5832_v46, %v5831_v42  ;;  %v5723_v3 = vpop.f32.mrb[151].mxu1  ;;  %v5834_v6 = vpop.f32.mrb[214].mxu0 }
 0x37a   : > { %v3822_v57 = vadd.f32 %v5721_v25, %v8725_v38  ;;  %v5724_v7 = vadd.f32 %v5723_v3, %v5722_v28  ;;  %v5835_v56 = vpop.f32.mrb[215].mxu0 }
 0x37b   : > { %v5836_v26 = vadd.f32 %v5835_v56, %v5834_v6  ;;  %6226 = vmatmul.mubr.bf16.gmra.mrb[0].mxu1 %v8601_v12 }
 0x37c   : > { %v8845_v55 = vadd.f32 %v5833_v10, %v3822_v57  ;;  %v3825_v52 = vadd.f32 %v5724_v7, %v8725_v38  ;;  %6229 = vmatprep.mubr.bf16.mxu1 %v8621_v32 }
 0x37e   : > { %v8849_v15 = vadd.f32 %v5836_v26, %v3825_v52  ;;  %v5725_v44 = vpop.f32.mrb[152].mxu1 }
 0x37f   : > { %v5726_v51 = vpop.f32.mrb[153].mxu1  ;;  %v5837_v47 = vpop.f32.mrb[216].mxu0 }
 0x380   : > { %v5727_v41 = vadd.f32 %v5726_v51, %v5725_v44  ;;  %v5728_v22 = vpop.f32.mrb[154].mxu1  ;;  %v5838_v29 = vpop.f32.mrb[217].mxu0 }
 0x381   : > { %v5839_v35 = vadd.f32 %v5838_v29, %v5837_v47  ;;  %v5729_v5 = vpop.f32.mrb[155].mxu1  ;;  %v5840_v18 = vpop.f32.mrb[218].mxu0  ;;  %v9279_v29 = vld [vmem:[#allocation8_spill] sm:$0xff] }
 0x382   : > { %v3830_v23 = vadd.f32 %v5727_v41, %v8725_v38  ;;  %v5730_v12 = vadd.f32 %v5729_v5, %v5728_v22  ;;  %v5841_v31 = vpop.f32.mrb[219].mxu0 }
 0x383   : > { %v5842_v30 = vadd.f32 %v5841_v31, %v5840_v18  ;;  %6230 = vmatmul.mubr.bf16.gmra.mrb[4].mxu1 %v8641_v21 }
 0x384   : > { %v8853_v39 = vadd.f32 %v5839_v35, %v3830_v23  ;;  %v3833_v32 = vadd.f32 %v5730_v12, %v8725_v38  ;;  %6233 = vmatprep.mubr.bf16.mxu1 %v8657_v19 }
 0x386   : > { %v8857_v4 = vadd.f32 %v5842_v30, %v3833_v32  ;;  %v5731_v11 = vpop.f32.mrb[156].mxu1 }
 0x387   : > { %v5732_v62 = vpop.f32.mrb[157].mxu1  ;;  %v5843_v58 = vpop.f32.mrb[220].mxu0 }
 0x388   : > { %v5733_v14 = vadd.f32 %v5732_v62, %v5731_v11  ;;  %v5734_v27 = vpop.f32.mrb[158].mxu1  ;;  %v5844_v9 = vpop.f32.mrb[221].mxu0 }
 0x389   : > { %v5845_v1 = vadd.f32 %v5844_v9, %v5843_v58  ;;  %v5735_v59 = vpop.f32.mrb[159].mxu1  ;;  %v5846_v16 = vpop.f32.mrb[222].mxu0  ;;  %v9280_v9 = vld [vmem:[#allocation9_spill] sm:$0xff] }
 0x38a   : > { %v3838_v37 = vadd.f32 %v5733_v14, %v8725_v38  ;;  %v5736_v21 = vadd.f32 %v5735_v59, %v5734_v27  ;;  %v5847_v42 = vpop.f32.mrb[223].mxu0 }
 0x38b   : > { %v5848_v25 = vadd.f32 %v5847_v42, %v5846_v16  ;;  %6234 = vmatmul.mubr.bf16.gmra.mrb[8].mxu1 %v8669_v13  ;;  %v9281_v16 = vld [vmem:[#allocation10_spill] sm:$0xff] }
 0x38c   : > { %v8861_v28 = vadd.f32 %v5845_v1, %v3838_v37  ;;  %v3841_v19 = vadd.f32 %v5736_v21, %v8725_v38  ;;  %6237 = vmatprep.mubr.bf16.mxu1 %v8771_v49 }
 0x38e   : > { %v8865_v46 = vadd.f32 %v5848_v25, %v3841_v19  ;;  %v5737_v10 = vpop.f32.mrb[160].mxu1 }
 0x38f   : > { %v5738_v3 = vpop.f32.mrb[161].mxu1  ;;  %v5849_v6 = vpop.f32.mrb[224].mxu0 }
 0x390   : > { %v5739_v57 = vadd.f32 %v5738_v3, %v5737_v10  ;;  %v5740_v7 = vpop.f32.mrb[162].mxu1  ;;  %v5850_v56 = vpop.f32.mrb[225].mxu0 }
 0x391   : > { %v5851_v26 = vadd.f32 %v5850_v56, %v5849_v6  ;;  %v5741_v52 = vpop.f32.mrb[163].mxu1  ;;  %v5852_v44 = vpop.f32.mrb[226].mxu0 }
 0x392   : > { %v3846_v51 = vadd.f32 %v5739_v57, %v8725_v38  ;;  %v5742_v13 = vadd.f32 %v5741_v52, %v5740_v7  ;;  %v5853_v47 = vpop.f32.mrb[227].mxu0 }
 0x393   : > { %v5854_v41 = vadd.f32 %v5853_v47, %v5852_v44  ;;  %6238 = vmatmul.mubr.bf16.gmra.mrb[12].mxu1 %v8283_v50 }
 0x394   : > { %v8869_v22 = vadd.f32 %v5851_v26, %v3846_v51  ;;  %v3849_v49 = vadd.f32 %v5742_v13, %v8725_v38  ;;  %6257 = vmatprep.mubr.bf16.mxu1 %v9279_v29  ;;  %v9282_v51 = vld [vmem:[#allocation11_spill] sm:$0xff] }
 0x396   : > { %v8873_v35 = vadd.f32 %v5854_v41, %v3849_v49  ;;  %v5743_v5 = vpop.f32.mrb[164].mxu1  ;;  %v9283_v41 = vld [vmem:[#allocation13_spill] sm:$0xff] }
 0x397   : > { %v5744_v18 = vpop.f32.mrb[165].mxu1  ;;  %v5855_v23 = vpop.f32.mrb[228].mxu0 }
 0x398   : > { %v5745_v12 = vadd.f32 %v5744_v18, %v5743_v5  ;;  %v5746_v31 = vpop.f32.mrb[166].mxu1  ;;  %v5856_v30 = vpop.f32.mrb[229].mxu0 }
 0x399   : > { %v5857_v32 = vadd.f32 %v5856_v30, %v5855_v23  ;;  %v5747_v11 = vpop.f32.mrb[167].mxu1  ;;  %v5858_v62 = vpop.f32.mrb[230].mxu0 }
 0x39a   : > { %v3854_v58 = vadd.f32 %v5745_v12, %v8725_v38  ;;  %v5748_v50 = vadd.f32 %v5747_v11, %v5746_v31  ;;  %v5859_v14 = vpop.f32.mrb[231].mxu0 }
 0x39b   : > { %v5860_v27 = vadd.f32 %v5859_v14, %v5858_v62  ;;  %6258 = vmatmul.mubr.bf16.vlgmr.msra.gmra.mrb[240].mxu1 %v9280_v9 }
 0x39c   : > { %v8877_v1 = vadd.f32 %v5857_v32, %v3854_v58  ;;  %v3857_v59 = vadd.f32 %v5748_v50, %v8725_v38  ;;  %6261 = vmatprep.mubr.bf16.mxu1 %v9281_v16  ;;  %v9285_v16 = vld [vmem:[#allocation20_spill] sm:$0xff] }
 0x39e   : > { %v8881_v37 = vadd.f32 %v5860_v27, %v3857_v59  ;;  %v5749_v21 = vpop.f32.mrb[168].mxu1  ;;  %v9284_v27 = vld [vmem:[#allocation16_spill] sm:$0xff] }
 0x39f   : > { %v5750_v42 = vpop.f32.mrb[169].mxu1  ;;  %v5861_v25 = vpop.f32.mrb[232].mxu0 }
 0x3a0   : > { %v5751_v19 = vadd.f32 %v5750_v42, %v5749_v21  ;;  %v5752_v10 = vpop.f32.mrb[170].mxu1  ;;  %v5862_v3 = vpop.f32.mrb[233].mxu0 }
 0x3a1   : > { %v5863_v6 = vadd.f32 %v5862_v3, %v5861_v25  ;;  %v5753_v57 = vpop.f32.mrb[171].mxu1  ;;  %v5864_v7 = vpop.f32.mrb[234].mxu0 }
 0x3a2   : > { %v3862_v56 = vadd.f32 %v5751_v19, %v8725_v38  ;;  %v5754_v26 = vadd.f32 %v5753_v57, %v5752_v10  ;;  %v5865_v52 = vpop.f32.mrb[235].mxu0 }
 0x3a3   : > { %v5866_v44 = vadd.f32 %v5865_v52, %v5864_v7  ;;  %6262 = vmatmul.mubr.bf16.gmra.mrb[244].mxu1 %v9282_v51 }
 0x3a4   : > { %v8885_v13 = vadd.f32 %v5863_v6, %v3862_v56  ;;  %v3865_v47 = vadd.f32 %v5754_v26, %v8725_v38  ;;  %6265 = vmatprep.mubr.bf16.mxu1 %v9283_v41  ;;  %v9287_v41 = vld [vmem:[#allocation23_spill] sm:$0xff] }
 0x3a6   : > { %v8889_v49 = vadd.f32 %v5866_v44, %v3865_v47  ;;  %v5755_v29 = vpop.f32.mrb[172].mxu1  ;;  %v9286_v47 = vld [vmem:[#allocation22_spill] sm:$0xff] }
 0x3a7   : > { %v5756_v5 = vpop.f32.mrb[173].mxu1  ;;  %v5867_v18 = vpop.f32.mrb[236].mxu0 }
 0x3a8   : > { %v5757_v23 = vadd.f32 %v5756_v5, %v5755_v29  ;;  %v5758_v12 = vpop.f32.mrb[174].mxu1  ;;  %v5868_v31 = vpop.f32.mrb[237].mxu0 }
 0x3a9   : > { %v5869_v30 = vadd.f32 %v5868_v31, %v5867_v18  ;;  %v5759_v32 = vpop.f32.mrb[175].mxu1  ;;  %v5870_v11 = vpop.f32.mrb[238].mxu0 }
 0x3aa   : > { %v3870_v62 = vadd.f32 %v5757_v23, %v8725_v38  ;;  %v5760_v58 = vadd.f32 %v5759_v32, %v5758_v12  ;;  %v5871_v50 = vpop.f32.mrb[239].mxu0 }
 0x3ab   : > { %v5872_v14 = vadd.f32 %v5871_v50, %v5870_v11  ;;  %6266 = vmatmul.mubr.bf16.gmra.mrb[248].mxu1 %v9284_v27  ;;  %v9288_v27 = vld [vmem:[#allocation26_spill] sm:$0xff] }
 0x3ac   : > { %v8893_v9 = vadd.f32 %v5869_v30, %v3870_v62  ;;  %v3873_v59 = vadd.f32 %v5760_v58, %v8725_v38  ;;  %6269 = vmatprep.mubr.bf16.mxu1 %v9285_v16  ;;  %v9289_v16 = vld [vmem:[#allocation28_spill] sm:$0xff] }
 0x3ae   : > { %v8897_v21 = vadd.f32 %v5872_v14, %v3873_v59  ;;  %v5889_v42 = vpop.f32.mrb[176].mxu1 }
 0x3af   : > { %v5890_v25 = vpop.f32.mrb[177].mxu1  ;;  %v6001_v19 = vpop.f32.mrb[240].mxu0 }
 0x3b0   : > { %v5891_v10 = vadd.f32 %v5890_v25, %v5889_v42  ;;  %v5892_v3 = vpop.f32.mrb[178].mxu1  ;;  %v6002_v6 = vpop.f32.mrb[241].mxu0 }
 0x3b1   : > { %v6003_v57 = vadd.f32 %v6002_v6, %v6001_v19  ;;  %v5893_v7 = vpop.f32.mrb[179].mxu1  ;;  %v6004_v56 = vpop.f32.mrb[242].mxu0 }
 0x3b2   : > { %v4072_v26 = vadd.f32 %v5891_v10, %v8734_v54  ;;  %v5894_v52 = vadd.f32 %v5893_v7, %v5892_v3  ;;  %v6005_v44 = vpop.f32.mrb[243].mxu0 }
 0x3b3   : > { %v6006_v51 = vadd.f32 %v6005_v44, %v6004_v56  ;;  %6270 = vmatmul.mubr.bf16.gmra.mrb[252].mxu1 %v9286_v47  ;;  %v9290_v47 = vld [vmem:[#allocation29_spill] sm:$0xff] }
 0x3b4   : > { %v4075_v38 = vadd.f32 %v5894_v52, %v8737_v48  ;;  %6273 = vmatprep.mubr.bf16.mxu1 %v9287_v41  ;;  %v8903_v29 = vadd.f32 %v6003_v57, %v4072_v26 }
 0x3b6   : > { %v8905_v5 = vadd.f32 %v6006_v51, %v4075_v38  ;;  %v5895_v18 = vpop.f32.mrb[180].mxu1 }
 0x3b7   : > { %v5896_v23 = vpop.f32.mrb[181].mxu1  ;;  %v6007_v12 = vpop.f32.mrb[244].mxu0 }
 0x3b8   : > { %v5897_v31 = vadd.f32 %v5896_v23, %v5895_v18  ;;  %v5898_v30 = vpop.f32.mrb[182].mxu1  ;;  %v6008_v32 = vpop.f32.mrb[245].mxu0  ;;  %v9291_v18 = vld [vmem:[#allocation30_spill] sm:$0xff] }
 0x3b9   : > { %v6009_v54 = vadd.f32 %v6008_v32, %v6007_v12  ;;  %v5899_v11 = vpop.f32.mrb[183].mxu1  ;;  %v6010_v62 = vpop.f32.mrb[246].mxu0 }
 0x3ba   : > { %v4080_v58 = vadd.f32 %v5897_v31, %v8748_v43  ;;  %v5900_v50 = vadd.f32 %v5899_v11, %v5898_v30  ;;  %v6011_v14 = vpop.f32.mrb[247].mxu0 }
 0x3bb   : > { %v6012_v48 = vadd.f32 %v6011_v14, %v6010_v62  ;;  %6274 = vmatmul.mubr.bf16.gmra.mrb[0].mxu1 %v9288_v27 }
 0x3bc   : > { %v4083_v59 = vadd.f32 %v5900_v50, %v8754_v45  ;;  %6277 = vmatprep.mubr.bf16.mxu1 %v9289_v16  ;;  %v8911_v42 = vadd.f32 %v6009_v54, %v4080_v58 }
 0x3be   : > { %v8913_v25 = vadd.f32 %v6012_v48, %v4083_v59  ;;  %v5901_v19 = vpop.f32.mrb[184].mxu1  ;;  %v9292_v59 = vld [vmem:[#allocation31_spill] sm:$0xff] }
 0x3bf   : > { %v5902_v10 = vpop.f32.mrb[185].mxu1  ;;  %v6013_v3 = vpop.f32.mrb[248].mxu0 }
 0x3c0   : > { %v5903_v6 = vadd.f32 %v5902_v10, %v5901_v19  ;;  %v5904_v57 = vpop.f32.mrb[186].mxu1  ;;  %v6014_v7 = vpop.f32.mrb[249].mxu0  ;;  %v9293_v19 = vld [vmem:[#allocation32_spill] sm:$0xff] }
 0x3c1   : > { %v6015_v43 = vadd.f32 %v6014_v7, %v6013_v3  ;;  %v5905_v56 = vpop.f32.mrb[187].mxu1  ;;  %v6016_v26 = vpop.f32.mrb[250].mxu0 }
 0x3c2   : > { %v4088_v52 = vadd.f32 %v5903_v6, %v8759_v36  ;;  %v5906_v44 = vadd.f32 %v5905_v56, %v5904_v57  ;;  %v6017_v51 = vpop.f32.mrb[251].mxu0 }
 0x3c3   : > { %v6018_v45 = vadd.f32 %v6017_v51, %v6016_v26  ;;  %6278 = vmatmul.mubr.bf16.gmra.mrb[4].mxu1 %v9290_v47 }
 0x3c4   : > { %v8917_v38 = vadd.f32 %v6015_v43, %v4088_v52  ;;  %v4091_v41 = vadd.f32 %v5906_v44, %v8765_v24  ;;  %6281 = vmatprep.mubr.bf16.mxu1 %v9291_v18 }
 0x3c6   : > { %v8921_v23 = vadd.f32 %v6018_v45, %v4091_v41  ;;  %v5907_v12 = vpop.f32.mrb[188].mxu1  ;;  %v9294_v41 = vld [vmem:[#allocation17_spill] sm:$0xff] }
 0x3c7   : > { %v5908_v31 = vpop.f32.mrb[189].mxu1  ;;  %v6019_v30 = vpop.f32.mrb[252].mxu0 }
 0x3c8   : > { %v5909_v32 = vadd.f32 %v5908_v31, %v5907_v12  ;;  %v5910_v54 = vpop.f32.mrb[190].mxu1  ;;  %v6020_v11 = vpop.f32.mrb[253].mxu0 }
 0x3c9   : > { %v6021_v36 = vadd.f32 %v6020_v11, %v6019_v30  ;;  %v5911_v62 = vpop.f32.mrb[191].mxu1  ;;  %v6022_v58 = vpop.f32.mrb[254].mxu0 }
 0x3ca   : > { %v4096_v50 = vadd.f32 %v5909_v32, %v8773_v60  ;;  %v5912_v14 = vadd.f32 %v5911_v62, %v5910_v54  ;;  %v6023_v48 = vpop.f32.mrb[255].mxu0 }
 0x3cb   : > { %v6024_v27 = vadd.f32 %v6023_v48, %v6022_v58  ;;  %6282 = vmatmul.mubr.bf16.gmra.mrb[8].mxu1 %v9292_v59 }
 0x3cc   : > { %v8925_v24 = vadd.f32 %v6021_v36, %v4096_v50  ;;  %v4099_v16 = vadd.f32 %v5912_v14, %v8779_v0  ;;  %6285 = vmatprep.mubr.bf16.mxu1 %v9293_v19 }
 0x3ce   : > { %v8929_v10 = vadd.f32 %v6024_v27, %v4099_v16  ;;  %v5913_v3 = vpop.f32.mrb[192].mxu1 }
 0x3cf   : > { %v5914_v6 = vpop.f32.mrb[193].mxu1  ;;  %v6025_v57 = vpop.f32.mrb[0].mxu0 }
 0x3d0   : > { %v5915_v7 = vadd.f32 %v5914_v6, %v5913_v3  ;;  %v5916_v43 = vpop.f32.mrb[194].mxu1  ;;  %v6026_v56 = vpop.f32.mrb[1].mxu0 }
 0x3d1   : > { %v6027_v60 = vadd.f32 %v6026_v56, %v6025_v57  ;;  %v5917_v26 = vpop.f32.mrb[195].mxu1  ;;  %v6028_v52 = vpop.f32.mrb[2].mxu0 }
 0x3d2   : > { %v4104_v44 = vadd.f32 %v5915_v7, %v8782_v20  ;;  %v5918_v51 = vadd.f32 %v5917_v26, %v5916_v43  ;;  %v6029_v45 = vpop.f32.mrb[3].mxu0 }
 0x3d3   : > { %v6030_v47 = vadd.f32 %v6029_v45, %v6028_v52  ;;  %6286 = vmatmul.mubr.bf16.gmra.mrb[12].mxu1 %v9294_v41 }
 0x3d4   : > { %v8933_v0 = vadd.f32 %v6027_v60, %v4104_v44  ;;  %v4107_v18 = vadd.f32 %v5918_v51, %v8787_v8 }
 0x3d6   : > { %v8936_v12 = vadd.f32 %v6030_v47, %v4107_v18  ;;  %v5919_v31 = vpop.f32.mrb[196].mxu1 }
 0x3d7   : > { %v5920_v30 = vpop.f32.mrb[197].mxu1  ;;  %v6031_v32 = vpop.f32.mrb[4].mxu0 }
 0x3d8   : > { %v5921_v54 = vadd.f32 %v5920_v30, %v5919_v31  ;;  %v5922_v11 = vpop.f32.mrb[198].mxu1  ;;  %v6032_v36 = vpop.f32.mrb[5].mxu0 }
 0x3d9   : > { %v6033_v62 = vadd.f32 %v6032_v36, %v6031_v32  ;;  %v5923_v58 = vpop.f32.mrb[199].mxu1  ;;  %v6034_v20 = vpop.f32.mrb[6].mxu0 }
 0x3da   : > { %v4112_v50 = vadd.f32 %v5921_v54, %v8794_v40  ;;  %v5924_v14 = vadd.f32 %v5923_v58, %v5922_v11  ;;  %v6035_v48 = vpop.f32.mrb[7].mxu0 }
 0x3db   : > { %v6036_v27 = vadd.f32 %v6035_v48, %v6034_v20 }
 0x3dc   : > { %v8939_v59 = vadd.f32 %v6033_v62, %v4112_v50  ;;  %v4115_v8 = vadd.f32 %v5924_v14, %v8802_v17 }
 0x3de   : > { %v8942_v16 = vadd.f32 %v6036_v27, %v4115_v8  ;;  %v5925_v19 = vpop.f32.mrb[200].mxu1 }
 0x3df   : > { %v5926_v3 = vpop.f32.mrb[201].mxu1  ;;  %v6037_v6 = vpop.f32.mrb[8].mxu0 }
 0x3e0   : > { %v5927_v57 = vadd.f32 %v5926_v3, %v5925_v19  ;;  %v5928_v7 = vpop.f32.mrb[202].mxu1  ;;  %v6038_v43 = vpop.f32.mrb[9].mxu0 }
 0x3e1   : > { %v6039_v56 = vadd.f32 %v6038_v43, %v6037_v6  ;;  %v5929_v60 = vpop.f32.mrb[203].mxu1  ;;  %v6040_v26 = vpop.f32.mrb[10].mxu0 }
 0x3e2   : > { %v4120_v40 = vadd.f32 %v5927_v57, %v8809_v63  ;;  %v5930_v52 = vadd.f32 %v5929_v60, %v5928_v7  ;;  %v6041_v44 = vpop.f32.mrb[11].mxu0 }
 0x3e3   : > { %v6042_v51 = vadd.f32 %v6041_v44, %v6040_v26 }
 0x3e4   : > { %v8945_v45 = vadd.f32 %v6039_v56, %v4120_v40  ;;  %v4123_v17 = vadd.f32 %v5930_v52, %v8816_v2 }
 0x3e6   : > { %v8948_v47 = vadd.f32 %v6042_v51, %v4123_v17  ;;  %v5931_v41 = vpop.f32.mrb[204].mxu1 }
 0x3e7   : > { %v5932_v18 = vpop.f32.mrb[205].mxu1  ;;  %v6043_v31 = vpop.f32.mrb[12].mxu0 }
 0x3e8   : > { %v5933_v30 = vadd.f32 %v5932_v18, %v5931_v41  ;;  %v5934_v32 = vpop.f32.mrb[206].mxu1  ;;  %v6044_v54 = vpop.f32.mrb[13].mxu0 }
 0x3e9   : > { %v6045_v11 = vadd.f32 %v6044_v54, %v6043_v31  ;;  %v5935_v36 = vpop.f32.mrb[207].mxu1  ;;  %v6046_v62 = vpop.f32.mrb[14].mxu0 }
 0x3ea   : > { %v4128_v63 = vadd.f32 %v5933_v30, %v8823_v33  ;;  %v5936_v58 = vadd.f32 %v5935_v36, %v5934_v32  ;;  %v6047_v20 = vpop.f32.mrb[15].mxu0 }
 0x3eb   : > { %v6048_v50 = vadd.f32 %v6047_v20, %v6046_v62 }
 0x3ec   : > { %v8951_v14 = vadd.f32 %v6045_v11, %v4128_v63  ;;  %v4131_v2 = vadd.f32 %v5936_v58, %v8830_v53 }
 0x3ee   : > { %v8954_v48 = vadd.f32 %v6048_v50, %v4131_v2  ;;  %v5937_v27 = vpop.f32.mrb[208].mxu1 }
 0x3ef   : > { %v5938_v8 = vpop.f32.mrb[209].mxu1  ;;  %v6049_v19 = vpop.f32.mrb[16].mxu0 }
 0x3f0   : > { %v5939_v3 = vadd.f32 %v5938_v8, %v5937_v27  ;;  %v5940_v6 = vpop.f32.mrb[210].mxu1  ;;  %v6050_v57 = vpop.f32.mrb[17].mxu0 }
 0x3f1   : > { %v6051_v7 = vadd.f32 %v6050_v57, %v6049_v19  ;;  %v5941_v43 = vpop.f32.mrb[211].mxu1  ;;  %v6052_v56 = vpop.f32.mrb[18].mxu0 }
 0x3f2   : > { %v4136_v33 = vadd.f32 %v5939_v3, %v8837_v34  ;;  %v5942_v60 = vadd.f32 %v5941_v43, %v5940_v6  ;;  %v6053_v26 = vpop.f32.mrb[19].mxu0 }
 0x3f3   : > { %v6054_v40 = vadd.f32 %v6053_v26, %v6052_v56 }
 0x3f4   : > { %v8957_v52 = vadd.f32 %v6051_v7, %v4136_v33  ;;  %v4139_v53 = vadd.f32 %v5942_v60, %v8841_v61 }
 0x3f6   : > { %v8960_v44 = vadd.f32 %v6054_v40, %v4139_v53  ;;  %v5943_v51 = vpop.f32.mrb[212].mxu1 }
 0x3f7   : > { %v5944_v17 = vpop.f32.mrb[213].mxu1  ;;  %v6055_v41 = vpop.f32.mrb[20].mxu0 }
 0x3f8   : > { %v5945_v18 = vadd.f32 %v5944_v17, %v5943_v51  ;;  %v5946_v31 = vpop.f32.mrb[214].mxu1  ;;  %v6056_v30 = vpop.f32.mrb[21].mxu0 }
 0x3f9   : > { %v6057_v32 = vadd.f32 %v6056_v30, %v6055_v41  ;;  %v5947_v54 = vpop.f32.mrb[215].mxu1  ;;  %v6058_v11 = vpop.f32.mrb[22].mxu0 }
 0x3fa   : > { %v4144_v34 = vadd.f32 %v5945_v18, %v8845_v55  ;;  %v5948_v36 = vadd.f32 %v5947_v54, %v5946_v31  ;;  %v6059_v62 = vpop.f32.mrb[23].mxu0 }
 0x3fb   : > { %v6060_v63 = vadd.f32 %v6059_v62, %v6058_v11 }
 0x3fc   : > { %v8963_v58 = vadd.f32 %v6057_v32, %v4144_v34  ;;  %v4147_v61 = vadd.f32 %v5948_v36, %v8849_v15 }
 0x3fe   : > { %v8966_v20 = vadd.f32 %v6060_v63, %v4147_v61  ;;  %v5949_v50 = vpop.f32.mrb[216].mxu1 }
 0x3ff   : > { %v5950_v2 = vpop.f32.mrb[217].mxu1  ;;  %v6061_v27 = vpop.f32.mrb[24].mxu0 }
 0x400   : > { %v5951_v8 = vadd.f32 %v5950_v2, %v5949_v50  ;;  %v5952_v19 = vpop.f32.mrb[218].mxu1  ;;  %v6062_v3 = vpop.f32.mrb[25].mxu0 }
 0x401   : > { %v6063_v6 = vadd.f32 %v6062_v3, %v6061_v27  ;;  %v5953_v57 = vpop.f32.mrb[219].mxu1  ;;  %v6064_v7 = vpop.f32.mrb[26].mxu0 }
 0x402   : > { %v4152_v55 = vadd.f32 %v5951_v8, %v8853_v39  ;;  %v5954_v43 = vadd.f32 %v5953_v57, %v5952_v19  ;;  %v6065_v56 = vpop.f32.mrb[27].mxu0 }
 0x403   : > { %v6066_v33 = vadd.f32 %v6065_v56, %v6064_v7 }
 0x404   : > { %v8969_v60 = vadd.f32 %v6063_v6, %v4152_v55  ;;  %v4155_v15 = vadd.f32 %v5954_v43, %v8857_v4 }
 0x406   : > { %v8972_v26 = vadd.f32 %v6066_v33, %v4155_v15  ;;  %v5955_v40 = vpop.f32.mrb[220].mxu1 }
 0x407   : > { %v5956_v53 = vpop.f32.mrb[221].mxu1  ;;  %v6067_v51 = vpop.f32.mrb[28].mxu0 }
 0x408   : > { %v5957_v17 = vadd.f32 %v5956_v53, %v5955_v40  ;;  %v5958_v41 = vpop.f32.mrb[222].mxu1  ;;  %v6068_v18 = vpop.f32.mrb[29].mxu0 }
 0x409   : > { %v6069_v31 = vadd.f32 %v6068_v18, %v6067_v51  ;;  %v5959_v30 = vpop.f32.mrb[223].mxu1  ;;  %v6070_v32 = vpop.f32.mrb[30].mxu0 }
 0x40a   : > { %v4160_v39 = vadd.f32 %v5957_v17, %v8861_v28  ;;  %v5960_v54 = vadd.f32 %v5959_v30, %v5958_v41  ;;  %v6071_v11 = vpop.f32.mrb[31].mxu0 }
 0x40b   : > { %v6072_v34 = vadd.f32 %v6071_v11, %v6070_v32 }
 0x40c   : > { %v8975_v36 = vadd.f32 %v6069_v31, %v4160_v39  ;;  %v4163_v4 = vadd.f32 %v5960_v54, %v8865_v46 }
 0x40e   : > { %v8978_v62 = vadd.f32 %v6072_v34, %v4163_v4  ;;  %v5961_v63 = vpop.f32.mrb[224].mxu1 }
 0x40f   : > { %v5962_v61 = vpop.f32.mrb[225].mxu1  ;;  %v6073_v50 = vpop.f32.mrb[32].mxu0 }
 0x410   : > { %v5963_v2 = vadd.f32 %v5962_v61, %v5961_v63  ;;  %v5964_v27 = vpop.f32.mrb[226].mxu1  ;;  %v6074_v8 = vpop.f32.mrb[33].mxu0 }
 0x411   : > { %v6075_v19 = vadd.f32 %v6074_v8, %v6073_v50  ;;  %v5965_v3 = vpop.f32.mrb[227].mxu1  ;;  %v6076_v6 = vpop.f32.mrb[34].mxu0 }
 0x412   : > { %v4168_v28 = vadd.f32 %v5963_v2, %v8869_v22  ;;  %v5966_v57 = vadd.f32 %v5965_v3, %v5964_v27  ;;  %v6077_v7 = vpop.f32.mrb[35].mxu0 }
 0x413   : > { %v6078_v55 = vadd.f32 %v6077_v7, %v6076_v6 }
 0x414   : > { %v8981_v43 = vadd.f32 %v6075_v19, %v4168_v28  ;;  %v4171_v46 = vadd.f32 %v5966_v57, %v8873_v35 }
 0x416   : > { %v8984_v56 = vadd.f32 %v6078_v55, %v4171_v46  ;;  %v5967_v33 = vpop.f32.mrb[228].mxu1 }
 0x417   : > { %v5968_v15 = vpop.f32.mrb[229].mxu1  ;;  %v6079_v40 = vpop.f32.mrb[36].mxu0 }
 0x418   : > { %v5969_v53 = vadd.f32 %v5968_v15, %v5967_v33  ;;  %v5970_v51 = vpop.f32.mrb[230].mxu1  ;;  %v6080_v17 = vpop.f32.mrb[37].mxu0 }
 0x419   : > { %v6081_v41 = vadd.f32 %v6080_v17, %v6079_v40  ;;  %v5971_v18 = vpop.f32.mrb[231].mxu1  ;;  %v6082_v31 = vpop.f32.mrb[38].mxu0 }
 0x41a   : > { %v4176_v22 = vadd.f32 %v5969_v53, %v8877_v1  ;;  %v5972_v30 = vadd.f32 %v5971_v18, %v5970_v51  ;;  %v6083_v32 = vpop.f32.mrb[39].mxu0 }
 0x41b   : > { %v6084_v39 = vadd.f32 %v6083_v32, %v6082_v31 }
 0x41c   : > { %v8987_v54 = vadd.f32 %v6081_v41, %v4176_v22  ;;  %v4179_v35 = vadd.f32 %v5972_v30, %v8881_v37 }
 0x41e   : > { %v8990_v11 = vadd.f32 %v6084_v39, %v4179_v35  ;;  %v5973_v34 = vpop.f32.mrb[232].mxu1  ;;  %v9008_v39 = vld [vmem:[%s9168_s6] ss:$0 sm:$0xff] }
 0x41f   : > { %v5974_v4 = vpop.f32.mrb[233].mxu1  ;;  %v6085_v63 = vpop.f32.mrb[40].mxu0 }
 0x420   : > { %v5975_v61 = vadd.f32 %v5974_v4, %v5973_v34  ;;  %v5976_v50 = vpop.f32.mrb[234].mxu1  ;;  %v6086_v2 = vpop.f32.mrb[41].mxu0  ;;  %v6309_v4 = vadd.f32 %v9008_v39, %v8913_v25  ;;  %v6315_v25 = vadd.f32 %v9008_v39, %v8917_v38 }
 0x421   : > { %v6087_v27 = vadd.f32 %v6086_v2, %v6085_v63  ;;  %v5977_v8 = vpop.f32.mrb[235].mxu1  ;;  %v6088_v19 = vpop.f32.mrb[42].mxu0 }
 0x422   : > { %v4184_v1 = vadd.f32 %v5975_v61, %v8885_v13  ;;  %v5978_v3 = vadd.f32 %v5977_v8, %v5976_v50  ;;  %v6089_v6 = vpop.f32.mrb[43].mxu0  ;;  %v6311_v61 = vadd.f32 %v9008_v39, %v8905_v5 }
 0x423   : > { %v6090_v28 = vadd.f32 %v6089_v6, %v6088_v19 }
 0x424   : > { %v8993_v57 = vadd.f32 %v6087_v27, %v4184_v1  ;;  %v4187_v37 = vadd.f32 %v5978_v3, %v8889_v49 }
 0x426   : > { %v8996_v7 = vadd.f32 %v6090_v28, %v4187_v37  ;;  %v5979_v55 = vpop.f32.mrb[236].mxu1 }
 0x427   : > { %v5980_v46 = vpop.f32.mrb[237].mxu1  ;;  %v6091_v33 = vpop.f32.mrb[44].mxu0 }
 0x428   : > { %v5981_v15 = vadd.f32 %v5980_v46, %v5979_v55  ;;  %v5982_v40 = vpop.f32.mrb[238].mxu1  ;;  %v6092_v53 = vpop.f32.mrb[45].mxu0  ;;  %v6317_v55 = vadd.f32 %v9008_v39, %v8929_v10 }
 0x429   : > { %v5983_v51 = vpop.f32.mrb[239].mxu1  ;;  %v6093_v17 = vadd.f32 %v6092_v53, %v6091_v33  ;;  %v6094_v13 = vpop.f32.mrb[46].mxu0 }
 0x42a   : > { %v4192_v41 = vadd.f32 %v5981_v15, %v8893_v9  ;;  %v5984_v18 = vadd.f32 %v5983_v51, %v5982_v40  ;;  %v6095_v31 = vpop.f32.mrb[47].mxu0 }
 0x42b   : > { %v6096_v22 = vadd.f32 %v6095_v31, %v6094_v13 }
 0x42c   : > { %v4195_v49 = vadd.f32 %v5984_v18, %v8897_v21  ;;  %v9000_v30 = vadd.f32 %v6093_v17, %v4192_v41  ;;  %v6321_v41 = vadd.f32 %v9008_v39, %v8939_v59 }
 0x42e   : > { %v9002_v32 = vadd.f32 %v6096_v22, %v4195_v49  ;;  %v6325_v22 = vadd.f32 %v9008_v39, %v8942_v16 }
 0x46e   : > { %v6259_v35 = vpop.f32.mrb[240].mxu1 }
 0x46f   : > { %v6305_v9 = vadd.f32 %v6259_v35, %v8911_v42  ;;  %v4625_v34 = vpop.f32.mrb[241].mxu1 }
 0x470   : > { %v6307_v21 = vadd.f32 %v4625_v34, %v8903_v29  ;;  %v6260_v63 = vpop.f32.mrb[242].mxu1  ;;  %v6313_v29 = vadd.f32 %v9008_v39, %v8925_v24  ;;  %v6319_v24 = vadd.f32 %v9008_v39, %v8921_v23  ;;  %v6323_v23 = vadd.f32 %v9008_v39, %v8933_v0 }
 0x471   : > { %v6306_v50 = vadd.f32 %v6305_v9, %v9008_v39  ;;  %v6310_v2 = vadd.f32 %v6309_v4, %v6260_v63  ;;  %v4628_v27 = vpop.f32.mrb[243].mxu1  ;;  %v6327_v9 = vadd.f32 %v9008_v39, %v8936_v12  ;;  %v6331_v12 = vadd.f32 %v9008_v39, %v8945_v45 }
 0x472   : > { %v6308_v8 = vadd.f32 %v6307_v21, %v9008_v39  ;;  %v6312_v19 = vadd.f32 %v6311_v61, %v4628_v27 }
 0x473   : > { %v4786_v1 = vmax.f32 %v6306_v50, 0.0  ;;  %v4787_v3 = vmax.f32 %v6310_v2, 0.0  ;;  %v6329_v50 = vadd.f32 %v9008_v39, %v8951_v14 }
 0x474   : > { %v4784_v42 = vmax.f32 %v6308_v8, 0.0  ;;  %v4785_v6 = vmax.f32 %v6312_v19, 0.0  ;;  %v6333_v8 = vadd.f32 %v9008_v39, %v8954_v48 }
 0x475   : > { %4818 = vst [vmem:[%s9020_s18 + $0x10] sm:$0xff] %v4786_v1  ;;  %4819 = vst [vmem:[%s9020_s18 + $0x18] sm:$0xff] %v4787_v3  ;;  %v6335_v3 = vadd.f32 %v9008_v39, %v8948_v47  ;;  %v6339_v47 = vadd.f32 %v9008_v39, %v8957_v52 }
 0x476   : > { %4816 = vst [vmem:[%s9020_s18] sm:$0xff] %v4784_v42  ;;  %4817 = vst [vmem:[%s9020_s18 + $0x8] sm:$0xff] %v4785_v6  ;;  %v6263_v5 = vpop.f32.mrb[244].mxu1 }
 0x477   : > { %v6314_v28 = vadd.f32 %v6313_v29, %v6263_v5  ;;  %v4641_v37 = vpop.f32.mrb[245].mxu1 }
 0x478   : > { %v6316_v46 = vadd.f32 %v6315_v25, %v4641_v37  ;;  %v6264_v33 = vpop.f32.mrb[246].mxu1 }
 0x479   : > { %v4790_v15 = vmax.f32 %v6314_v28, 0.0  ;;  %v6318_v40 = vadd.f32 %v6317_v55, %v6264_v33  ;;  %v4644_v53 = vpop.f32.mrb[247].mxu1  ;;  %v6337_v28 = vadd.f32 %v9008_v39, %v8963_v58 }
 0x47a   : > { %v4788_v51 = vmax.f32 %v6316_v46, 0.0  ;;  %v6320_v17 = vadd.f32 %v6319_v24, %v4644_v53  ;;  %v6341_v46 = vadd.f32 %v9008_v39, %v8966_v20 }
 0x47b   : > { %4822 = vst [vmem:[%s9020_s18 + $0x30] sm:$0xff] %v4790_v15  ;;  %v4791_v13 = vmax.f32 %v6318_v40, 0.0  ;;  %v6343_v15 = vadd.f32 %v9008_v39, %v8960_v44  ;;  %v6347_v44 = vadd.f32 %v9008_v39, %v8969_v60 }
 0x47c   : > { %4820 = vst [vmem:[%s9020_s18 + $0x20] sm:$0xff] %v4788_v51  ;;  %v4789_v38 = vmax.f32 %v6320_v17, 0.0 }
 0x47d   : > { %4823 = vst [vmem:[%s9020_s18 + $0x38] sm:$0xff] %v4791_v13 }
 0x47e   : > { %4821 = vst [vmem:[%s9020_s18 + $0x28] sm:$0xff] %v4789_v38  ;;  %v6267_v10 = vpop.f32.mrb[248].mxu1  ;;  %v6345_v38 = vadd.f32 %v9008_v39, %v8975_v36 }
 0x47f   : > { %v6322_v18 = vadd.f32 %v6321_v41, %v6267_v10  ;;  %v4657_v31 = vpop.f32.mrb[249].mxu1 }
 0x480   : > { %v6324_v49 = vadd.f32 %v6323_v23, %v4657_v31  ;;  %v6268_v35 = vpop.f32.mrb[250].mxu1  ;;  %v6349_v23 = vadd.f32 %v9008_v39, %v8978_v62 }
 0x481   : > { %v4794_v34 = vmax.f32 %v6322_v18, 0.0  ;;  %v6326_v59 = vadd.f32 %v6325_v22, %v6268_v35  ;;  %v4660_v4 = vpop.f32.mrb[251].mxu1  ;;  %v6351_v22 = vadd.f32 %v9008_v39, %v8972_v26  ;;  %v6355_v26 = vadd.f32 %v9008_v39, %v8981_v43 }
 0x482   : > { %v4792_v21 = vmax.f32 %v6324_v49, 0.0  ;;  %v6328_v63 = vadd.f32 %v6327_v9, %v4660_v4  ;;  %v6353_v4 = vadd.f32 %v9008_v39, %v8987_v54 }
 0x483   : > { %4826 = vst [vmem:[%s9020_s18 + $0x50] sm:$0xff] %v4794_v34  ;;  %v4795_v61 = vmax.f32 %v6326_v59, 0.0 }
 0x484   : > { %4824 = vst [vmem:[%s9020_s18 + $0x40] sm:$0xff] %v4792_v21  ;;  %v4793_v0 = vmax.f32 %v6328_v63, 0.0 }
 0x485   : > { %4827 = vst [vmem:[%s9020_s18 + $0x58] sm:$0xff] %v4795_v61  ;;  %v6357_v61 = vadd.f32 %v9008_v39, %v8990_v11  ;;  %v6361_v11 = vadd.f32 %v9008_v39, %v9000_v30 }
 0x486   : > { %4825 = vst [vmem:[%s9020_s18 + $0x48] sm:$0xff] %v4793_v0  ;;  %v6271_v16 = vpop.f32.mrb[252].mxu1 }
 0x487   : > { %v6330_v2 = vadd.f32 %v6329_v50, %v6271_v16  ;;  %v4673_v27 = vpop.f32.mrb[253].mxu1  ;;  %v6359_v16 = vadd.f32 %v9008_v39, %v8984_v56  ;;  %v6363_v56 = vadd.f32 %v9008_v39, %v8993_v57 }
 0x488   : > { %v6332_v19 = vadd.f32 %v6331_v12, %v4673_v27  ;;  %v6272_v1 = vpop.f32.mrb[254].mxu1 }
 0x489   : > { %v4798_v42 = vmax.f32 %v6330_v2, 0.0  ;;  %v6334_v14 = vadd.f32 %v6333_v8, %v6272_v1  ;;  %v4676_v6 = vpop.f32.mrb[255].mxu1 }
 0x48a   : > { %v4796_v29 = vmax.f32 %v6332_v19, 0.0  ;;  %v6336_v5 = vadd.f32 %v6335_v3, %v4676_v6 }
 0x48b   : > { %4830 = vst [vmem:[%s9020_s18 + $0x70] sm:$0xff] %v4798_v42  ;;  %v4799_v25 = vmax.f32 %v6334_v14, 0.0  ;;  %v6365_v14 = vadd.f32 %v9008_v39, %v9002_v32 }
 0x48c   : > { %4828 = vst [vmem:[%s9020_s18 + $0x60] sm:$0xff] %v4796_v29  ;;  %v4797_v45 = vmax.f32 %v6336_v5, 0.0  ;;  %v6367_v5 = vadd.f32 %v9008_v39, %v8996_v7 }
 0x48d   : > { %4831 = vst [vmem:[%s9020_s18 + $0x78] sm:$0xff] %v4799_v25 }
 0x48e   : > { %4829 = vst [vmem:[%s9020_s18 + $0x68] sm:$0xff] %v4797_v45  ;;  %v6275_v48 = vpop.f32.mrb[0].mxu1 }
 0x48f   : > { %v6338_v37 = vadd.f32 %v6337_v28, %v6275_v48  ;;  %v4689_v55 = vpop.f32.mrb[1].mxu1 }
 0x490   : > { %v6340_v33 = vadd.f32 %v6339_v47, %v4689_v55  ;;  %v6276_v24 = vpop.f32.mrb[2].mxu1 }
 0x491   : > { %v4802_v40 = vmax.f32 %v6338_v37, 0.0  ;;  %v6342_v58 = vadd.f32 %v6341_v46, %v6276_v24  ;;  %v4692_v53 = vpop.f32.mrb[3].mxu1 }
 0x492   : > { %v4800_v51 = vmax.f32 %v6340_v33, 0.0  ;;  %v6344_v17 = vadd.f32 %v6343_v15, %v4692_v53 }
 0x493   : > { %4834 = vst [vmem:[%s9020_s18 + $0x90] sm:$0xff] %v4802_v40  ;;  %v4803_v13 = vmax.f32 %v6342_v58, 0.0 }
 0x494   : > { %4832 = vst [vmem:[%s9020_s18 + $0x80] sm:$0xff] %v4800_v51  ;;  %v4801_v52 = vmax.f32 %v6344_v17, 0.0 }
 0x495   : > { %4835 = vst [vmem:[%s9020_s18 + $0x98] sm:$0xff] %v4803_v13 }
 0x496   : > { %4833 = vst [vmem:[%s9020_s18 + $0x88] sm:$0xff] %v4801_v52  ;;  %v6279_v20 = vpop.f32.mrb[4].mxu1 }
 0x497   : > { %v6346_v41 = vadd.f32 %v6345_v38, %v6279_v20  ;;  %v4705_v10 = vpop.f32.mrb[5].mxu1 }
 0x498   : > { %v6348_v18 = vadd.f32 %v6347_v44, %v4705_v10  ;;  %v6280_v31 = vpop.f32.mrb[6].mxu1 }
 0x499   : > { %v4806_v49 = vmax.f32 %v6346_v41, 0.0  ;;  %v6350_v36 = vadd.f32 %v6349_v23, %v6280_v31  ;;  %v4708_v35 = vpop.f32.mrb[7].mxu1 }
 0x49a   : > { %v4804_v9 = vmax.f32 %v6348_v18, 0.0  ;;  %v6352_v34 = vadd.f32 %v6351_v22, %v4708_v35 }
 0x49b   : > { %4838 = vst [vmem:[%s9020_s18 + $0xb0] sm:$0xff] %v4806_v49  ;;  %v4807_v59 = vmax.f32 %v6350_v36, 0.0 }
 0x49c   : > { %4836 = vst [vmem:[%s9020_s18 + $0xa0] sm:$0xff] %v4804_v9  ;;  %v4805_v60 = vmax.f32 %v6352_v34, 0.0 }
 0x49d   : > { %4839 = vst [vmem:[%s9020_s18 + $0xb8] sm:$0xff] %v4807_v59 }
 0x49e   : > { %4837 = vst [vmem:[%s9020_s18 + $0xa8] sm:$0xff] %v4805_v60  ;;  %v6283_v62 = vpop.f32.mrb[8].mxu1 }
 0x49f   : > { %v6354_v21 = vadd.f32 %v6353_v4, %v6283_v62  ;;  %v4721_v63 = vpop.f32.mrb[9].mxu1 }
 0x4a0   : > { %v6356_v0 = vadd.f32 %v6355_v26, %v4721_v63  ;;  %v6284_v50 = vpop.f32.mrb[10].mxu1 }
 0x4a1   : > { %v4810_v12 = vmax.f32 %v6354_v21, 0.0  ;;  %v6358_v54 = vadd.f32 %v6357_v61, %v6284_v50  ;;  %v4724_v2 = vpop.f32.mrb[11].mxu1 }
 0x4a2   : > { %v4808_v27 = vmax.f32 %v6356_v0, 0.0  ;;  %v6360_v8 = vadd.f32 %v6359_v16, %v4724_v2 }
 0x4a3   : > { %4842 = vst [vmem:[%s9020_s18 + $0xd0] sm:$0xff] %v4810_v12  ;;  %v4811_v43 = vmax.f32 %v6358_v54, 0.0 }
 0x4a4   : > { %4840 = vst [vmem:[%s9020_s18 + $0xc0] sm:$0xff] %v4808_v27  ;;  %v4809_v19 = vmax.f32 %v6360_v8, 0.0 }
 0x4a5   : > { %4843 = vst [vmem:[%s9020_s18 + $0xd8] sm:$0xff] %v4811_v43 }
 0x4a6   : > { %4841 = vst [vmem:[%s9020_s18 + $0xc8] sm:$0xff] %v4809_v19  ;;  %v6287_v1 = vpop.f32.mrb[12].mxu1 }
 0x4a7   : > { %v6362_v3 = vadd.f32 %v6361_v11, %v6287_v1  ;;  %v4737_v42 = vpop.f32.mrb[13].mxu1 }
 0x4a8   : > { %v6364_v6 = vadd.f32 %v6363_v56, %v4737_v42  ;;  %v6288_v29 = vpop.f32.mrb[14].mxu1 }
 0x4a9   : > { %v4814_v30 = vmax.f32 %v6362_v3, 0.0  ;;  %v6366_v25 = vadd.f32 %v6365_v14, %v6288_v29  ;;  %v4740_v57 = vpop.f32.mrb[15].mxu1 }
 0x4aa   : > { %v4812_v45 = vmax.f32 %v6364_v6, 0.0  ;;  %v6368_v28 = vadd.f32 %v6367_v5, %v4740_v57 }
 0x4ab   : > { %4846 = vst [vmem:[%s9020_s18 + $0xf0] sm:$0xff] %v4814_v30  ;;  %v4815_v48 = vmax.f32 %v6366_v25, 0.0 }
 0x4ac   : > { %4844 = vst [vmem:[%s9020_s18 + $0xe0] sm:$0xff] %v4812_v45  ;;  %v4813_v7 = vmax.f32 %v6368_v28, 0.0 }
 0x4ad   : > { %4847 = vst [vmem:[%s9020_s18 + $0xf8] sm:$0xff] %v4815_v48 }
 0x4ae   : > { %4845 = vst [vmem:[%s9020_s18 + $0xe8] sm:$0xff] %v4813_v7 }
 0x4af   : > { %6675 = shalt.err (!%p6672_p7)
}
 0x4b0   : > { %s6676_s8 = scalar_lea.hbm %s9112_s13, 4096  ;;  %s6680_s17 = scalar_lea.hbm %s9169_s7, 8192 }
 0x4b1   : > { %p6677_p8 = scmp.ne.s32.totalorder %s9112_s13, %s6676_s8  ;;  %p6681_p1 = scmp.lt.u32.totalorder %s9112_s13, %s9169_s7 }
 0x4b2   : > { %p6682_p0 = scmp.lt.u32.totalorder %s6680_s17, %s6676_s8  ;;  %p6684_p6 = scmp.lt.u32.totalorder %s6676_s8, %s9112_s13 }
 0x4b3   : > { %p6678_p11 = pnand %p6677_p8, %p9295_p9 }
 0x4b4   : > { %p6683_p5 = por %p6682_p0, %p6681_p1 }
 0x4b5   : > { %p6679_p13 = pneg %p6678_p11 }
 0x4b6   : > { %p6685_p10 = por %p6684_p6, %p6683_p5 }
 0x4b8   : > { %p6686_p12 = pnand %p6685_p10, %p6679_p13 }
 0x4ba   : > { %6689 = shalt.err (!%p6686_p12)
}
 0x4bb   : > { %s6735_s20 = smov 128   ;;  %s6736_s23 = smov 8  }
 0x4bc   : > { %6406 = dma.vmem_to_hbm [thread:$0]  (%p9295_p9), %s9114_s16, 4096, %s9112_s13, %s9121_s28, %s6735_s20, %s6735_s20, %s6736_s23  }
 0x4bd PF: > { %p6418_p2 = scmp.ge.s32.totalorder %s6728_s27, 2  ;;  %s4877_s15 = sand.u32 1, %s6716_s24  }
 0x4be   : > { %p9296_p3 = scmp.ne.s32.totalorder %s9219_s12, 0  ;;  %s4878_s21 = scalar_lea.sflag [#allocation4], %s4877_s15 }
 0x4c0   : > { %p6413_p4 = pnand %p6418_p2, %p9296_p3 }
 0x4c2   : > { %6711 = dma.done.wait (!%p6413_p4), %s4878_s21, 4096  }
 0x4c3   : > { %6713 = vsyncadd (!%p6413_p4), %s4878_s21, 4294963200  ;;  %p18_p7 = scmp.ge.s32.totalorder %s6802_s30, 4   ;;  %s9297_s24 = smov %s6720_s25 }
 0x4c4   : > { %s9298_s25 = smov %s6724_s26  ;;  %s9299_s26 = smov %s6813_s10 }
 0x4c5   : > { %s9300_s27 = smov %s6802_s30  ;;  %20 = sbr.rel (!%p18_p7) target bundleno = 4 (0x4), region = 88 }
 0x4cc   :  { %4883 = vsyncpa [#allocation3], 1 }
 0x4cd   :  { %4885 = vsyncpa [#allocation3 + $0x1], 1 }
 0x4ce   :  { %4886 = vsyncpa [#allocation4], 1 }
 0x4cf   :  { %4888 = vsyncpa [#allocation4 + $0x1], 1 }

</bundles_post_ra>
